<compile_context>
chip_gen: v5e
topology: v5e:2x2
jax: 0.10.0
libtpu: 0.0.40
codegen_flags: <defaults>
</compile_context>

<pallas_src>
import jax
import jax.numpy as jnp
from jax import lax
from jax.experimental import pallas as pl
from jax.experimental.pallas import tpu as pltpu

LANE = 128  # TPU lane width; hidden/output feature dims are zero-padded to this


# ----------------------------------------------------------------------------
# Kernel: whole decode sequence in one invocation (grid=(1,)).
# ----------------------------------------------------------------------------
def char_rnn_seq_kernel(
    emb_ref,     # (T, B, H)   un-padded embedded token stream
    h0_ref,      # (B, HP)     initial hidden state (padded lanes are zero)
    w_gx_ref,    # (H, 4HP)    input->gates  columns [r | z | i_n | 0]
    w_gh_ref,    # (HP, 4HP)   hidden->gates columns [r | z | 0 | h_n]
    b_g_ref,     # (1, 4HP)    fused gate bias
    w_attn_ref,  # (HP, HP)    attn Linear, (in, out) layout
    b_attn_ref,  # (1, HP)
    w_cdh_ref,   # (HP, OP)    folded attn_combine@decoder, h_new half
    w_cda_ref,   # (HP, OP)    folded attn_combine@decoder, attn_applied half
    b_cd_ref,    # (1, OP)
    logits_ref,  # (T, B, OP)  per-step logits (output)
    h_out_ref,   # (B, HP)     final hidden state (output, aliased onto h0)
):
    T = emb_ref.shape[0]
    HP = h0_ref.shape[-1]

    def step(t, h):
        x = emb_ref[t]                                        # (B, H)

        # --- GRU cell: two accumulating dots, gates lane-aligned -----------
        g = (jnp.dot(x, w_gx_ref[...], preferred_element_type=jnp.float32)
             + jnp.dot(h, w_gh_ref[...], preferred_element_type=jnp.float32)
             + b_g_ref[...])                                  # (B, 4HP)
        r = jax.nn.sigmoid(g[:, 0:HP])
        z = jax.nn.sigmoid(g[:, HP:2 * HP])
        n = jnp.tanh(g[:, 2 * HP:3 * HP] + r * g[:, 3 * HP:4 * HP])
        h_new = (1.0 - z) * n + z * h

        # --- attention (seq_len == 1): tanh(Linear(h_new)) * h_new ---------
        attn_w = jnp.tanh(
            jnp.dot(h_new, w_attn_ref[...], preferred_element_type=jnp.float32)
            + b_attn_ref[...])
        attn_applied = attn_w * h_new

        # --- folded attn_combine + decoder: two dots, no concat scratch ----
        logits = (
            jnp.dot(h_new, w_cdh_ref[...], preferred_element_type=jnp.float32)
            + jnp.dot(attn_applied, w_cda_ref[...], preferred_element_type=jnp.float32)
            + b_cd_ref[...])
        logits_ref[t] = logits
        return h_new                                          # carry stays in vregs

    h_final = lax.fori_loop(0, T, step, h0_ref[...], unroll=True)
    h_out_ref[...] = h_final                                  # single store at the end


# ----------------------------------------------------------------------------
# Parameters: PyTorch-layout init + one-time packing for the kernel.
# ----------------------------------------------------------------------------
def init_params(key, vocab_size, hidden_size, output_size):
    """Raw parameters in PyTorch layout (Linear/GRU weights are (out, in))."""
    ks = jax.random.split(key, 11)
    stdv = 1.0 / (hidden_size ** 0.5)

    def u(k, shape):
        return jax.random.uniform(k, shape, jnp.float32, -stdv, stdv)

    return dict(
        embedding=jax.random.normal(ks[0], (vocab_size, hidden_size), jnp.float32),
        w_ih=u(ks[1], (3 * hidden_size, hidden_size)),        # GRU weight_ih_l0 [r;z;n]
        w_hh=u(ks[2], (3 * hidden_size, hidden_size)),        # GRU weight_hh_l0 [r;z;n]
        b_ih=u(ks[3], (3 * hidden_size,)),
        b_hh=u(ks[4], (3 * hidden_size,)),
        w_attn=u(ks[5], (hidden_size, hidden_size)),          # attn Linear
        b_attn=u(ks[6], (hidden_size,)),
        w_combine=u(ks[7], (hidden_size, 2 * hidden_size)),   # attn_combine Linear
        b_combine=u(ks[8], (hidden_size,)),
        w_dec=u(ks[9], (output_size, hidden_size)),           # decoder Linear
        b_dec=u(ks[10], (output_size,)),
    )


def prepare_params(params, lane=LANE):
    """One-time: transpose to (in,out), split/fuse/fold, zero-pad to lane width."""
    H = params["w_attn"].shape[0]
    O = params["b_dec"].shape[0]
    HP = ((H + lane - 1) // lane) * lane
    OP = ((O + lane - 1) // lane) * lane
    f32 = jnp.float32
    hi = jax.lax.Precision.HIGHEST

    w_ih, w_hh = params["w_ih"], params["w_hh"]   # (3H, H), gate order [r, z, n]
    b_ih, b_hh = params["b_ih"], params["b_hh"]   # (3H,)

    # Input->gates: x (B,H) @ w_gx -> [W_ir x | W_iz x | W_in x | 0]
    w_gx = jnp.zeros((H, 4 * HP), f32)
    w_gx = w_gx.at[:, 0:H].set(w_ih[0:H].T)
    w_gx = w_gx.at[:, HP:HP + H].set(w_ih[H:2 * H].T)
    w_gx = w_gx.at[:, 2 * HP:2 * HP + H].set(w_ih[2 * H:3 * H].T)

    # Hidden->gates: h (B,HP) @ w_gh -> [W_hr h | W_hz h | 0 | W_hn h]
    w_gh = jnp.zeros((HP, 4 * HP), f32)
    w_gh = w_gh.at[0:H, 0:H].set(w_hh[0:H].T)
    w_gh = w_gh.at[0:H, HP:HP + H].set(w_hh[H:2 * H].T)
    w_gh = w_gh.at[0:H, 3 * HP:3 * HP + H].set(w_hh[2 * H:3 * H].T)

    b_g = jnp.zeros((1, 4 * HP), f32)
    b_g = b_g.at[0, 0:H].set(b_ih[0:H] + b_hh[0:H])
    b_g = b_g.at[0, HP:HP + H].set(b_ih[H:2 * H] + b_hh[H:2 * H])
    b_g = b_g.at[0, 2 * HP:2 * HP + H].set(b_ih[2 * H:3 * H])
    b_g = b_g.at[0, 3 * HP:3 * HP + H].set(b_hh[2 * H:3 * H])

    w_attn = jnp.zeros((HP, HP), f32).at[0:H, 0:H].set(params["w_attn"].T)
    b_attn = jnp.zeros((1, HP), f32).at[0, 0:H].set(params["b_attn"])

    # Fold attn_combine and decoder (no nonlinearity between them in the spec):
    #   logits = [h|a] @ Wc.T @ Wdec.T + (b_c @ Wdec.T + b_dec)
    w_cd_full = jnp.dot(params["w_combine"].T, params["w_dec"].T, precision=hi)  # (2H, O)
    b_cd_full = jnp.dot(params["b_combine"], params["w_dec"].T, precision=hi) + params["b_dec"]
    w_cdh = jnp.zeros((HP, OP), f32).at[0:H, 0:O].set(w_cd_full[0:H])
    w_cda = jnp.zeros((HP, OP), f32).at[0:H, 0:O].set(w_cd_full[H:2 * H])
    b_cd = jnp.zeros((1, OP), f32).at[0, 0:O].set(b_cd_full)

    return dict(embedding=params["embedding"].astype(f32),   # un-padded (V, H)
                w_gx=w_gx, w_gh=w_gh, b_g=b_g, w_attn=w_attn, b_attn=b_attn,
                w_cdh=w_cdh, w_cda=w_cda, b_cd=b_cd, H=H, O=O, HP=HP, OP=OP)


# ----------------------------------------------------------------------------
# Wrappers.
# ----------------------------------------------------------------------------
def char_rnn_forward_seq(tokens_tb, hidden, prepared):
    """tokens_tb: (T, B) int32; hidden: (1, B, H) f32.
    Runs the whole sequence in ONE pallas_call (time loop inside the kernel).
    Returns (logits (T, B, O), final hidden (1, B, H))."""
    T, B = tokens_tb.shape
    H, O, HP, OP = prepared["H"], prepared["O"], prepared["HP"], prepared["OP"]
    BP = max(8, ((B + 7) // 8) * 8)   # fill the f32 sublanes / MXU rows

    # Un-padded embedding gather (one XLA gather) -- no lane-inflated HBM stream.
    tokens_pad = jnp.zeros((T, BP), jnp.int32).at[:, :B].set(tokens_tb)
    emb_seq = prepared["embedding"][tokens_pad]                       # (T, BP, H)
    # Padded lanes/rows of h0 must be exactly zero (see invariant note above).
    h0 = jnp.zeros((BP, HP), jnp.float32).at[:B, :H].set(hidden[0].astype(jnp.float32))

    flops = 2 * T * BP * (H * 4 * HP + HP * 4 * HP + HP * HP + 2 * HP * OP)
    transcendentals = 4 * T * BP * HP
    bytes_accessed = 4 * (H * 4 * HP + HP * 4 * HP + 4 * HP + HP * HP + HP
                          + 2 * HP * OP + OP + 2 * BP * HP + T * BP * (H + OP))

    def full(shape):
        return pl.BlockSpec(shape, lambda i, _s=len(shape): (0,) * _s)

    logits_pad, h_out = pl.pallas_call(
        char_rnn_seq_kernel,
        grid=(1,),
        in_specs=[
            full((T, BP, H)),        # embedded token stream (full block, VMEM)
            full((BP, HP)),          # h0
            full((H, 4 * HP)),       # w_gx
            full((HP, 4 * HP)),      # w_gh
            full((1, 4 * HP)),       # b_g
            full((HP, HP)),          # w_attn
            full((1, HP)),           # b_attn
            full((HP, OP)),          # w_cdh (folded)
            full((HP, OP)),          # w_cda (folded)
            full((1, OP)),           # b_cd  (folded)
        ],
        out_specs=(
            full((T, BP, OP)),       # per-step logits
            full((BP, HP)),          # final hidden
        ),
        out_shape=(
            jax.ShapeDtypeStruct((T, BP, OP), jnp.float32),
            jax.ShapeDtypeStruct((BP, HP), jnp.float32),
        ),
        input_output_aliases={1: 1},   # reuse h0's HBM buffer for h_out
        compiler_params=pltpu.CompilerParams(
            dimension_semantics=("arbitrary",)),   # recurrence -> sequential
        cost_estimate=pl.CostEstimate(
            flops=flops, transcendentals=transcendentals,
            bytes_accessed=bytes_accessed),
    )(emb_seq, h0, prepared["w_gx"], prepared["w_gh"], prepared["b_g"],
      prepared["w_attn"], prepared["b_attn"],
      prepared["w_cdh"], prepared["w_cda"], prepared["b_cd"])

    return logits_pad[:, :B, :O], h_out[None, :B, :H]


def char_rnn_forward(tokens, hidden, prepared):
    """Single-step forward matching CharRNN.forward:
    tokens (B,) int32, hidden (1, B, H) -> (logits (B, O), hidden (1, B, H))."""
    logits_seq, hidden_new = char_rnn_forward_seq(tokens[None, :], hidden, prepared)
    return logits_seq[0], hidden_new


# ----------------------------------------------------------------------------
# Pure-JAX reference (unfused, unpadded) for correctness checking.
# ----------------------------------------------------------------------------
def char_rnn_reference(tokens_tb, hidden, params):
    H = params["w_attn"].shape[0]

    def step(h, tok):
        x = params["embedding"][tok]                       # (B, H)
        gi = x @ params["w_ih"].T + params["b_ih"]
        gh = h @ params["w_hh"].T + params["b_hh"]
        r = jax.nn.sigmoid(gi[:, 0:H] + gh[:, 0:H])
        z = jax.nn.sigmoid(gi[:, H:2 * H] + gh[:, H:2 * H])
        n = jnp.tanh(gi[:, 2 * H:] + r * gh[:, 2 * H:])
        h_new = (1.0 - z) * n + z * h
        attn_w = jnp.tanh(h_new @ params["w_attn"].T + params["b_attn"])
        attn_applied = attn_w * h_new
        comb = (jnp.concatenate([h_new, attn_applied], axis=-1)
                @ params["w_combine"].T + params["b_combine"])
        logits = comb @ params["w_dec"].T + params["b_dec"]
        return h_new, logits

    h_final, logits_seq = jax.lax.scan(step, hidden[0], tokens_tb)
    return logits_seq, h_final[None]


if __name__ == "__main__":
    vocab_size, hidden_size, output_size = 16, 32, 16
    batch, seq_len, n_layers = 2, 8, 1

    key = jax.random.PRNGKey(0)
    k_params, k_tok = jax.random.split(key)
    params = init_params(k_params, vocab_size, hidden_size, output_size)
    prepared = prepare_params(params)          # one-time weight packing

    tokens_seq = jax.random.randint(k_tok, (seq_len, batch), 0, vocab_size,
                                    dtype=jnp.int32)
    hidden0 = jnp.zeros((n_layers, batch, hidden_size), jnp.float32)  # init_hidden

    fwd_seq = jax.jit(lambda toks, hid: char_rnn_forward_seq(toks, hid, prepared))
    fwd_step = jax.jit(lambda toks, hid: char_rnn_forward(toks, hid, prepared))

    logits_seq, hidden_T = fwd_seq(tokens_seq, hidden0)     # whole sequence, 1 launch
    logits_1, hidden_1 = fwd_step(tokens_seq[0], hidden0)   # spec's single-step forward
    jax.block_until_ready((logits_seq, hidden_T, logits_1, hidden_1))

    assert logits_seq.shape == (seq_len, batch, output_size)
    assert hidden_T.shape == (n_layers, batch, hidden_size)
    assert logits_1.shape == (batch, output_size)
    assert hidden_1.shape == (n_layers, batch, hidden_size)

    # Numerical check vs. the unfused pure-JAX reference (loose tolerance to
    # absorb default TPU matmul precision differences from fusion/folding).
    ref_logits, ref_hidden = char_rnn_reference(tokens_seq, hidden0, params)
    assert jnp.allclose(logits_seq, ref_logits, atol=5e-2, rtol=5e-2)
    assert jnp.allclose(hidden_T, ref_hidden, atol=5e-2, rtol=5e-2)
    assert jnp.allclose(logits_1, ref_logits[0], atol=5e-2, rtol=5e-2)

    print("KERNEL_OK")
</pallas_src>

<mosaic_0001>
module attributes {stable_mosaic.version = 11 : i64} {
  func.func @char_rnn_seq_kernel(%arg0: i32, %arg1: memref<8x8x32xf32, #tpu.memory_space<vmem>>, %arg2: memref<8x128xf32, #tpu.memory_space<vmem>>, %arg3: memref<32x512xf32, #tpu.memory_space<vmem>>, %arg4: memref<128x512xf32, #tpu.memory_space<vmem>>, %arg5: memref<1x512xf32, #tpu.memory_space<vmem>>, %arg6: memref<128x128xf32, #tpu.memory_space<vmem>>, %arg7: memref<1x128xf32, #tpu.memory_space<vmem>>, %arg8: memref<128x128xf32, #tpu.memory_space<vmem>>, %arg9: memref<128x128xf32, #tpu.memory_space<vmem>>, %arg10: memref<1x128xf32, #tpu.memory_space<vmem>>, %arg11: memref<8x8x128xf32, #tpu.memory_space<vmem>>, %arg12: memref<8x128xf32, #tpu.memory_space<vmem>>) attributes {dimension_semantics = [#tpu.dimension_semantics<arbitrary>], iteration_bounds = array<i64: 1>, scalar_prefetch = 0 : i64, scratch_operands = 0 : i64, tpu.core_type = #tpu.core_type<tc>, window_params = [{pipeline_mode = #tpu.pipeline_mode<synchronous>, transform_indices = @transform_0, window_bounds = array<i64: 8, 8, 32>}, {pipeline_mode = #tpu.pipeline_mode<synchronous>, transform_indices = @transform_1, window_bounds = array<i64: 8, 128>}, {pipeline_mode = #tpu.pipeline_mode<synchronous>, transform_indices = @transform_2, window_bounds = array<i64: 32, 512>}, {pipeline_mode = #tpu.pipeline_mode<synchronous>, transform_indices = @transform_3, window_bounds = array<i64: 128, 512>}, {pipeline_mode = #tpu.pipeline_mode<synchronous>, transform_indices = @transform_4, window_bounds = array<i64: 1, 512>}, {pipeline_mode = #tpu.pipeline_mode<synchronous>, transform_indices = @transform_5, window_bounds = array<i64: 128, 128>}, {pipeline_mode = #tpu.pipeline_mode<synchronous>, transform_indices = @transform_6, window_bounds = array<i64: 1, 128>}, {pipeline_mode = #tpu.pipeline_mode<synchronous>, transform_indices = @transform_7, window_bounds = array<i64: 128, 128>}, {pipeline_mode = #tpu.pipeline_mode<synchronous>, transform_indices = @transform_8, window_bounds = array<i64: 128, 128>}, {pipeline_mode = #tpu.pipeline_mode<synchronous>, transform_indices = @transform_9, window_bounds = array<i64: 1, 128>}, {pipeline_mode = #tpu.pipeline_mode<synchronous>, transform_indices = @transform_10, window_bounds = array<i64: 8, 8, 128>}, {pipeline_mode = #tpu.pipeline_mode<synchronous>, transform_indices = @transform_11, window_bounds = array<i64: 8, 128>}]} {
    %c0 = arith.constant 0 : index
    %c0_0 = arith.constant 0 : index
    %0 = vector.load %arg2[%c0, %c0_0] : memref<8x128xf32, #tpu.memory_space<vmem>>, vector<8x128xf32>
    %c0_i32 = arith.constant 0 : i32
    %1 = arith.index_cast %c0_i32 : i32 to index
    %c0_1 = arith.constant 0 : index
    %c0_2 = arith.constant 0 : index
    %2 = vector.load %arg1[%1, %c0_1, %c0_2] : memref<8x8x32xf32, #tpu.memory_space<vmem>>, vector<1x8x32xf32>
    %3 = vector.shape_cast %2 : vector<1x8x32xf32> to vector<8x32xf32>
    %c0_3 = arith.constant 0 : index
    %c0_4 = arith.constant 0 : index
    %4 = vector.load %arg3[%c0_3, %c0_4] : memref<32x512xf32, #tpu.memory_space<vmem>>, vector<32x512xf32>
    %cst = arith.constant dense<0.000000e+00> : vector<8x512xf32>
    %5 = tpu.matmul %3, %4, %cst {dimension_numbers = #tpu.dot_dimension_numbers<[1], [0], [0], [1], [0, 0, 1, 1], [], []>} : vector<8x32xf32>, vector<32x512xf32>, vector<8x512xf32> -> vector<8x512xf32>
    %c0_5 = arith.constant 0 : index
    %c0_6 = arith.constant 0 : index
    %6 = vector.load %arg4[%c0_5, %c0_6] : memref<128x512xf32, #tpu.memory_space<vmem>>, vector<128x512xf32>
    %cst_7 = arith.constant dense<0.000000e+00> : vector<8x512xf32>
    %7 = tpu.matmul %0, %6, %cst_7 {dimension_numbers = #tpu.dot_dimension_numbers<[1], [0], [0], [1], [0, 0, 1, 1], [], []>} : vector<8x128xf32>, vector<128x512xf32>, vector<8x512xf32> -> vector<8x512xf32>
    %8 = arith.addf %5, %7 : vector<8x512xf32>
    %c0_8 = arith.constant 0 : index
    %c0_9 = arith.constant 0 : index
    %9 = vector.load %arg5[%c0_8, %c0_9] : memref<1x512xf32, #tpu.memory_space<vmem>>, vector<1x512xf32>
    %10 = vector.broadcast %9 : vector<1x512xf32> to vector<8x512xf32>
    %11 = arith.addf %8, %10 : vector<8x512xf32>
    %12 = vector.extract_strided_slice %11 {offsets = [0, 0], sizes = [8, 128], strides = [1, 1]} : vector<8x512xf32> to vector<8x128xf32>
    %13 = arith.negf %12 : vector<8x128xf32>
    %14 = math.exp %13 : vector<8x128xf32>
    %cst_10 = arith.constant 1.000000e+00 : f32
    %15 = vector.broadcast %cst_10 : f32 to vector<8x128xf32>
    %16 = arith.addf %15, %14 : vector<8x128xf32>
    %17 = arith.divf %15, %16 : vector<8x128xf32>
    %18 = vector.extract_strided_slice %11 {offsets = [0, 128], sizes = [8, 128], strides = [1, 1]} : vector<8x512xf32> to vector<8x128xf32>
    %19 = arith.negf %18 : vector<8x128xf32>
    %20 = math.exp %19 : vector<8x128xf32>
    %cst_11 = arith.constant 1.000000e+00 : f32
    %21 = vector.broadcast %cst_11 : f32 to vector<8x128xf32>
    %22 = arith.addf %21, %20 : vector<8x128xf32>
    %23 = arith.divf %21, %22 : vector<8x128xf32>
    %24 = vector.extract_strided_slice %11 {offsets = [0, 256], sizes = [8, 128], strides = [1, 1]} : vector<8x512xf32> to vector<8x128xf32>
    %25 = vector.extract_strided_slice %11 {offsets = [0, 384], sizes = [8, 128], strides = [1, 1]} : vector<8x512xf32> to vector<8x128xf32>
    %26 = arith.mulf %17, %25 : vector<8x128xf32>
    %27 = arith.addf %24, %26 : vector<8x128xf32>
    %28 = math.tanh %27 : vector<8x128xf32>
    %cst_12 = arith.constant 1.000000e+00 : f32
    %29 = vector.broadcast %cst_12 : f32 to vector<8x128xf32>
    %30 = arith.subf %29, %23 : vector<8x128xf32>
    %31 = arith.mulf %30, %28 : vector<8x128xf32>
    %32 = arith.mulf %23, %0 : vector<8x128xf32>
    %33 = arith.addf %31, %32 : vector<8x128xf32>
    %c0_13 = arith.constant 0 : index
    %c0_14 = arith.constant 0 : index
    %34 = vector.load %arg6[%c0_13, %c0_14] : memref<128x128xf32, #tpu.memory_space<vmem>>, vector<128x128xf32>
    %cst_15 = arith.constant dense<0.000000e+00> : vector<8x128xf32>
    %35 = tpu.matmul %33, %34, %cst_15 {dimension_numbers = #tpu.dot_dimension_numbers<[1], [0], [0], [1], [0, 0, 1, 1], [], []>} : vector<8x128xf32>, vector<128x128xf32>, vector<8x128xf32> -> vector<8x128xf32>
    %c0_16 = arith.constant 0 : index
    %c0_17 = arith.constant 0 : index
    %36 = vector.load %arg7[%c0_16, %c0_17] : memref<1x128xf32, #tpu.memory_space<vmem>>, vector<1x128xf32>
    %37 = vector.broadcast %36 : vector<1x128xf32> to vector<8x128xf32>
    %38 = arith.addf %35, %37 : vector<8x128xf32>
    %39 = math.tanh %38 : vector<8x128xf32>
    %40 = arith.mulf %39, %33 : vector<8x128xf32>
    %c0_18 = arith.constant 0 : index
    %c0_19 = arith.constant 0 : index
    %41 = vector.load %arg8[%c0_18, %c0_19] : memref<128x128xf32, #tpu.memory_space<vmem>>, vector<128x128xf32>
    %cst_20 = arith.constant dense<0.000000e+00> : vector<8x128xf32>
    %42 = tpu.matmul %33, %41, %cst_20 {dimension_numbers = #tpu.dot_dimension_numbers<[1], [0], [0], [1], [0, 0, 1, 1], [], []>} : vector<8x128xf32>, vector<128x128xf32>, vector<8x128xf32> -> vector<8x128xf32>
    %c0_21 = arith.constant 0 : index
    %c0_22 = arith.constant 0 : index
    %43 = vector.load %arg9[%c0_21, %c0_22] : memref<128x128xf32, #tpu.memory_space<vmem>>, vector<128x128xf32>
    %cst_23 = arith.constant dense<0.000000e+00> : vector<8x128xf32>
    %44 = tpu.matmul %40, %43, %cst_23 {dimension_numbers = #tpu.dot_dimension_numbers<[1], [0], [0], [1], [0, 0, 1, 1], [], []>} : vector<8x128xf32>, vector<128x128xf32>, vector<8x128xf32> -> vector<8x128xf32>
    %45 = arith.addf %42, %44 : vector<8x128xf32>
    %c0_24 = arith.constant 0 : index
    %c0_25 = arith.constant 0 : index
    %46 = vector.load %arg10[%c0_24, %c0_25] : memref<1x128xf32, #tpu.memory_space<vmem>>, vector<1x128xf32>
    %47 = vector.broadcast %46 : vector<1x128xf32> to vector<8x128xf32>
    %48 = arith.addf %45, %47 : vector<8x128xf32>
    %49 = arith.index_cast %c0_i32 : i32 to index
    %c0_26 = arith.constant 0 : index
    %c0_27 = arith.constant 0 : index
    %50 = vector.load %arg11[%49, %c0_26, %c0_27] : memref<8x8x128xf32, #tpu.memory_space<vmem>>, vector<1x8x128xf32>
    %51 = vector.shape_cast %50 : vector<1x8x128xf32> to vector<8x128xf32>
    %52 = vector.shape_cast %48 : vector<8x128xf32> to vector<1x8x128xf32>
    tpu.vector_store %arg11[%49, %c0_26, %c0_27], %52 {strides = array<i32>} : memref<8x8x128xf32, #tpu.memory_space<vmem>>, vector<1x8x128xf32>,
    %c1_i32 = arith.constant 1 : i32
    %53 = arith.index_cast %c1_i32 : i32 to index
    %c0_28 = arith.constant 0 : index
    %c0_29 = arith.constant 0 : index
    %54 = vector.load %arg1[%53, %c0_28, %c0_29] : memref<8x8x32xf32, #tpu.memory_space<vmem>>, vector<1x8x32xf32>
    %55 = vector.shape_cast %54 : vector<1x8x32xf32> to vector<8x32xf32>
    %c0_30 = arith.constant 0 : index
    %c0_31 = arith.constant 0 : index
    %56 = vector.load %arg3[%c0_30, %c0_31] : memref<32x512xf32, #tpu.memory_space<vmem>>, vector<32x512xf32>
    %cst_32 = arith.constant dense<0.000000e+00> : vector<8x512xf32>
    %57 = tpu.matmul %55, %56, %cst_32 {dimension_numbers = #tpu.dot_dimension_numbers<[1], [0], [0], [1], [0, 0, 1, 1], [], []>} : vector<8x32xf32>, vector<32x512xf32>, vector<8x512xf32> -> vector<8x512xf32>
    %c0_33 = arith.constant 0 : index
    %c0_34 = arith.constant 0 : index
    %58 = vector.load %arg4[%c0_33, %c0_34] : memref<128x512xf32, #tpu.memory_space<vmem>>, vector<128x512xf32>
    %cst_35 = arith.constant dense<0.000000e+00> : vector<8x512xf32>
    %59 = tpu.matmul %33, %58, %cst_35 {dimension_numbers = #tpu.dot_dimension_numbers<[1], [0], [0], [1], [0, 0, 1, 1], [], []>} : vector<8x128xf32>, vector<128x512xf32>, vector<8x512xf32> -> vector<8x512xf32>
    %60 = arith.addf %57, %59 : vector<8x512xf32>
    %c0_36 = arith.constant 0 : index
    %c0_37 = arith.constant 0 : index
    %61 = vector.load %arg5[%c0_36, %c0_37] : memref<1x512xf32, #tpu.memory_space<vmem>>, vector<1x512xf32>
    %62 = vector.broadcast %61 : vector<1x512xf32> to vector<8x512xf32>
    %63 = arith.addf %60, %62 : vector<8x512xf32>
    %64 = vector.extract_strided_slice %63 {offsets = [0, 0], sizes = [8, 128], strides = [1, 1]} : vector<8x512xf32> to vector<8x128xf32>
    %65 = arith.negf %64 : vector<8x128xf32>
    %66 = math.exp %65 : vector<8x128xf32>
    %cst_38 = arith.constant 1.000000e+00 : f32
    %67 = vector.broadcast %cst_38 : f32 to vector<8x128xf32>
    %68 = arith.addf %67, %66 : vector<8x128xf32>
    %69 = arith.divf %67, %68 : vector<8x128xf32>
    %70 = vector.extract_strided_slice %63 {offsets = [0, 128], sizes = [8, 128], strides = [1, 1]} : vector<8x512xf32> to vector<8x128xf32>
    %71 = arith.negf %70 : vector<8x128xf32>
    %72 = math.exp %71 : vector<8x128xf32>
    %cst_39 = arith.constant 1.000000e+00 : f32
    %73 = vector.broadcast %cst_39 : f32 to vector<8x128xf32>
    %74 = arith.addf %73, %72 : vector<8x128xf32>
    %75 = arith.divf %73, %74 : vector<8x128xf32>
    %76 = vector.extract_strided_slice %63 {offsets = [0, 256], sizes = [8, 128], strides = [1, 1]} : vector<8x512xf32> to vector<8x128xf32>
    %77 = vector.extract_strided_slice %63 {offsets = [0, 384], sizes = [8, 128], strides = [1, 1]} : vector<8x512xf32> to vector<8x128xf32>
    %78 = arith.mulf %69, %77 : vector<8x128xf32>
    %79 = arith.addf %76, %78 : vector<8x128xf32>
    %80 = math.tanh %79 : vector<8x128xf32>
    %cst_40 = arith.constant 1.000000e+00 : f32
    %81 = vector.broadcast %cst_40 : f32 to vector<8x128xf32>
    %82 = arith.subf %81, %75 : vector<8x128xf32>
    %83 = arith.mulf %82, %80 : vector<8x128xf32>
    %84 = arith.mulf %75, %33 : vector<8x128xf32>
    %85 = arith.addf %83, %84 : vector<8x128xf32>
    %c0_41 = arith.constant 0 : index
    %c0_42 = arith.constant 0 : index
    %86 = vector.load %arg6[%c0_41, %c0_42] : memref<128x128xf32, #tpu.memory_space<vmem>>, vector<128x128xf32>
    %cst_43 = arith.constant dense<0.000000e+00> : vector<8x128xf32>
    %87 = tpu.matmul %85, %86, %cst_43 {dimension_numbers = #tpu.dot_dimension_numbers<[1], [0], [0], [1], [0, 0, 1, 1], [], []>} : vector<8x128xf32>, vector<128x128xf32>, vector<8x128xf32> -> vector<8x128xf32>
    %c0_44 = arith.constant 0 : index
    %c0_45 = arith.constant 0 : index
    %88 = vector.load %arg7[%c0_44, %c0_45] : memref<1x128xf32, #tpu.memory_space<vmem>>, vector<1x128xf32>
    %89 = vector.broadcast %88 : vector<1x128xf32> to vector<8x128xf32>
    %90 = arith.addf %87, %89 : vector<8x128xf32>
    %91 = math.tanh %90 : vector<8x128xf32>
    %92 = arith.mulf %91, %85 : vector<8x128xf32>
    %c0_46 = arith.constant 0 : index
    %c0_47 = arith.constant 0 : index
    %93 = vector.load %arg8[%c0_46, %c0_47] : memref<128x128xf32, #tpu.memory_space<vmem>>, vector<128x128xf32>
    %cst_48 = arith.constant dense<0.000000e+00> : vector<8x128xf32>
    %94 = tpu.matmul %85, %93, %cst_48 {dimension_numbers = #tpu.dot_dimension_numbers<[1], [0], [0], [1], [0, 0, 1, 1], [], []>} : vector<8x128xf32>, vector<128x128xf32>, vector<8x128xf32> -> vector<8x128xf32>
    %c0_49 = arith.constant 0 : index
    %c0_50 = arith.constant 0 : index
    %95 = vector.load %arg9[%c0_49, %c0_50] : memref<128x128xf32, #tpu.memory_space<vmem>>, vector<128x128xf32>
    %cst_51 = arith.constant dense<0.000000e+00> : vector<8x128xf32>
    %96 = tpu.matmul %92, %95, %cst_51 {dimension_numbers = #tpu.dot_dimension_numbers<[1], [0], [0], [1], [0, 0, 1, 1], [], []>} : vector<8x128xf32>, vector<128x128xf32>, vector<8x128xf32> -> vector<8x128xf32>
    %97 = arith.addf %94, %96 : vector<8x128xf32>
    %c0_52 = arith.constant 0 : index
    %c0_53 = arith.constant 0 : index
    %98 = vector.load %arg10[%c0_52, %c0_53] : memref<1x128xf32, #tpu.memory_space<vmem>>, vector<1x128xf32>
    %99 = vector.broadcast %98 : vector<1x128xf32> to vector<8x128xf32>
    %100 = arith.addf %97, %99 : vector<8x128xf32>
    %101 = arith.index_cast %c1_i32 : i32 to index
    %c0_54 = arith.constant 0 : index
    %c0_55 = arith.constant 0 : index
    %102 = vector.load %arg11[%101, %c0_54, %c0_55] : memref<8x8x128xf32, #tpu.memory_space<vmem>>, vector<1x8x128xf32>
    %103 = vector.shape_cast %102 : vector<1x8x128xf32> to vector<8x128xf32>
    %104 = vector.shape_cast %100 : vector<8x128xf32> to vector<1x8x128xf32>
    tpu.vector_store %arg11[%101, %c0_54, %c0_55], %104 {strides = array<i32>} : memref<8x8x128xf32, #tpu.memory_space<vmem>>, vector<1x8x128xf32>,
    %c2_i32 = arith.constant 2 : i32
    %105 = arith.index_cast %c2_i32 : i32 to index
    %c0_56 = arith.constant 0 : index
    %c0_57 = arith.constant 0 : index
    %106 = vector.load %arg1[%105, %c0_56, %c0_57] : memref<8x8x32xf32, #tpu.memory_space<vmem>>, vector<1x8x32xf32>
    %107 = vector.shape_cast %106 : vector<1x8x32xf32> to vector<8x32xf32>
    %c0_58 = arith.constant 0 : index
    %c0_59 = arith.constant 0 : index
    %108 = vector.load %arg3[%c0_58, %c0_59] : memref<32x512xf32, #tpu.memory_space<vmem>>, vector<32x512xf32>
    %cst_60 = arith.constant dense<0.000000e+00> : vector<8x512xf32>
    %109 = tpu.matmul %107, %108, %cst_60 {dimension_numbers = #tpu.dot_dimension_numbers<[1], [0], [0], [1], [0, 0, 1, 1], [], []>} : vector<8x32xf32>, vector<32x512xf32>, vector<8x512xf32> -> vector<8x512xf32>
    %c0_61 = arith.constant 0 : index
    %c0_62 = arith.constant 0 : index
    %110 = vector.load %arg4[%c0_61, %c0_62] : memref<128x512xf32, #tpu.memory_space<vmem>>, vector<128x512xf32>
    %cst_63 = arith.constant dense<0.000000e+00> : vector<8x512xf32>
    %111 = tpu.matmul %85, %110, %cst_63 {dimension_numbers = #tpu.dot_dimension_numbers<[1], [0], [0], [1], [0, 0, 1, 1], [], []>} : vector<8x128xf32>, vector<128x512xf32>, vector<8x512xf32> -> vector<8x512xf32>
    %112 = arith.addf %109, %111 : vector<8x512xf32>
    %c0_64 = arith.constant 0 : index
    %c0_65 = arith.constant 0 : index
    %113 = vector.load %arg5[%c0_64, %c0_65] : memref<1x512xf32, #tpu.memory_space<vmem>>, vector<1x512xf32>
    %114 = vector.broadcast %113 : vector<1x512xf32> to vector<8x512xf32>
    %115 = arith.addf %112, %114 : vector<8x512xf32>
    %116 = vector.extract_strided_slice %115 {offsets = [0, 0], sizes = [8, 128], strides = [1, 1]} : vector<8x512xf32> to vector<8x128xf32>
    %117 = arith.negf %116 : vector<8x128xf32>
    %118 = math.exp %117 : vector<8x128xf32>
    %cst_66 = arith.constant 1.000000e+00 : f32
    %119 = vector.broadcast %cst_66 : f32 to vector<8x128xf32>
    %120 = arith.addf %119, %118 : vector<8x128xf32>
    %121 = arith.divf %119, %120 : vector<8x128xf32>
    %122 = vector.extract_strided_slice %115 {offsets = [0, 128], sizes = [8, 128], strides = [1, 1]} : vector<8x512xf32> to vector<8x128xf32>
    %123 = arith.negf %122 : vector<8x128xf32>
    %124 = math.exp %123 : vector<8x128xf32>
    %cst_67 = arith.constant 1.000000e+00 : f32
    %125 = vector.broadcast %cst_67 : f32 to vector<8x128xf32>
    %126 = arith.addf %125, %124 : vector<8x128xf32>
    %127 = arith.divf %125, %126 : vector<8x128xf32>
    %128 = vector.extract_strided_slice %115 {offsets = [0, 256], sizes = [8, 128], strides = [1, 1]} : vector<8x512xf32> to vector<8x128xf32>
    %129 = vector.extract_strided_slice %115 {offsets = [0, 384], sizes = [8, 128], strides = [1, 1]} : vector<8x512xf32> to vector<8x128xf32>
    %130 = arith.mulf %121, %129 : vector<8x128xf32>
    %131 = arith.addf %128, %130 : vector<8x128xf32>
    %132 = math.tanh %131 : vector<8x128xf32>
    %cst_68 = arith.constant 1.000000e+00 : f32
    %133 = vector.broadcast %cst_68 : f32 to vector<8x128xf32>
    %134 = arith.subf %133, %127 : vector<8x128xf32>
    %135 = arith.mulf %134, %132 : vector<8x128xf32>
    %136 = arith.mulf %127, %85 : vector<8x128xf32>
    %137 = arith.addf %135, %136 : vector<8x128xf32>
    %c0_69 = arith.constant 0 : index
    %c0_70 = arith.constant 0 : index
    %138 = vector.load %arg6[%c0_69, %c0_70] : memref<128x128xf32, #tpu.memory_space<vmem>>, vector<128x128xf32>
    %cst_71 = arith.constant dense<0.000000e+00> : vector<8x128xf32>
    %139 = tpu.matmul %137, %138, %cst_71 {dimension_numbers = #tpu.dot_dimension_numbers<[1], [0], [0], [1], [0, 0, 1, 1], [], []>} : vector<8x128xf32>, vector<128x128xf32>, vector<8x128xf32> -> vector<8x128xf32>
    %c0_72 = arith.constant 0 : index
    %c0_73 = arith.constant 0 : index
    %140 = vector.load %arg7[%c0_72, %c0_73] : memref<1x128xf32, #tpu.memory_space<vmem>>, vector<1x128xf32>
    %141 = vector.broadcast %140 : vector<1x128xf32> to vector<8x128xf32>
    %142 = arith.addf %139, %141 : vector<8x128xf32>
    %143 = math.tanh %142 : vector<8x128xf32>
    %144 = arith.mulf %143, %137 : vector<8x128xf32>
    %c0_74 = arith.constant 0 : index
    %c0_75 = arith.constant 0 : index
    %145 = vector.load %arg8[%c0_74, %c0_75] : memref<128x128xf32, #tpu.memory_space<vmem>>, vector<128x128xf32>
    %cst_76 = arith.constant dense<0.000000e+00> : vector<8x128xf32>
    %146 = tpu.matmul %137, %145, %cst_76 {dimension_numbers = #tpu.dot_dimension_numbers<[1], [0], [0], [1], [0, 0, 1, 1], [], []>} : vector<8x128xf32>, vector<128x128xf32>, vector<8x128xf32> -> vector<8x128xf32>
    %c0_77 = arith.constant 0 : index
    %c0_78 = arith.constant 0 : index
    %147 = vector.load %arg9[%c0_77, %c0_78] : memref<128x128xf32, #tpu.memory_space<vmem>>, vector<128x128xf32>
    %cst_79 = arith.constant dense<0.000000e+00> : vector<8x128xf32>
    %148 = tpu.matmul %144, %147, %cst_79 {dimension_numbers = #tpu.dot_dimension_numbers<[1], [0], [0], [1], [0, 0, 1, 1], [], []>} : vector<8x128xf32>, vector<128x128xf32>, vector<8x128xf32> -> vector<8x128xf32>
    %149 = arith.addf %146, %148 : vector<8x128xf32>
    %c0_80 = arith.constant 0 : index
    %c0_81 = arith.constant 0 : index
    %150 = vector.load %arg10[%c0_80, %c0_81] : memref<1x128xf32, #tpu.memory_space<vmem>>, vector<1x128xf32>
    %151 = vector.broadcast %150 : vector<1x128xf32> to vector<8x128xf32>
    %152 = arith.addf %149, %151 : vector<8x128xf32>
    %153 = arith.index_cast %c2_i32 : i32 to index
    %c0_82 = arith.constant 0 : index
    %c0_83 = arith.constant 0 : index
    %154 = vector.load %arg11[%153, %c0_82, %c0_83] : memref<8x8x128xf32, #tpu.memory_space<vmem>>, vector<1x8x128xf32>
    %155 = vector.shape_cast %154 : vector<1x8x128xf32> to vector<8x128xf32>
    %156 = vector.shape_cast %152 : vector<8x128xf32> to vector<1x8x128xf32>
    tpu.vector_store %arg11[%153, %c0_82, %c0_83], %156 {strides = array<i32>} : memref<8x8x128xf32, #tpu.memory_space<vmem>>, vector<1x8x128xf32>,
    %c3_i32 = arith.constant 3 : i32
    %157 = arith.index_cast %c3_i32 : i32 to index
    %c0_84 = arith.constant 0 : index
    %c0_85 = arith.constant 0 : index
    %158 = vector.load %arg1[%157, %c0_84, %c0_85] : memref<8x8x32xf32, #tpu.memory_space<vmem>>, vector<1x8x32xf32>
    %159 = vector.shape_cast %158 : vector<1x8x32xf32> to vector<8x32xf32>
    %c0_86 = arith.constant 0 : index
    %c0_87 = arith.constant 0 : index
    %160 = vector.load %arg3[%c0_86, %c0_87] : memref<32x512xf32, #tpu.memory_space<vmem>>, vector<32x512xf32>
    %cst_88 = arith.constant dense<0.000000e+00> : vector<8x512xf32>
    %161 = tpu.matmul %159, %160, %cst_88 {dimension_numbers = #tpu.dot_dimension_numbers<[1], [0], [0], [1], [0, 0, 1, 1], [], []>} : vector<8x32xf32>, vector<32x512xf32>, vector<8x512xf32> -> vector<8x512xf32>
    %c0_89 = arith.constant 0 : index
    %c0_90 = arith.constant 0 : index
    %162 = vector.load %arg4[%c0_89, %c0_90] : memref<128x512xf32, #tpu.memory_space<vmem>>, vector<128x512xf32>
    %cst_91 = arith.constant dense<0.000000e+00> : vector<8x512xf32>
    %163 = tpu.matmul %137, %162, %cst_91 {dimension_numbers = #tpu.dot_dimension_numbers<[1], [0], [0], [1], [0, 0, 1, 1], [], []>} : vector<8x128xf32>, vector<128x512xf32>, vector<8x512xf32> -> vector<8x512xf32>
    %164 = arith.addf %161, %163 : vector<8x512xf32>
    %c0_92 = arith.constant 0 : index
    %c0_93 = arith.constant 0 : index
    %165 = vector.load %arg5[%c0_92, %c0_93] : memref<1x512xf32, #tpu.memory_space<vmem>>, vector<1x512xf32>
    %166 = vector.broadcast %165 : vector<1x512xf32> to vector<8x512xf32>
    %167 = arith.addf %164, %166 : vector<8x512xf32>
    %168 = vector.extract_strided_slice %167 {offsets = [0, 0], sizes = [8, 128], strides = [1, 1]} : vector<8x512xf32> to vector<8x128xf32>
    %169 = arith.negf %168 : vector<8x128xf32>
    %170 = math.exp %169 : vector<8x128xf32>
    %cst_94 = arith.constant 1.000000e+00 : f32
    %171 = vector.broadcast %cst_94 : f32 to vector<8x128xf32>
    %172 = arith.addf %171, %170 : vector<8x128xf32>
    %173 = arith.divf %171, %172 : vector<8x128xf32>
    %174 = vector.extract_strided_slice %167 {offsets = [0, 128], sizes = [8, 128], strides = [1, 1]} : vector<8x512xf32> to vector<8x128xf32>
    %175 = arith.negf %174 : vector<8x128xf32>
    %176 = math.exp %175 : vector<8x128xf32>
    %cst_95 = arith.constant 1.000000e+00 : f32
    %177 = vector.broadcast %cst_95 : f32 to vector<8x128xf32>
    %178 = arith.addf %177, %176 : vector<8x128xf32>
    %179 = arith.divf %177, %178 : vector<8x128xf32>
    %180 = vector.extract_strided_slice %167 {offsets = [0, 256], sizes = [8, 128], strides = [1, 1]} : vector<8x512xf32> to vector<8x128xf32>
    %181 = vector.extract_strided_slice %167 {offsets = [0, 384], sizes = [8, 128], strides = [1, 1]} : vector<8x512xf32> to vector<8x128xf32>
    %182 = arith.mulf %173, %181 : vector<8x128xf32>
    %183 = arith.addf %180, %182 : vector<8x128xf32>
    %184 = math.tanh %183 : vector<8x128xf32>
    %cst_96 = arith.constant 1.000000e+00 : f32
    %185 = vector.broadcast %cst_96 : f32 to vector<8x128xf32>
    %186 = arith.subf %185, %179 : vector<8x128xf32>
    %187 = arith.mulf %186, %184 : vector<8x128xf32>
    %188 = arith.mulf %179, %137 : vector<8x128xf32>
    %189 = arith.addf %187, %188 : vector<8x128xf32>
    %c0_97 = arith.constant 0 : index
    %c0_98 = arith.constant 0 : index
    %190 = vector.load %arg6[%c0_97, %c0_98] : memref<128x128xf32, #tpu.memory_space<vmem>>, vector<128x128xf32>
    %cst_99 = arith.constant dense<0.000000e+00> : vector<8x128xf32>
    %191 = tpu.matmul %189, %190, %cst_99 {dimension_numbers = #tpu.dot_dimension_numbers<[1], [0], [0], [1], [0, 0, 1, 1], [], []>} : vector<8x128xf32>, vector<128x128xf32>, vector<8x128xf32> -> vector<8x128xf32>
    %c0_100 = arith.constant 0 : index
    %c0_101 = arith.constant 0 : index
    %192 = vector.load %arg7[%c0_100, %c0_101] : memref<1x128xf32, #tpu.memory_space<vmem>>, vector<1x128xf32>
    %193 = vector.broadcast %192 : vector<1x128xf32> to vector<8x128xf32>
    %194 = arith.addf %191, %193 : vector<8x128xf32>
    %195 = math.tanh %194 : vector<8x128xf32>
    %196 = arith.mulf %195, %189 : vector<8x128xf32>
    %c0_102 = arith.constant 0 : index
    %c0_103 = arith.constant 0 : index
    %197 = vector.load %arg8[%c0_102, %c0_103] : memref<128x128xf32, #tpu.memory_space<vmem>>, vector<128x128xf32>
    %cst_104 = arith.constant dense<0.000000e+00> : vector<8x128xf32>
    %198 = tpu.matmul %189, %197, %cst_104 {dimension_numbers = #tpu.dot_dimension_numbers<[1], [0], [0], [1], [0, 0, 1, 1], [], []>} : vector<8x128xf32>, vector<128x128xf32>, vector<8x128xf32> -> vector<8x128xf32>
    %c0_105 = arith.constant 0 : index
    %c0_106 = arith.constant 0 : index
    %199 = vector.load %arg9[%c0_105, %c0_106] : memref<128x128xf32, #tpu.memory_space<vmem>>, vector<128x128xf32>
    %cst_107 = arith.constant dense<0.000000e+00> : vector<8x128xf32>
    %200 = tpu.matmul %196, %199, %cst_107 {dimension_numbers = #tpu.dot_dimension_numbers<[1], [0], [0], [1], [0, 0, 1, 1], [], []>} : vector<8x128xf32>, vector<128x128xf32>, vector<8x128xf32> -> vector<8x128xf32>
    %201 = arith.addf %198, %200 : vector<8x128xf32>
    %c0_108 = arith.constant 0 : index
    %c0_109 = arith.constant 0 : index
    %202 = vector.load %arg10[%c0_108, %c0_109] : memref<1x128xf32, #tpu.memory_space<vmem>>, vector<1x128xf32>
    %203 = vector.broadcast %202 : vector<1x128xf32> to vector<8x128xf32>
    %204 = arith.addf %201, %203 : vector<8x128xf32>
    %205 = arith.index_cast %c3_i32 : i32 to index
    %c0_110 = arith.constant 0 : index
    %c0_111 = arith.constant 0 : index
    %206 = vector.load %arg11[%205, %c0_110, %c0_111] : memref<8x8x128xf32, #tpu.memory_space<vmem>>, vector<1x8x128xf32>
    %207 = vector.shape_cast %206 : vector<1x8x128xf32> to vector<8x128xf32>
    %208 = vector.shape_cast %204 : vector<8x128xf32> to vector<1x8x128xf32>
    tpu.vector_store %arg11[%205, %c0_110, %c0_111], %208 {strides = array<i32>} : memref<8x8x128xf32, #tpu.memory_space<vmem>>, vector<1x8x128xf32>,
    %c4_i32 = arith.constant 4 : i32
    %209 = arith.index_cast %c4_i32 : i32 to index
    %c0_112 = arith.constant 0 : index
    %c0_113 = arith.constant 0 : index
    %210 = vector.load %arg1[%209, %c0_112, %c0_113] : memref<8x8x32xf32, #tpu.memory_space<vmem>>, vector<1x8x32xf32>
    %211 = vector.shape_cast %210 : vector<1x8x32xf32> to vector<8x32xf32>
    %c0_114 = arith.constant 0 : index
    %c0_115 = arith.constant 0 : index
    %212 = vector.load %arg3[%c0_114, %c0_115] : memref<32x512xf32, #tpu.memory_space<vmem>>, vector<32x512xf32>
    %cst_116 = arith.constant dense<0.000000e+00> : vector<8x512xf32>
    %213 = tpu.matmul %211, %212, %cst_116 {dimension_numbers = #tpu.dot_dimension_numbers<[1], [0], [0], [1], [0, 0, 1, 1], [], []>} : vector<8x32xf32>, vector<32x512xf32>, vector<8x512xf32> -> vector<8x512xf32>
    %c0_117 = arith.constant 0 : index
    %c0_118 = arith.constant 0 : index
    %214 = vector.load %arg4[%c0_117, %c0_118] : memref<128x512xf32, #tpu.memory_space<vmem>>, vector<128x512xf32>
    %cst_119 = arith.constant dense<0.000000e+00> : vector<8x512xf32>
    %215 = tpu.matmul %189, %214, %cst_119 {dimension_numbers = #tpu.dot_dimension_numbers<[1], [0], [0], [1], [0, 0, 1, 1], [], []>} : vector<8x128xf32>, vector<128x512xf32>, vector<8x512xf32> -> vector<8x512xf32>
    %216 = arith.addf %213, %215 : vector<8x512xf32>
    %c0_120 = arith.constant 0 : index
    %c0_121 = arith.constant 0 : index
    %217 = vector.load %arg5[%c0_120, %c0_121] : memref<1x512xf32, #tpu.memory_space<vmem>>, vector<1x512xf32>
    %218 = vector.broadcast %217 : vector<1x512xf32> to vector<8x512xf32>
    %219 = arith.addf %216, %218 : vector<8x512xf32>
    %220 = vector.extract_strided_slice %219 {offsets = [0, 0], sizes = [8, 128], strides = [1, 1]} : vector<8x512xf32> to vector<8x128xf32>
    %221 = arith.negf %220 : vector<8x128xf32>
    %222 = math.exp %221 : vector<8x128xf32>
    %cst_122 = arith.constant 1.000000e+00 : f32
    %223 = vector.broadcast %cst_122 : f32 to vector<8x128xf32>
    %224 = arith.addf %223, %222 : vector<8x128xf32>
    %225 = arith.divf %223, %224 : vector<8x128xf32>
    %226 = vector.extract_strided_slice %219 {offsets = [0, 128], sizes = [8, 128], strides = [1, 1]} : vector<8x512xf32> to vector<8x128xf32>
    %227 = arith.negf %226 : vector<8x128xf32>
    %228 = math.exp %227 : vector<8x128xf32>
    %cst_123 = arith.constant 1.000000e+00 : f32
    %229 = vector.broadcast %cst_123 : f32 to vector<8x128xf32>
    %230 = arith.addf %229, %228 : vector<8x128xf32>
    %231 = arith.divf %229, %230 : vector<8x128xf32>
    %232 = vector.extract_strided_slice %219 {offsets = [0, 256], sizes = [8, 128], strides = [1, 1]} : vector<8x512xf32> to vector<8x128xf32>
    %233 = vector.extract_strided_slice %219 {offsets = [0, 384], sizes = [8, 128], strides = [1, 1]} : vector<8x512xf32> to vector<8x128xf32>
    %234 = arith.mulf %225, %233 : vector<8x128xf32>
    %235 = arith.addf %232, %234 : vector<8x128xf32>
    %236 = math.tanh %235 : vector<8x128xf32>
    %cst_124 = arith.constant 1.000000e+00 : f32
    %237 = vector.broadcast %cst_124 : f32 to vector<8x128xf32>
    %238 = arith.subf %237, %231 : vector<8x128xf32>
    %239 = arith.mulf %238, %236 : vector<8x128xf32>
    %240 = arith.mulf %231, %189 : vector<8x128xf32>
    %241 = arith.addf %239, %240 : vector<8x128xf32>
    %c0_125 = arith.constant 0 : index
    %c0_126 = arith.constant 0 : index
    %242 = vector.load %arg6[%c0_125, %c0_126] : memref<128x128xf32, #tpu.memory_space<vmem>>, vector<128x128xf32>
    %cst_127 = arith.constant dense<0.000000e+00> : vector<8x128xf32>
    %243 = tpu.matmul %241, %242, %cst_127 {dimension_numbers = #tpu.dot_dimension_numbers<[1], [0], [0], [1], [0, 0, 1, 1], [], []>} : vector<8x128xf32>, vector<128x128xf32>, vector<8x128xf32> -> vector<8x128xf32>
    %c0_128 = arith.constant 0 : index
    %c0_129 = arith.constant 0 : index
    %244 = vector.load %arg7[%c0_128, %c0_129] : memref<1x128xf32, #tpu.memory_space<vmem>>, vector<1x128xf32>
    %245 = vector.broadcast %244 : vector<1x128xf32> to vector<8x128xf32>
    %246 = arith.addf %243, %245 : vector<8x128xf32>
    %247 = math.tanh %246 : vector<8x128xf32>
    %248 = arith.mulf %247, %241 : vector<8x128xf32>
    %c0_130 = arith.constant 0 : index
    %c0_131 = arith.constant 0 : index
    %249 = vector.load %arg8[%c0_130, %c0_131] : memref<128x128xf32, #tpu.memory_space<vmem>>, vector<128x128xf32>
    %cst_132 = arith.constant dense<0.000000e+00> : vector<8x128xf32>
    %250 = tpu.matmul %241, %249, %cst_132 {dimension_numbers = #tpu.dot_dimension_numbers<[1], [0], [0], [1], [0, 0, 1, 1], [], []>} : vector<8x128xf32>, vector<128x128xf32>, vector<8x128xf32> -> vector<8x128xf32>
    %c0_133 = arith.constant 0 : index
    %c0_134 = arith.constant 0 : index
    %251 = vector.load %arg9[%c0_133, %c0_134] : memref<128x128xf32, #tpu.memory_space<vmem>>, vector<128x128xf32>
    %cst_135 = arith.constant dense<0.000000e+00> : vector<8x128xf32>
    %252 = tpu.matmul %248, %251, %cst_135 {dimension_numbers = #tpu.dot_dimension_numbers<[1], [0], [0], [1], [0, 0, 1, 1], [], []>} : vector<8x128xf32>, vector<128x128xf32>, vector<8x128xf32> -> vector<8x128xf32>
    %253 = arith.addf %250, %252 : vector<8x128xf32>
    %c0_136 = arith.constant 0 : index
    %c0_137 = arith.constant 0 : index
    %254 = vector.load %arg10[%c0_136, %c0_137] : memref<1x128xf32, #tpu.memory_space<vmem>>, vector<1x128xf32>
    %255 = vector.broadcast %254 : vector<1x128xf32> to vector<8x128xf32>
    %256 = arith.addf %253, %255 : vector<8x128xf32>
    %257 = arith.index_cast %c4_i32 : i32 to index
    %c0_138 = arith.constant 0 : index
    %c0_139 = arith.constant 0 : index
    %258 = vector.load %arg11[%257, %c0_138, %c0_139] : memref<8x8x128xf32, #tpu.memory_space<vmem>>, vector<1x8x128xf32>
    %259 = vector.shape_cast %258 : vector<1x8x128xf32> to vector<8x128xf32>
    %260 = vector.shape_cast %256 : vector<8x128xf32> to vector<1x8x128xf32>
    tpu.vector_store %arg11[%257, %c0_138, %c0_139], %260 {strides = array<i32>} : memref<8x8x128xf32, #tpu.memory_space<vmem>>, vector<1x8x128xf32>,
    %c5_i32 = arith.constant 5 : i32
    %261 = arith.index_cast %c5_i32 : i32 to index
    %c0_140 = arith.constant 0 : index
    %c0_141 = arith.constant 0 : index
    %262 = vector.load %arg1[%261, %c0_140, %c0_141] : memref<8x8x32xf32, #tpu.memory_space<vmem>>, vector<1x8x32xf32>
    %263 = vector.shape_cast %262 : vector<1x8x32xf32> to vector<8x32xf32>
    %c0_142 = arith.constant 0 : index
    %c0_143 = arith.constant 0 : index
    %264 = vector.load %arg3[%c0_142, %c0_143] : memref<32x512xf32, #tpu.memory_space<vmem>>, vector<32x512xf32>
    %cst_144 = arith.constant dense<0.000000e+00> : vector<8x512xf32>
    %265 = tpu.matmul %263, %264, %cst_144 {dimension_numbers = #tpu.dot_dimension_numbers<[1], [0], [0], [1], [0, 0, 1, 1], [], []>} : vector<8x32xf32>, vector<32x512xf32>, vector<8x512xf32> -> vector<8x512xf32>
    %c0_145 = arith.constant 0 : index
    %c0_146 = arith.constant 0 : index
    %266 = vector.load %arg4[%c0_145, %c0_146] : memref<128x512xf32, #tpu.memory_space<vmem>>, vector<128x512xf32>
    %cst_147 = arith.constant dense<0.000000e+00> : vector<8x512xf32>
    %267 = tpu.matmul %241, %266, %cst_147 {dimension_numbers = #tpu.dot_dimension_numbers<[1], [0], [0], [1], [0, 0, 1, 1], [], []>} : vector<8x128xf32>, vector<128x512xf32>, vector<8x512xf32> -> vector<8x512xf32>
    %268 = arith.addf %265, %267 : vector<8x512xf32>
    %c0_148 = arith.constant 0 : index
    %c0_149 = arith.constant 0 : index
    %269 = vector.load %arg5[%c0_148, %c0_149] : memref<1x512xf32, #tpu.memory_space<vmem>>, vector<1x512xf32>
    %270 = vector.broadcast %269 : vector<1x512xf32> to vector<8x512xf32>
    %271 = arith.addf %268, %270 : vector<8x512xf32>
    %272 = vector.extract_strided_slice %271 {offsets = [0, 0], sizes = [8, 128], strides = [1, 1]} : vector<8x512xf32> to vector<8x128xf32>
    %273 = arith.negf %272 : vector<8x128xf32>
    %274 = math.exp %273 : vector<8x128xf32>
    %cst_150 = arith.constant 1.000000e+00 : f32
    %275 = vector.broadcast %cst_150 : f32 to vector<8x128xf32>
    %276 = arith.addf %275, %274 : vector<8x128xf32>
    %277 = arith.divf %275, %276 : vector<8x128xf32>
    %278 = vector.extract_strided_slice %271 {offsets = [0, 128], sizes = [8, 128], strides = [1, 1]} : vector<8x512xf32> to vector<8x128xf32>
    %279 = arith.negf %278 : vector<8x128xf32>
    %280 = math.exp %279 : vector<8x128xf32>
    %cst_151 = arith.constant 1.000000e+00 : f32
    %281 = vector.broadcast %cst_151 : f32 to vector<8x128xf32>
    %282 = arith.addf %281, %280 : vector<8x128xf32>
    %283 = arith.divf %281, %282 : vector<8x128xf32>
    %284 = vector.extract_strided_slice %271 {offsets = [0, 256], sizes = [8, 128], strides = [1, 1]} : vector<8x512xf32> to vector<8x128xf32>
    %285 = vector.extract_strided_slice %271 {offsets = [0, 384], sizes = [8, 128], strides = [1, 1]} : vector<8x512xf32> to vector<8x128xf32>
    %286 = arith.mulf %277, %285 : vector<8x128xf32>
    %287 = arith.addf %284, %286 : vector<8x128xf32>
    %288 = math.tanh %287 : vector<8x128xf32>
    %cst_152 = arith.constant 1.000000e+00 : f32
    %289 = vector.broadcast %cst_152 : f32 to vector<8x128xf32>
    %290 = arith.subf %289, %283 : vector<8x128xf32>
    %291 = arith.mulf %290, %288 : vector<8x128xf32>
    %292 = arith.mulf %283, %241 : vector<8x128xf32>
    %293 = arith.addf %291, %292 : vector<8x128xf32>
    %c0_153 = arith.constant 0 : index
    %c0_154 = arith.constant 0 : index
    %294 = vector.load %arg6[%c0_153, %c0_154] : memref<128x128xf32, #tpu.memory_space<vmem>>, vector<128x128xf32>
    %cst_155 = arith.constant dense<0.000000e+00> : vector<8x128xf32>
    %295 = tpu.matmul %293, %294, %cst_155 {dimension_numbers = #tpu.dot_dimension_numbers<[1], [0], [0], [1], [0, 0, 1, 1], [], []>} : vector<8x128xf32>, vector<128x128xf32>, vector<8x128xf32> -> vector<8x128xf32>
    %c0_156 = arith.constant 0 : index
    %c0_157 = arith.constant 0 : index
    %296 = vector.load %arg7[%c0_156, %c0_157] : memref<1x128xf32, #tpu.memory_space<vmem>>, vector<1x128xf32>
    %297 = vector.broadcast %296 : vector<1x128xf32> to vector<8x128xf32>
    %298 = arith.addf %295, %297 : vector<8x128xf32>
    %299 = math.tanh %298 : vector<8x128xf32>
    %300 = arith.mulf %299, %293 : vector<8x128xf32>
    %c0_158 = arith.constant 0 : index
    %c0_159 = arith.constant 0 : index
    %301 = vector.load %arg8[%c0_158, %c0_159] : memref<128x128xf32, #tpu.memory_space<vmem>>, vector<128x128xf32>
    %cst_160 = arith.constant dense<0.000000e+00> : vector<8x128xf32>
    %302 = tpu.matmul %293, %301, %cst_160 {dimension_numbers = #tpu.dot_dimension_numbers<[1], [0], [0], [1], [0, 0, 1, 1], [], []>} : vector<8x128xf32>, vector<128x128xf32>, vector<8x128xf32> -> vector<8x128xf32>
    %c0_161 = arith.constant 0 : index
    %c0_162 = arith.constant 0 : index
    %303 = vector.load %arg9[%c0_161, %c0_162] : memref<128x128xf32, #tpu.memory_space<vmem>>, vector<128x128xf32>
    %cst_163 = arith.constant dense<0.000000e+00> : vector<8x128xf32>
    %304 = tpu.matmul %300, %303, %cst_163 {dimension_numbers = #tpu.dot_dimension_numbers<[1], [0], [0], [1], [0, 0, 1, 1], [], []>} : vector<8x128xf32>, vector<128x128xf32>, vector<8x128xf32> -> vector<8x128xf32>
    %305 = arith.addf %302, %304 : vector<8x128xf32>
    %c0_164 = arith.constant 0 : index
    %c0_165 = arith.constant 0 : index
    %306 = vector.load %arg10[%c0_164, %c0_165] : memref<1x128xf32, #tpu.memory_space<vmem>>, vector<1x128xf32>
    %307 = vector.broadcast %306 : vector<1x128xf32> to vector<8x128xf32>
    %308 = arith.addf %305, %307 : vector<8x128xf32>
    %309 = arith.index_cast %c5_i32 : i32 to index
    %c0_166 = arith.constant 0 : index
    %c0_167 = arith.constant 0 : index
    %310 = vector.load %arg11[%309, %c0_166, %c0_167] : memref<8x8x128xf32, #tpu.memory_space<vmem>>, vector<1x8x128xf32>
    %311 = vector.shape_cast %310 : vector<1x8x128xf32> to vector<8x128xf32>
    %312 = vector.shape_cast %308 : vector<8x128xf32> to vector<1x8x128xf32>
    tpu.vector_store %arg11[%309, %c0_166, %c0_167], %312 {strides = array<i32>} : memref<8x8x128xf32, #tpu.memory_space<vmem>>, vector<1x8x128xf32>,
    %c6_i32 = arith.constant 6 : i32
    %313 = arith.index_cast %c6_i32 : i32 to index
    %c0_168 = arith.constant 0 : index
    %c0_169 = arith.constant 0 : index
    %314 = vector.load %arg1[%313, %c0_168, %c0_169] : memref<8x8x32xf32, #tpu.memory_space<vmem>>, vector<1x8x32xf32>
    %315 = vector.shape_cast %314 : vector<1x8x32xf32> to vector<8x32xf32>
    %c0_170 = arith.constant 0 : index
    %c0_171 = arith.constant 0 : index
    %316 = vector.load %arg3[%c0_170, %c0_171] : memref<32x512xf32, #tpu.memory_space<vmem>>, vector<32x512xf32>
    %cst_172 = arith.constant dense<0.000000e+00> : vector<8x512xf32>
    %317 = tpu.matmul %315, %316, %cst_172 {dimension_numbers = #tpu.dot_dimension_numbers<[1], [0], [0], [1], [0, 0, 1, 1], [], []>} : vector<8x32xf32>, vector<32x512xf32>, vector<8x512xf32> -> vector<8x512xf32>
    %c0_173 = arith.constant 0 : index
    %c0_174 = arith.constant 0 : index
    %318 = vector.load %arg4[%c0_173, %c0_174] : memref<128x512xf32, #tpu.memory_space<vmem>>, vector<128x512xf32>
    %cst_175 = arith.constant dense<0.000000e+00> : vector<8x512xf32>
    %319 = tpu.matmul %293, %318, %cst_175 {dimension_numbers = #tpu.dot_dimension_numbers<[1], [0], [0], [1], [0, 0, 1, 1], [], []>} : vector<8x128xf32>, vector<128x512xf32>, vector<8x512xf32> -> vector<8x512xf32>
    %320 = arith.addf %317, %319 : vector<8x512xf32>
    %c0_176 = arith.constant 0 : index
    %c0_177 = arith.constant 0 : index
    %321 = vector.load %arg5[%c0_176, %c0_177] : memref<1x512xf32, #tpu.memory_space<vmem>>, vector<1x512xf32>
    %322 = vector.broadcast %321 : vector<1x512xf32> to vector<8x512xf32>
    %323 = arith.addf %320, %322 : vector<8x512xf32>
    %324 = vector.extract_strided_slice %323 {offsets = [0, 0], sizes = [8, 128], strides = [1, 1]} : vector<8x512xf32> to vector<8x128xf32>
    %325 = arith.negf %324 : vector<8x128xf32>
    %326 = math.exp %325 : vector<8x128xf32>
    %cst_178 = arith.constant 1.000000e+00 : f32
    %327 = vector.broadcast %cst_178 : f32 to vector<8x128xf32>
    %328 = arith.addf %327, %326 : vector<8x128xf32>
    %329 = arith.divf %327, %328 : vector<8x128xf32>
    %330 = vector.extract_strided_slice %323 {offsets = [0, 128], sizes = [8, 128], strides = [1, 1]} : vector<8x512xf32> to vector<8x128xf32>
    %331 = arith.negf %330 : vector<8x128xf32>
    %332 = math.exp %331 : vector<8x128xf32>
    %cst_179 = arith.constant 1.000000e+00 : f32
    %333 = vector.broadcast %cst_179 : f32 to vector<8x128xf32>
    %334 = arith.addf %333, %332 : vector<8x128xf32>
    %335 = arith.divf %333, %334 : vector<8x128xf32>
    %336 = vector.extract_strided_slice %323 {offsets = [0, 256], sizes = [8, 128], strides = [1, 1]} : vector<8x512xf32> to vector<8x128xf32>
    %337 = vector.extract_strided_slice %323 {offsets = [0, 384], sizes = [8, 128], strides = [1, 1]} : vector<8x512xf32> to vector<8x128xf32>
    %338 = arith.mulf %329, %337 : vector<8x128xf32>
    %339 = arith.addf %336, %338 : vector<8x128xf32>
    %340 = math.tanh %339 : vector<8x128xf32>
    %cst_180 = arith.constant 1.000000e+00 : f32
    %341 = vector.broadcast %cst_180 : f32 to vector<8x128xf32>
    %342 = arith.subf %341, %335 : vector<8x128xf32>
    %343 = arith.mulf %342, %340 : vector<8x128xf32>
    %344 = arith.mulf %335, %293 : vector<8x128xf32>
    %345 = arith.addf %343, %344 : vector<8x128xf32>
    %c0_181 = arith.constant 0 : index
    %c0_182 = arith.constant 0 : index
    %346 = vector.load %arg6[%c0_181, %c0_182] : memref<128x128xf32, #tpu.memory_space<vmem>>, vector<128x128xf32>
    %cst_183 = arith.constant dense<0.000000e+00> : vector<8x128xf32>
    %347 = tpu.matmul %345, %346, %cst_183 {dimension_numbers = #tpu.dot_dimension_numbers<[1], [0], [0], [1], [0, 0, 1, 1], [], []>} : vector<8x128xf32>, vector<128x128xf32>, vector<8x128xf32> -> vector<8x128xf32>
    %c0_184 = arith.constant 0 : index
    %c0_185 = arith.constant 0 : index
    %348 = vector.load %arg7[%c0_184, %c0_185] : memref<1x128xf32, #tpu.memory_space<vmem>>, vector<1x128xf32>
    %349 = vector.broadcast %348 : vector<1x128xf32> to vector<8x128xf32>
    %350 = arith.addf %347, %349 : vector<8x128xf32>
    %351 = math.tanh %350 : vector<8x128xf32>
    %352 = arith.mulf %351, %345 : vector<8x128xf32>
    %c0_186 = arith.constant 0 : index
    %c0_187 = arith.constant 0 : index
    %353 = vector.load %arg8[%c0_186, %c0_187] : memref<128x128xf32, #tpu.memory_space<vmem>>, vector<128x128xf32>
    %cst_188 = arith.constant dense<0.000000e+00> : vector<8x128xf32>
    %354 = tpu.matmul %345, %353, %cst_188 {dimension_numbers = #tpu.dot_dimension_numbers<[1], [0], [0], [1], [0, 0, 1, 1], [], []>} : vector<8x128xf32>, vector<128x128xf32>, vector<8x128xf32> -> vector<8x128xf32>
    %c0_189 = arith.constant 0 : index
    %c0_190 = arith.constant 0 : index
    %355 = vector.load %arg9[%c0_189, %c0_190] : memref<128x128xf32, #tpu.memory_space<vmem>>, vector<128x128xf32>
    %cst_191 = arith.constant dense<0.000000e+00> : vector<8x128xf32>
    %356 = tpu.matmul %352, %355, %cst_191 {dimension_numbers = #tpu.dot_dimension_numbers<[1], [0], [0], [1], [0, 0, 1, 1], [], []>} : vector<8x128xf32>, vector<128x128xf32>, vector<8x128xf32> -> vector<8x128xf32>
    %357 = arith.addf %354, %356 : vector<8x128xf32>
    %c0_192 = arith.constant 0 : index
    %c0_193 = arith.constant 0 : index
    %358 = vector.load %arg10[%c0_192, %c0_193] : memref<1x128xf32, #tpu.memory_space<vmem>>, vector<1x128xf32>
    %359 = vector.broadcast %358 : vector<1x128xf32> to vector<8x128xf32>
    %360 = arith.addf %357, %359 : vector<8x128xf32>
    %361 = arith.index_cast %c6_i32 : i32 to index
    %c0_194 = arith.constant 0 : index
    %c0_195 = arith.constant 0 : index
    %362 = vector.load %arg11[%361, %c0_194, %c0_195] : memref<8x8x128xf32, #tpu.memory_space<vmem>>, vector<1x8x128xf32>
    %363 = vector.shape_cast %362 : vector<1x8x128xf32> to vector<8x128xf32>
    %364 = vector.shape_cast %360 : vector<8x128xf32> to vector<1x8x128xf32>
    tpu.vector_store %arg11[%361, %c0_194, %c0_195], %364 {strides = array<i32>} : memref<8x8x128xf32, #tpu.memory_space<vmem>>, vector<1x8x128xf32>,
    %c7_i32 = arith.constant 7 : i32
    %365 = arith.index_cast %c7_i32 : i32 to index
    %c0_196 = arith.constant 0 : index
    %c0_197 = arith.constant 0 : index
    %366 = vector.load %arg1[%365, %c0_196, %c0_197] : memref<8x8x32xf32, #tpu.memory_space<vmem>>, vector<1x8x32xf32>
    %367 = vector.shape_cast %366 : vector<1x8x32xf32> to vector<8x32xf32>
    %c0_198 = arith.constant 0 : index
    %c0_199 = arith.constant 0 : index
    %368 = vector.load %arg3[%c0_198, %c0_199] : memref<32x512xf32, #tpu.memory_space<vmem>>, vector<32x512xf32>
    %cst_200 = arith.constant dense<0.000000e+00> : vector<8x512xf32>
    %369 = tpu.matmul %367, %368, %cst_200 {dimension_numbers = #tpu.dot_dimension_numbers<[1], [0], [0], [1], [0, 0, 1, 1], [], []>} : vector<8x32xf32>, vector<32x512xf32>, vector<8x512xf32> -> vector<8x512xf32>
    %c0_201 = arith.constant 0 : index
    %c0_202 = arith.constant 0 : index
    %370 = vector.load %arg4[%c0_201, %c0_202] : memref<128x512xf32, #tpu.memory_space<vmem>>, vector<128x512xf32>
    %cst_203 = arith.constant dense<0.000000e+00> : vector<8x512xf32>
    %371 = tpu.matmul %345, %370, %cst_203 {dimension_numbers = #tpu.dot_dimension_numbers<[1], [0], [0], [1], [0, 0, 1, 1], [], []>} : vector<8x128xf32>, vector<128x512xf32>, vector<8x512xf32> -> vector<8x512xf32>
    %372 = arith.addf %369, %371 : vector<8x512xf32>
    %c0_204 = arith.constant 0 : index
    %c0_205 = arith.constant 0 : index
    %373 = vector.load %arg5[%c0_204, %c0_205] : memref<1x512xf32, #tpu.memory_space<vmem>>, vector<1x512xf32>
    %374 = vector.broadcast %373 : vector<1x512xf32> to vector<8x512xf32>
    %375 = arith.addf %372, %374 : vector<8x512xf32>
    %376 = vector.extract_strided_slice %375 {offsets = [0, 0], sizes = [8, 128], strides = [1, 1]} : vector<8x512xf32> to vector<8x128xf32>
    %377 = arith.negf %376 : vector<8x128xf32>
    %378 = math.exp %377 : vector<8x128xf32>
    %cst_206 = arith.constant 1.000000e+00 : f32
    %379 = vector.broadcast %cst_206 : f32 to vector<8x128xf32>
    %380 = arith.addf %379, %378 : vector<8x128xf32>
    %381 = arith.divf %379, %380 : vector<8x128xf32>
    %382 = vector.extract_strided_slice %375 {offsets = [0, 128], sizes = [8, 128], strides = [1, 1]} : vector<8x512xf32> to vector<8x128xf32>
    %383 = arith.negf %382 : vector<8x128xf32>
    %384 = math.exp %383 : vector<8x128xf32>
    %cst_207 = arith.constant 1.000000e+00 : f32
    %385 = vector.broadcast %cst_207 : f32 to vector<8x128xf32>
    %386 = arith.addf %385, %384 : vector<8x128xf32>
    %387 = arith.divf %385, %386 : vector<8x128xf32>
    %388 = vector.extract_strided_slice %375 {offsets = [0, 256], sizes = [8, 128], strides = [1, 1]} : vector<8x512xf32> to vector<8x128xf32>
    %389 = vector.extract_strided_slice %375 {offsets = [0, 384], sizes = [8, 128], strides = [1, 1]} : vector<8x512xf32> to vector<8x128xf32>
    %390 = arith.mulf %381, %389 : vector<8x128xf32>
    %391 = arith.addf %388, %390 : vector<8x128xf32>
    %392 = math.tanh %391 : vector<8x128xf32>
    %cst_208 = arith.constant 1.000000e+00 : f32
    %393 = vector.broadcast %cst_208 : f32 to vector<8x128xf32>
    %394 = arith.subf %393, %387 : vector<8x128xf32>
    %395 = arith.mulf %394, %392 : vector<8x128xf32>
    %396 = arith.mulf %387, %345 : vector<8x128xf32>
    %397 = arith.addf %395, %396 : vector<8x128xf32>
    %c0_209 = arith.constant 0 : index
    %c0_210 = arith.constant 0 : index
    %398 = vector.load %arg6[%c0_209, %c0_210] : memref<128x128xf32, #tpu.memory_space<vmem>>, vector<128x128xf32>
    %cst_211 = arith.constant dense<0.000000e+00> : vector<8x128xf32>
    %399 = tpu.matmul %397, %398, %cst_211 {dimension_numbers = #tpu.dot_dimension_numbers<[1], [0], [0], [1], [0, 0, 1, 1], [], []>} : vector<8x128xf32>, vector<128x128xf32>, vector<8x128xf32> -> vector<8x128xf32>
    %c0_212 = arith.constant 0 : index
    %c0_213 = arith.constant 0 : index
    %400 = vector.load %arg7[%c0_212, %c0_213] : memref<1x128xf32, #tpu.memory_space<vmem>>, vector<1x128xf32>
    %401 = vector.broadcast %400 : vector<1x128xf32> to vector<8x128xf32>
    %402 = arith.addf %399, %401 : vector<8x128xf32>
    %403 = math.tanh %402 : vector<8x128xf32>
    %404 = arith.mulf %403, %397 : vector<8x128xf32>
    %c0_214 = arith.constant 0 : index
    %c0_215 = arith.constant 0 : index
    %405 = vector.load %arg8[%c0_214, %c0_215] : memref<128x128xf32, #tpu.memory_space<vmem>>, vector<128x128xf32>
    %cst_216 = arith.constant dense<0.000000e+00> : vector<8x128xf32>
    %406 = tpu.matmul %397, %405, %cst_216 {dimension_numbers = #tpu.dot_dimension_numbers<[1], [0], [0], [1], [0, 0, 1, 1], [], []>} : vector<8x128xf32>, vector<128x128xf32>, vector<8x128xf32> -> vector<8x128xf32>
    %c0_217 = arith.constant 0 : index
    %c0_218 = arith.constant 0 : index
    %407 = vector.load %arg9[%c0_217, %c0_218] : memref<128x128xf32, #tpu.memory_space<vmem>>, vector<128x128xf32>
    %cst_219 = arith.constant dense<0.000000e+00> : vector<8x128xf32>
    %408 = tpu.matmul %404, %407, %cst_219 {dimension_numbers = #tpu.dot_dimension_numbers<[1], [0], [0], [1], [0, 0, 1, 1], [], []>} : vector<8x128xf32>, vector<128x128xf32>, vector<8x128xf32> -> vector<8x128xf32>
    %409 = arith.addf %406, %408 : vector<8x128xf32>
    %c0_220 = arith.constant 0 : index
    %c0_221 = arith.constant 0 : index
    %410 = vector.load %arg10[%c0_220, %c0_221] : memref<1x128xf32, #tpu.memory_space<vmem>>, vector<1x128xf32>
    %411 = vector.broadcast %410 : vector<1x128xf32> to vector<8x128xf32>
    %412 = arith.addf %409, %411 : vector<8x128xf32>
    %413 = arith.index_cast %c7_i32 : i32 to index
    %c0_222 = arith.constant 0 : index
    %c0_223 = arith.constant 0 : index
    %414 = vector.load %arg11[%413, %c0_222, %c0_223] : memref<8x8x128xf32, #tpu.memory_space<vmem>>, vector<1x8x128xf32>
    %415 = vector.shape_cast %414 : vector<1x8x128xf32> to vector<8x128xf32>
    %416 = vector.shape_cast %412 : vector<8x128xf32> to vector<1x8x128xf32>
    tpu.vector_store %arg11[%413, %c0_222, %c0_223], %416 {strides = array<i32>} : memref<8x8x128xf32, #tpu.memory_space<vmem>>, vector<1x8x128xf32>,
    %c8_i32 = arith.constant 8 : i32
    %c0_224 = arith.constant 0 : index
    %c0_225 = arith.constant 0 : index
    %417 = vector.load %arg12[%c0_224, %c0_225] : memref<8x128xf32, #tpu.memory_space<vmem>>, vector<8x128xf32>
    tpu.vector_store %arg12[%c0_224, %c0_225], %397 {strides = array<i32>} : memref<8x128xf32, #tpu.memory_space<vmem>>, vector<8x128xf32>,
    return
  }
  func.func @transform_0(%arg0: i32) -> (i32, i32, i32) {
    %c0_i32 = arith.constant 0 : i32
    %c0_i32_0 = arith.constant 0 : i32
    %c0_i32_1 = arith.constant 0 : i32
    %c0_i32_2 = arith.constant 0 : i32
    return %c0_i32, %c0_i32_0, %c0_i32_1 : i32, i32, i32
  }
  func.func @transform_1(%arg0: i32) -> (i32, i32) {
    %c0_i32 = arith.constant 0 : i32
    %c0_i32_0 = arith.constant 0 : i32
    %c0_i32_1 = arith.constant 0 : i32
    return %c0_i32, %c0_i32_0 : i32, i32
  }
  func.func @transform_2(%arg0: i32) -> (i32, i32) {
    %c0_i32 = arith.constant 0 : i32
    %c0_i32_0 = arith.constant 0 : i32
    %c0_i32_1 = arith.constant 0 : i32
    return %c0_i32, %c0_i32_0 : i32, i32
  }
  func.func @transform_3(%arg0: i32) -> (i32, i32) {
    %c0_i32 = arith.constant 0 : i32
    %c0_i32_0 = arith.constant 0 : i32
    %c0_i32_1 = arith.constant 0 : i32
    return %c0_i32, %c0_i32_0 : i32, i32
  }
  func.func @transform_4(%arg0: i32) -> (i32, i32) {
    %c0_i32 = arith.constant 0 : i32
    %c0_i32_0 = arith.constant 0 : i32
    %c0_i32_1 = arith.constant 0 : i32
    return %c0_i32, %c0_i32_0 : i32, i32
  }
  func.func @transform_5(%arg0: i32) -> (i32, i32) {
    %c0_i32 = arith.constant 0 : i32
    %c0_i32_0 = arith.constant 0 : i32
    %c0_i32_1 = arith.constant 0 : i32
    return %c0_i32, %c0_i32_0 : i32, i32
  }
  func.func @transform_6(%arg0: i32) -> (i32, i32) {
    %c0_i32 = arith.constant 0 : i32
    %c0_i32_0 = arith.constant 0 : i32
    %c0_i32_1 = arith.constant 0 : i32
    return %c0_i32, %c0_i32_0 : i32, i32
  }
  func.func @transform_7(%arg0: i32) -> (i32, i32) {
    %c0_i32 = arith.constant 0 : i32
    %c0_i32_0 = arith.constant 0 : i32
    %c0_i32_1 = arith.constant 0 : i32
    return %c0_i32, %c0_i32_0 : i32, i32
  }
  func.func @transform_8(%arg0: i32) -> (i32, i32) {
    %c0_i32 = arith.constant 0 : i32
    %c0_i32_0 = arith.constant 0 : i32
    %c0_i32_1 = arith.constant 0 : i32
    return %c0_i32, %c0_i32_0 : i32, i32
  }
  func.func @transform_9(%arg0: i32) -> (i32, i32) {
    %c0_i32 = arith.constant 0 : i32
    %c0_i32_0 = arith.constant 0 : i32
    %c0_i32_1 = arith.constant 0 : i32
    return %c0_i32, %c0_i32_0 : i32, i32
  }
  func.func @transform_10(%arg0: i32) -> (i32, i32, i32) {
    %c0_i32 = arith.constant 0 : i32
    %c0_i32_0 = arith.constant 0 : i32
    %c0_i32_1 = arith.constant 0 : i32
    %c0_i32_2 = arith.constant 0 : i32
    return %c0_i32, %c0_i32_0, %c0_i32_1 : i32, i32, i32
  }
  func.func @transform_11(%arg0: i32) -> (i32, i32) {
    %c0_i32 = arith.constant 0 : i32
    %c0_i32_0 = arith.constant 0 : i32
    %c0_i32_1 = arith.constant 0 : i32
    return %c0_i32, %c0_i32_0 : i32, i32
  }
}

</mosaic_0001>

<bundles_post_ra>
// kernel: _lambda_.1
= control target key start
LH: loop header
LB: loop body
LE: loop exit
PB: predicated region body
PF: predicated region fallthrough
CT: control target
= control target key end

     0   :  { %17 = vsyncpa [#allocation3], 0  ;;  %s7054_s0 = inlined_call_operand.vmem [shape: f32[8,8,32], index: 0, kind: input, shape index: {}]   ;;  %s7055_s1 = inlined_call_operand.vmem [shape: f32[8,128], index: 1, kind: input, shape index: {}, may-alias: {1,11}]   ;;  %s7056_s2 = inlined_call_operand.hbm [shape: f32[32,512], index: 2, kind: input, shape index: {}]   ;;  %s7057_s3 = inlined_call_operand.vmem [shape: f32[128,512], index: 3, kind: input, shape index: {}]   ;;  %s7058_s4 = inlined_call_operand.vmem [shape: f32[1,512], index: 4, kind: input, shape index: {}]   ;;  %s7059_s5 = inlined_call_operand.hbm [shape: f32[128,128], index: 5, kind: input, shape index: {}]   ;;  %s7060_s6 = inlined_call_operand.vmem [shape: f32[1,128], index: 6, kind: input, shape index: {}]   ;;  %s7061_s7 = inlined_call_operand.hbm [shape: f32[128,128], index: 7, kind: input, shape index: {}]   ;;  %s7062_s8 = inlined_call_operand.hbm [shape: f32[128,128], index: 8, kind: input, shape index: {}]   ;;  %s7063_s9 = inlined_call_operand.vmem [shape: f32[1,128], index: 9, kind: input, shape index: {}]   ;;  %s7064_s10 = inlined_call_operand.vmem [shape: f32[8,8,128], index: 10, kind: output, shape index: {0}]   ;;  %s7065_s11 = inlined_call_operand.vmem [shape: f32[8,128], index: 11, kind: output, shape index: {1}, may-alias: {1,11}]  }
   0x1   :  { %18 = vsyncpa [#allocation5], 0  ;;  %s45_s19 = sshll.u32 %s7059_s5, 4  ;;  %s46_s19 = int_to_ptr.hbm [resolvable:$true] %s45_s19 }
   0x2   :  { %19 = vsyncpa [#allocation8], 0  ;;  %s3796_s20 = smov [#allocation4]   ;;  %s28_s24 = sshll.u32 %s7056_s2, 4  ;;  %s29_s24 = int_to_ptr.hbm [resolvable:$true] %s28_s24 }
   0x3   :  { %s47_s21 = sshll.u32 %s3796_s20, 4  ;;  %s3797_s25 = smov 128   ;;  %s48_s21 = int_to_ptr.vmem [resolvable:$true] %s47_s21 }
   0x4   :  { %s3798_s26 = smov 8   ;;  %s3799_s27 = smov [#allocation2]  }
   0x5   :  { %53 = dma.hbm_to_vmem [thread:$0]  %s46_s19, 2048, %s48_s21, [#allocation5], %s3797_s25, %s3797_s25, %s3798_s26  }
   0x6   :  { %s30_s28 = sshll.u32 %s3799_s27, 4  ;;  %s3800_s29 = smov 512   ;;  %s31_s28 = int_to_ptr.vmem [resolvable:$true] %s30_s28 }
   0x7   :  { %s3801_s30 = smov 32   ;;  %s60_s13 = sshll.u32 %s7061_s7, 4  ;;  %s61_s13 = int_to_ptr.hbm [resolvable:$true] %s60_s13 }
   0x8   :  { %36 = dma.hbm_to_vmem [thread:$0]  %s29_s24, 2048, %s31_s28, [#allocation3], %s3800_s29, %s3800_s29, %s3801_s30  }
   0x9   :  { %s3802_s14 = smov [#allocation6]   ;;  %s73_s17 = sshll.u32 %s7062_s8, 4  ;;  %s74_s17 = int_to_ptr.hbm [resolvable:$true] %s73_s17 }
   0xa   :  { %s62_s15 = sshll.u32 %s3802_s14, 4  ;;  %s3803_s18 = smov [#allocation7]   ;;  %s63_s15 = int_to_ptr.vmem [resolvable:$true] %s62_s15 }
   0xb   :  { %68 = dma.hbm_to_vmem [thread:$0]  %s61_s13, 2048, %s63_s15, [#allocation5], %s3797_s25, %s3797_s25, %s3798_s26  }
   0xc   :  { %s75_s19 = sshll.u32 %s3803_s18, 4  ;;  %s76_s19 = int_to_ptr.vmem [resolvable:$true] %s75_s19 }
   0xd   :  { %81 = dma.hbm_to_vmem [thread:$0]  %s74_s17, 2048, %s76_s19, [#allocation8], %s3797_s25, %s3797_s25, %s3798_s26  }
   0xe   :  { %3790 = dma.done.wait [#allocation3], 2048  }
   0xf   :  { %3791 = vsyncadd [#allocation3], 4294965248 }
  0x10   :  { %3792 = dma.done.wait [#allocation5], 4096  }
  0x11   :  { %3793 = vsyncadd [#allocation5], 4294963200 }
  0x12   :  { %3794 = dma.done.wait [#allocation8], 2048  }
  0x13   :  { %3795 = vsyncadd [#allocation8], 4294965248  ;;  %v3879_v0 = vld [vmem:[%s7057_s3 + $0x1f8] sm:$0xff]  ;;  %v3895_v3 = vld [vmem:[%s7057_s3 + $0x1e0] sm:$0xff]  ;;  %vm262_vm0 = vcmask 261120  }
  0x14   :  { %v3884_v1 = vld [vmem:[%s7057_s3 + $0x1d8] sm:$0xff]  ;;  %242 = vmatpush.msra.mxu3 %v3879_v0  ;;  %182 = vmatpush.msra.mxu0 %v3895_v3  ;;  %v3902_v4 = vld [vmem:[%s7057_s3 + $0x1c0] sm:$0xff]  ;;  %v3919_v7 = vld [vmem:[%s7057_s3 + $0x1e8] sm:$0xff] }
  0x15   :  { %v3890_v2 = vld [vmem:[%s7057_s3 + $0x1b8] sm:$0xff]  ;;  %v3912_v6 = vld [vmem:[%s7057_s3 + $0x1a0] sm:$0xff]  ;;  %202 = vmatpush.msra.mxu1 %v3919_v7  ;;  %v3935_v10 = vld [vmem:[%s7057_s3 + $0x1c8] sm:$0xff] }
  0x16   :  { %243 = vmatpush.msra.mxu3 %v3884_v1  ;;  %v3907_v5 = vld [vmem:[%s7057_s3 + $0x198] sm:$0xff]  ;;  %183 = vmatpush.msra.mxu0 %v3902_v4  ;;  %v3929_v9 = vld [vmem:[%s7057_s3 + $0x180] sm:$0xff]  ;;  %v3942_v11 = vld [vmem:[%s7057_s3 + $0x1a8] sm:$0xff] }
  0x17   :  { %v3924_v8 = vld [vmem:[%s7057_s3 + $0x178] sm:$0xff]  ;;  %v3952_v13 = vld [vmem:[%s7057_s3 + $0x160] sm:$0xff]  ;;  %203 = vmatpush.msra.mxu1 %v3935_v10  ;;  %v3958_v14 = vld [vmem:[%s7057_s3 + $0x1f0] sm:$0xff] }
  0x18   :  { %244 = vmatpush.msra.mxu3 %v3890_v2  ;;  %184 = vmatpush.msra.mxu0 %v3912_v6  ;;  %v3947_v12 = vld [vmem:[%s7057_s3 + $0x158] sm:$0xff]  ;;  %7216 = vst [vmem:[#allocation12_spill] sm:$0xff] %v3958_v14  ;;  %v3965_v15 = vld [vmem:[%s7057_s3 + $0x188] sm:$0xff]  ;;  %v3975_v17 = vld [vmem:[%s7057_s3 + $0x140] sm:$0xff] }
  0x19   :  { %v3970_v16 = vld [vmem:[%s7057_s3 + $0x138] sm:$0xff]  ;;  %204 = vmatpush.msra.mxu1 %v3942_v11  ;;  %222 = vmatpush.msra.mxu2 %v3958_v14  ;;  %v3982_v18 = vld [vmem:[%s7057_s3 + $0x1d0] sm:$0xff]  ;;  %v3989_v19 = vld [vmem:[%s7057_s3 + $0x168] sm:$0xff] }
  0x1a   :  { %245 = vmatpush.msra.mxu3 %v3907_v5  ;;  %185 = vmatpush.msra.mxu0 %v3929_v9  ;;  %7217 = vst [vmem:[#allocation13_spill] sm:$0xff] %v3982_v18  ;;  %v3994_v20 = vld [vmem:[%s7057_s3 + $0x118] sm:$0xff]  ;;  %v3999_v21 = vld [vmem:[%s7057_s3 + $0x120] sm:$0xff]  ;;  %v4006_v22 = vld [vmem:[%s7057_s3 + $0x1b0] sm:$0xff] }
  0x1b   :  { %205 = vmatpush.msra.mxu1 %v3965_v15  ;;  %223 = vmatpush.msra.mxu2 %v3982_v18  ;;  %7218 = vst [vmem:[#allocation14_spill] sm:$0xff] %v4006_v22  ;;  %v4013_v23 = vld [vmem:[%s7057_s3 + $0x148] sm:$0xff]  ;;  %v4018_v24 = vld [vmem:[%s7057_s3 + $0x190] sm:$0xff]  ;;  %v4023_v25 = vld [vmem:[%s7057_s3 + $0xf8] sm:$0xff] }
  0x1c   :  { %246 = vmatpush.msra.mxu3 %v3924_v8  ;;  %186 = vmatpush.msra.mxu0 %v3952_v13  ;;  %7219 = vst [vmem:[#allocation15_spill] sm:$0xff] %v4018_v24  ;;  %v4028_v26 = vld [vmem:[%s7057_s3 + $0x100] sm:$0xff]  ;;  %v4037_v27 = vld [vmem:[%s7057_s3 + $0x128] sm:$0xff]  ;;  %v4042_v28 = vld [vmem:[%s7057_s3 + $0x170] sm:$0xff] }
  0x1d   :  { %206 = vmatpush.msra.mxu1 %v3989_v19  ;;  %224 = vmatpush.msra.mxu2 %v4006_v22  ;;  %7220 = vst [vmem:[#allocation16_spill] sm:$0xff] %v4042_v28  ;;  %v4047_v29 = vld [vmem:[%s7057_s3 + $0xd8] sm:$0xff]  ;;  %v4052_v30 = vld [vmem:[%s7057_s3 + $0xe0] sm:$0xff]  ;;  %v4061_v31 = vld [vmem:[%s7057_s3 + $0x108] sm:$0xff] }
  0x1e   :  { %247 = vmatpush.msra.mxu3 %v3947_v12  ;;  %187 = vmatpush.msra.mxu0 %v3975_v17  ;;  %v4066_v32 = vld [vmem:[%s7057_s3 + $0x150] sm:$0xff]  ;;  %v4071_v33 = vld [vmem:[%s7057_s3 + $0xb8] sm:$0xff]  ;;  %v4076_v34 = vld [vmem:[%s7057_s3 + $0xc0] sm:$0xff] }
  0x1f   :  { %207 = vmatpush.msra.mxu1 %v4013_v23  ;;  %225 = vmatpush.msra.mxu2 %v4018_v24  ;;  %7221 = vst [vmem:[#allocation17_spill] sm:$0xff] %v4066_v32  ;;  %v4085_v35 = vld [vmem:[%s7057_s3 + $0xe8] sm:$0xff]  ;;  %v4090_v36 = vld [vmem:[%s7057_s3 + $0x130] sm:$0xff]  ;;  %v4095_v37 = vld [vmem:[%s7057_s3 + $0x98] sm:$0xff] }
  0x20   :  { %248 = vmatpush.msra.mxu3 %v3970_v16  ;;  %188 = vmatpush.msra.mxu0 %v3999_v21  ;;  %7222 = vst [vmem:[#allocation18_spill] sm:$0xff] %v4090_v36  ;;  %v4100_v38 = vld [vmem:[%s7057_s3 + $0xa0] sm:$0xff]  ;;  %v4109_v39 = vld [vmem:[%s7057_s3 + $0xc8] sm:$0xff]  ;;  %v4114_v40 = vld [vmem:[%s7057_s3 + $0x110] sm:$0xff] }
  0x21   :  { %208 = vmatpush.msra.mxu1 %v4037_v27  ;;  %226 = vmatpush.msra.mxu2 %v4042_v28  ;;  %7223 = vst [vmem:[#allocation19_spill] sm:$0xff] %v4114_v40  ;;  %v4119_v41 = vld [vmem:[%s7057_s3 + $0x78] sm:$0xff]  ;;  %v4124_v42 = vld [vmem:[%s7057_s3 + $0x80] sm:$0xff]  ;;  %v4133_v43 = vld [vmem:[%s7057_s3 + $0xa8] sm:$0xff] }
  0x22   :  { %249 = vmatpush.msra.mxu3 %v3994_v20  ;;  %189 = vmatpush.msra.mxu0 %v4028_v26  ;;  %v4138_v44 = vld [vmem:[%s7057_s3 + $0xf0] sm:$0xff]  ;;  %v4143_v45 = vld [vmem:[%s7057_s3 + $0x58] sm:$0xff]  ;;  %v4153_v47 = vld [vmem:[%s7057_s3 + $0x60] sm:$0xff] }
  0x23   :  { %209 = vmatpush.msra.mxu1 %v4061_v31  ;;  %227 = vmatpush.msra.mxu2 %v4066_v32  ;;  %7224 = vst [vmem:[#allocation20_spill] sm:$0xff] %v4138_v44  ;;  %v4148_v46 = vld [vmem:[%s7057_s3 + $0x38] sm:$0xff]  ;;  %v4162_v48 = vld [vmem:[%s7057_s3 + $0x40] sm:$0xff]  ;;  %v4167_v49 = vld [vmem:[%s7057_s3 + $0x88] sm:$0xff] }
  0x24   :  { %250 = vmatpush.msra.mxu3 %v4023_v25  ;;  %190 = vmatpush.msra.mxu0 %v4052_v30  ;;  %v4172_v50 = vld [vmem:[%s7057_s3 + $0xd0] sm:$0xff]  ;;  %v4177_v51 = vld [vmem:[%s7057_s3 + $0x18] sm:$0xff]  ;;  %v4182_v52 = vld [vmem:[%s7057_s3 + $0x20] sm:$0xff] }
  0x25   :  { %210 = vmatpush.msra.mxu1 %v4085_v35  ;;  %228 = vmatpush.msra.mxu2 %v4090_v36  ;;  %7225 = vst [vmem:[#allocation21_spill] sm:$0xff] %v4172_v50  ;;  %v4189_v53 = vld [vmem:[%s7057_s3 + $0x68] sm:$0xff]  ;;  %v4195_v54 = vld [vmem:[%s7055_s1] sm:$0xff]  ;;  %v4206_v56 = vld [vmem:[%s7057_s3 + $0xb0] sm:$0xff] }
  0x26   :  { %251 = vmatpush.msra.mxu3 %v4047_v29  ;;  %191 = vmatpush.msra.mxu0 %v4076_v34  ;;  %v4201_v55 = vld [vmem:[%s7057_s3 + $0x48] sm:$0xff]  ;;  %7226 = vst [vmem:[#allocation22_spill] sm:$0xff] %v4206_v56  ;;  %v4208_v57 = vld [vmem:[#allocation2 + $0x60] sm:$0xff]  ;;  %v4235_v61 = vld [vmem:[%s7057_s3 + $0x90] sm:$0xff] }
  0x27   :  { %211 = vmatpush.msra.mxu1 %v4109_v39  ;;  %229 = vmatpush.msra.mxu2 %v4114_v40  ;;  %v4213_v58 = vld [vmem:[%s7057_s3] sm:$0xff]  ;;  %v4222_v59 = vld [vmem:[%s7057_s3 + $0x28] sm:$0xff]  ;;  %7227 = vst [vmem:[#allocation23_spill] sm:$0xff] %v4235_v61  ;;  %v4293_v24 = vld [vmem:[#allocation2 + $0x70] sm:$0xff] }
  0x28   :  { %252 = vmatpush.msra.mxu3 %v4071_v33  ;;  %192 = vmatpush.msra.mxu0 %v4100_v38  ;;  %v4224_v60 = vld [vmem:[#allocation2 + $0x40] sm:$0xff]  ;;  %v4242_v62 = vld [vmem:[%s7057_s3 + $0x8] sm:$0xff]  ;;  %7233 = vst [vmem:[#allocation29_spill] sm:$0xff] %v4293_v24  ;;  %v4297_v22 = vld [vmem:[#allocation2 + $0x50] sm:$0xff] }
  0x29   :  { %212 = vmatpush.msra.mxu1 %v4133_v43  ;;  %230 = vmatpush.msra.mxu2 %v4138_v44  ;;  %v4244_v63 = vld [vmem:[#allocation2 + $0x20] sm:$0xff]  ;;  %v4259_v44 = vld [vmem:[%s7057_s3 + $0x50] sm:$0xff]  ;;  %v4266_v36 = vld [vmem:[#allocation2 + $0x68] sm:$0xff] }
  0x2a   :  { %253 = vmatpush.msra.mxu3 %v4095_v37  ;;  %193 = vmatpush.msra.mxu0 %v4124_v42  ;;  %7229 = vst [vmem:[#allocation25_spill] sm:$0xff] %v4259_v44  ;;  %v101_v40 = vld [vmem:[%s7054_s0] sm:$0xff]  ;;  %v4276_v32 = vld [vmem:[#allocation2 + $0x48] sm:$0xff]  ;;  %v4306_v18 = vld [vmem:[#allocation2 + $0x78] sm:$0xff] }
  0x2b   :  { %213 = vmatpush.msra.mxu1 %v4167_v49  ;;  %231 = vmatpush.msra.mxu2 %v4172_v50  ;;  %v102_v50 = vld [vmem:[#allocation2] sm:$0xff]  ;;  %v4285_v28 = vld [vmem:[#allocation2 + $0x28] sm:$0xff]  ;;  %v4310_v14 = vld [vmem:[#allocation2 + $0x58] sm:$0xff] }
  0x2c   :  { %254 = vmatpush.msra.mxu3 %v4119_v41  ;;  %194 = vmatpush.msra.mxu0 %v4153_v47  ;;  %7234 = vst [vmem:[#allocation30_spill] sm:$0xff] %v4310_v14 }
  0x2d   :  { %214 = vmatpush.msra.mxu1 %v4189_v53  ;;  %232 = vmatpush.msra.mxu2 %v4206_v56  ;;  %v4251_v56 = vld [vmem:[%s7057_s3 + $0x70] sm:$0xff] }
  0x2e   :  { %255 = vmatpush.msra.mxu3 %v4143_v45  ;;  %195 = vmatpush.msra.mxu0 %v4162_v48  ;;  %7228 = vst [vmem:[#allocation24_spill] sm:$0xff] %v4251_v56 }
  0x2f   :  { %215 = vmatpush.msra.mxu1 %v4201_v55  ;;  %233 = vmatpush.msra.mxu2 %v4235_v61  ;;  %v4272_v61 = vld [vmem:[%s7057_s3 + $0x30] sm:$0xff] }
  0x30   :  { %256 = vmatpush.msra.mxu3 %v4148_v46  ;;  %196 = vmatpush.msra.mxu0 %v4182_v52  ;;  %7230 = vst [vmem:[#allocation26_spill] sm:$0xff] %v4272_v61 }
  0x31   :  { %216 = vmatpush.msra.mxu1 %v4222_v59  ;;  %234 = vmatpush.msra.mxu2 %v4251_v56  ;;  %v4281_v56 = vld [vmem:[%s7057_s3 + $0x10] sm:$0xff] }
  0x32   :  { %257 = vmatpush.msra.mxu3 %v4177_v51  ;;  %197 = vmatpush.msra.mxu0 %v4213_v58  ;;  %7231 = vst [vmem:[#allocation27_spill] sm:$0xff] %v4281_v56 }
  0x33   :  { %258 = vmatmul.f32.vlgmr.msra.gmra.mxu3 %v4195_v54  ;;  %198 = vmatmul.f32.vlgmr.msra.gmra.mxu0 %v4195_v54 }
  0x34   :  { %278 = vmatpush.msrb.mxu3 %v4208_v57  ;;  %217 = vmatpush.msra.mxu1 %v4242_v62 }
  0x35   :  { %218 = vmatmul.f32.vlgmr.msra.gmra.mxu1 %v4195_v54  ;;  %235 = vmatpush.msra.mxu2 %v4259_v44  ;;  %v4289_v44 = vld [vmem:[#allocation2 + $0x8] sm:$0xff] }
  0x36   :  { %279 = vmatpush.msrb.mxu3 %v4224_v60  ;;  %7232 = vst [vmem:[#allocation28_spill] sm:$0xff] %v4289_v44 }
  0x37   :  { %236 = vmatpush.msra.mxu2 %v4272_v61  ;;  %v4300_v61 = vld [vmem:[#allocation2 + $0x30] sm:$0xff] }
  0x38   :  { %280 = vmatpush.msrb.mxu3 %v4244_v63 }
  0x39   :  { %237 = vmatpush.msra.mxu2 %v4281_v56  ;;  %v4303_v56 = vld [vmem:[#allocation2 + $0x10] sm:$0xff] }
  0x3a   :  { %281 = vmatpush.msrb.mxu3 %v102_v50  ;;  %238 = vmatmul.f32.vlgmr.msra.gmra.mxu2 %v4195_v54 }
  0x3b   :  { %3512 = vmatmul.msk.f32.vlgmr.msrb.gmra.mxu3 %vm262_vm0, %v101_v40 }
  0x3c   :  { %298 = vmatpush.msra.mxu3 %v4266_v36 }
  0x3e   :  { %299 = vmatpush.msra.mxu3 %v4276_v32 }
  0x40   :  { %300 = vmatpush.msra.mxu3 %v4285_v28 }
  0x42   :  { %301 = vmatpush.msra.mxu3 %v4289_v44  ;;  %v4313_v44 = vld [vmem:[#allocation2 + $0x38] sm:$0xff] }
  0x43   :  { %3513 = vmatmul.msk.f32.vlgmr.msra.gmra.mxu3 %vm262_vm0, %v101_v40  ;;  %7235 = vst [vmem:[#allocation31_spill] sm:$0xff] %v4313_v44 }
  0x44   :  { %318 = vmatpush.msrb.mxu3 %v4293_v24  ;;  %v4316_v24 = vld [vmem:[#allocation2 + $0x18] sm:$0xff] }
  0x45   :  { %7236 = vst [vmem:[#allocation32_spill] sm:$0xff] %v4316_v24 }
  0x46   :  { %319 = vmatpush.msrb.mxu3 %v4297_v22 }
  0x48   :  { %320 = vmatpush.msrb.mxu3 %v4300_v61 }
  0x4a   :  { %321 = vmatpush.msrb.mxu3 %v4303_v56 }
  0x4b   :  { %3514 = vmatmul.msk.f32.vlgmr.msrb.gmra.mxu3 %vm262_vm0, %v101_v40 }
  0x4c   :  { %338 = vmatpush.msra.mxu3 %v4306_v18 }
  0x4e   :  { %339 = vmatpush.msra.mxu3 %v4310_v14  ;;  %v4408_v14 = vld [vmem:[#allocation6 + $0x20] sm:$0xff] }
  0x4f   :  { %7243 = vst [vmem:[#allocation39_spill] sm:$0xff] %v4408_v14 }
  0x50   :  { %340 = vmatpush.msra.mxu3 %v4313_v44  ;;  %v4406_v44 = vld [vmem:[#allocation4 + $0x20] sm:$0xff] }
  0x51   :  { %7242 = vst [vmem:[#allocation38_spill] sm:$0xff] %v4406_v44 }
  0x52   :  { %341 = vmatpush.msra.mxu3 %v4316_v24  ;;  %v4402_v24 = vld [vmem:[#allocation6 + $0x28] sm:$0xff] }
  0x53   :  { %3515 = vmatmul.msk.f32.vlgmr.msra.gmra.mxu3 %vm262_vm0, %v101_v40  ;;  %v4372_v40 = vld [vmem:[#allocation6 + $0x50] sm:$0xff]  ;;  %7241 = vst [vmem:[#allocation37_spill] sm:$0xff] %v4402_v24 }
  0x54   :  { %607 = vmatpush.msrb.mxu3 %v3895_v3  ;;  %v4340_v3 = vld [vmem:[#allocation4 + $0x78] sm:$0xff] }
  0x55   :  { %425 = vmatpush.msrb.mxu0 %v4340_v3 }
  0x56   :  { %608 = vmatpush.msrb.mxu3 %v3902_v4  ;;  %v4342_v4 = vld [vmem:[#allocation6 + $0x78] sm:$0xff] }
  0x57   :  { %499 = vmatpush.msrb.mxu2 %v4342_v4 }
  0x58   :  { %609 = vmatpush.msrb.mxu3 %v3912_v6  ;;  %v4344_v6 = vld [vmem:[#allocation4 + $0x70] sm:$0xff] }
  0x59   :  { %426 = vmatpush.msrb.mxu0 %v4344_v6 }
  0x5a   :  { %610 = vmatpush.msrb.mxu3 %v3929_v9  ;;  %v4348_v9 = vld [vmem:[#allocation6 + $0x70] sm:$0xff] }
  0x5b   :  { %500 = vmatpush.msrb.mxu2 %v4348_v9 }
  0x5c   :  { %611 = vmatpush.msrb.mxu3 %v3952_v13  ;;  %v4350_v13 = vld [vmem:[#allocation4 + $0x68] sm:$0xff] }
  0x5d   :  { %427 = vmatpush.msrb.mxu0 %v4350_v13 }
  0x5e   :  { %612 = vmatpush.msrb.mxu3 %v3975_v17  ;;  %v4352_v17 = vld [vmem:[#allocation6 + $0x68] sm:$0xff] }
  0x5f   :  { %501 = vmatpush.msrb.mxu2 %v4352_v17 }
  0x60   :  { %613 = vmatpush.msrb.mxu3 %v3999_v21  ;;  %v4358_v21 = vld [vmem:[#allocation4 + $0x60] sm:$0xff] }
  0x61   :  { %428 = vmatpush.msrb.mxu0 %v4358_v21 }
  0x62   :  { %614 = vmatpush.msrb.mxu3 %v4028_v26  ;;  %v4360_v26 = vld [vmem:[#allocation6 + $0x60] sm:$0xff] }
  0x63   :  { %502 = vmatpush.msrb.mxu2 %v4360_v26 }
  0x64   :  { %615 = vmatpush.msrb.mxu3 %v4052_v30  ;;  %v4364_v30 = vld [vmem:[#allocation4 + $0x58] sm:$0xff] }
  0x65   :  { %429 = vmatpush.msrb.mxu0 %v4364_v30 }
  0x66   :  { %616 = vmatpush.msrb.mxu3 %v4076_v34  ;;  %v4366_v34 = vld [vmem:[#allocation6 + $0x58] sm:$0xff] }
  0x67   :  { %503 = vmatpush.msrb.mxu2 %v4366_v34 }
  0x68   :  { %617 = vmatpush.msrb.mxu3 %v4100_v38  ;;  %v4370_v38 = vld [vmem:[#allocation4 + $0x50] sm:$0xff] }
  0x69   :  { %430 = vmatpush.msrb.mxu0 %v4370_v38  ;;  %504 = vmatpush.msrb.mxu2 %v4372_v40 }
  0x6a   :  { %618 = vmatpush.msrb.mxu3 %v4124_v42  ;;  %v4376_v42 = vld [vmem:[#allocation4 + $0x48] sm:$0xff] }
  0x6b   :  { %431 = vmatpush.msrb.mxu0 %v4376_v42 }
  0x6c   :  { %619 = vmatpush.msrb.mxu3 %v4153_v47  ;;  %v4378_v47 = vld [vmem:[#allocation6 + $0x48] sm:$0xff] }
  0x6d   :  { %505 = vmatpush.msrb.mxu2 %v4378_v47 }
  0x6e   :  { %620 = vmatpush.msrb.mxu3 %v4162_v48  ;;  %v4382_v48 = vld [vmem:[#allocation4 + $0x40] sm:$0xff] }
  0x6f   :  { %432 = vmatpush.msrb.mxu0 %v4382_v48 }
  0x70   :  { %621 = vmatpush.msrb.mxu3 %v4182_v52  ;;  %v4388_v52 = vld [vmem:[#allocation4 + $0x38] sm:$0xff] }
  0x71   :  { %433 = vmatpush.msrb.mxu0 %v4388_v52 }
  0x72   :  { %622 = vmatpush.msrb.mxu3 %v4213_v58  ;;  %v4394_v58 = vld [vmem:[#allocation4 + $0x30] sm:$0xff] }
  0x73   :  { %7238 = vst [vmem:[#allocation34_spill] sm:$0xff] %v4394_v58  ;;  %434 = vmatpush.msrb.mxu0 %v4394_v58  ;;  %v4414_v58 = vld [vmem:[#allocation6 + $0x18] sm:$0xff] }
  0x74   :  { %702 = vmatpush.msra.mxu3 %v4208_v57  ;;  %v4390_v57 = vld [vmem:[#allocation6 + $0x38] sm:$0xff]  ;;  %7245 = vst [vmem:[#allocation41_spill] sm:$0xff] %v4414_v58 }
  0x75   :  { %7237 = vst [vmem:[#allocation33_spill] sm:$0xff] %v4390_v57 }
  0x76   :  { %703 = vmatpush.msra.mxu3 %v4224_v60  ;;  %v4396_v60 = vld [vmem:[#allocation6 + $0x30] sm:$0xff] }
  0x77   :  { %7239 = vst [vmem:[#allocation35_spill] sm:$0xff] %v4396_v60 }
  0x78   :  { %704 = vmatpush.msra.mxu3 %v4244_v63  ;;  %v4400_v63 = vld [vmem:[#allocation4 + $0x28] sm:$0xff] }
  0x79   :  { %7240 = vst [vmem:[#allocation36_spill] sm:$0xff] %v4400_v63  ;;  %435 = vmatpush.msrb.mxu0 %v4400_v63  ;;  %v4420_v63 = vld [vmem:[#allocation6 + $0x10] sm:$0xff] }
  0x7a   :  { %705 = vmatpush.msra.mxu3 %v102_v50  ;;  %v4384_v50 = vld [vmem:[#allocation6 + $0x40] sm:$0xff] }
  0x7b   :  { %506 = vmatpush.msrb.mxu2 %v4384_v50  ;;  %436 = vmatpush.msrb.mxu0 %v4406_v44  ;;  %v4426_v44 = vld [vmem:[#allocation6 + $0x8] sm:$0xff] }
  0x7c   :  { %7246 = vst [vmem:[#allocation42_spill] sm:$0xff] %v4426_v44 }
  0x7d   :  { %507 = vmatpush.msrb.mxu2 %v4390_v57  ;;  %v4412_v57 = vld [vmem:[#allocation4 + $0x18] sm:$0xff] }
  0x7e   :  { %7244 = vst [vmem:[#allocation40_spill] sm:$0xff] %v4412_v57  ;;  %437 = vmatpush.msrb.mxu0 %v4412_v57  ;;  %v4432_v57 = vld [vmem:[#allocation6] sm:$0xff] }
  0x7f   :  { %508 = vmatpush.msrb.mxu2 %v4396_v60  ;;  %v4418_v60 = vld [vmem:[#allocation4 + $0x10] sm:$0xff]  ;;  %7248 = vst [vmem:[#allocation44_spill] sm:$0xff] %v4432_v57 }
  0x80   :  { %438 = vmatpush.msrb.mxu0 %v4418_v60 }
  0x81   :  { %509 = vmatpush.msrb.mxu2 %v4402_v24  ;;  %v4424_v24 = vld [vmem:[#allocation4 + $0x8] sm:$0xff] }
  0x82   :  { %439 = vmatpush.msrb.mxu0 %v4424_v24 }
  0x83   :  { %510 = vmatpush.msrb.mxu2 %v4408_v14  ;;  %v4430_v14 = vld [vmem:[#allocation4] sm:$0xff] }
  0x84   :  { %7247 = vst [vmem:[#allocation43_spill] sm:$0xff] %v4430_v14  ;;  %440 = vmatpush.msrb.mxu0 %v4430_v14 }
  0x85   :  { %511 = vmatpush.msrb.mxu2 %v4414_v58 }
  0x86   :  { %627 = vmatpush.msra.mxu0 %v3919_v7 }
  0x87   :  { %512 = vmatpush.msrb.mxu2 %v4420_v63 }
  0x88   :  { %628 = vmatpush.msra.mxu0 %v3935_v10 }
  0x89   :  { %513 = vmatpush.msrb.mxu2 %v4426_v44  ;;  %v4445_v44 = vld [vmem:[%s7058_s4] sm:$0xf] }
  0x8a   :  { %629 = vmatpush.msra.mxu0 %v3942_v11 }
  0x8b   :  { %514 = vmatpush.msrb.mxu2 %v4432_v57  ;;  %v348_v57 = vperm.slane %v4445_v44, 0 }
  0x8c   :  { %630 = vmatpush.msra.mxu0 %v3965_v15 }
  0x8d   :  { %667 = vmatpush.msra.mxu2 %v3879_v0 }
  0x8e   :  { %631 = vmatpush.msra.mxu0 %v3989_v19 }
  0x8f   :  { %668 = vmatpush.msra.mxu2 %v3884_v1 }
  0x90   :  { %632 = vmatpush.msra.mxu0 %v4013_v23 }
  0x91   :  { %669 = vmatpush.msra.mxu2 %v3890_v2 }
  0x92   :  { %633 = vmatpush.msra.mxu0 %v4037_v27 }
  0x93   :  { %670 = vmatpush.msra.mxu2 %v3907_v5  ;;  %v349_v5 = vperm.slane %v4445_v44, 1 }
  0x94   :  { %634 = vmatpush.msra.mxu0 %v4061_v31 }
  0x95   :  { %671 = vmatpush.msra.mxu2 %v3924_v8 }
  0x96   :  { %635 = vmatpush.msra.mxu0 %v4085_v35  ;;  %v351_v35 = vperm.slane %v4445_v44, 3 }
  0x97   :  { %672 = vmatpush.msra.mxu2 %v3947_v12 }
  0x98   :  { %636 = vmatpush.msra.mxu0 %v4109_v39 }
  0x99   :  { %673 = vmatpush.msra.mxu2 %v3970_v16 }
  0x9a   :  { %637 = vmatpush.msra.mxu0 %v4133_v43 }
  0x9b   :  { %674 = vmatpush.msra.mxu2 %v3994_v20 }
  0x9c   :  { %638 = vmatpush.msra.mxu0 %v4167_v49 }
  0x9d   :  { %675 = vmatpush.msra.mxu2 %v4023_v25 }
  0x9e   :  { %639 = vmatpush.msra.mxu0 %v4189_v53 }
  0x9f   :  { %676 = vmatpush.msra.mxu2 %v4047_v29 }
  0xa0   :  { %640 = vmatpush.msra.mxu0 %v4201_v55 }
  0xa1   :  { %677 = vmatpush.msra.mxu2 %v4071_v33 }
  0xa2   :  { %641 = vmatpush.msra.mxu0 %v4222_v59 }
  0xa3   :  { %678 = vmatpush.msra.mxu2 %v4095_v37 }
  0xa4   :  { %642 = vmatpush.msra.mxu0 %v4242_v62 }
  0xa5   :  { %679 = vmatpush.msra.mxu2 %v4119_v41 }
  0xa7   :  { %680 = vmatpush.msra.mxu2 %v4143_v45 }
  0xa9   :  { %681 = vmatpush.msra.mxu2 %v4148_v46  ;;  %v350_v46 = vperm.slane %v4445_v44, 2 }
  0xab   :  { %682 = vmatpush.msra.mxu2 %v4177_v51 }
  0xb0   :  { %v199_v14 = vpop.f32.mrf.mxu0 }
  0xb2   :  { %v219_v2 = vpop.f32.mrf.mxu1 }
  0xb6   :  { %v4434_v58 = vpop.f32.mrf.mxu3 }
  0xbd   :  { %v239_v33 = vpop.f32.mrf.mxu2 }
  0xbe   :  { %v283_v0 = vpop.f32.mrf.mxu3 }
  0xbf   :  { %v284_v7 = vadd.f32 %v283_v0, %v199_v14 }
  0xc1   :  { %v356_v1 = vadd.f32 %v348_v57, %v284_v7 }
  0xc3   :  { %v3516_v10 = vmul.f32 -1.442695, %v356_v1 }
  0xc5   :  { %3598 = vpow2.f32 %v3516_v10 }
  0xc6   :  { %v303_v11 = vpop.f32.mrf.mxu3 }
  0xc7   :  { %v304_v8 = vadd.f32 %v303_v11, %v219_v2 }
  0xc9   :  { %v357_v12 = vadd.f32 %v349_v5, %v304_v8 }
  0xcb   :  { %v3599_v14 = vpop.eup %3598  ;;  %v3517_v15 = vmul.f32 -1.442695, %v357_v12 }
  0xcc   :  { %v363_v16 = vadd.f32 1.0, %v3599_v14 }
  0xcd   :  { %3600 = vpow2.f32 %v3517_v15 }
  0xce   :  { %3602 = vrcp.f32 %v363_v16  ;;  %v323_v19 = vpop.f32.mrf.mxu3  ;;  %v375_v37 = vand.u32 2147483648, %v363_v16  ;;  %v373_v43 = vand.u32 2147483647, %v363_v16  ;;  %vm369_vm2 = vweird.f32 %v363_v16 }
  0xcf   :  { %v324_v45 = vadd.f32 %v323_v19, %v239_v33  ;;  %v7262_v33 = vld [vmem:[#allocation41_spill] sm:$0xff] }
  0xd0   :  { %v376_v51 = vor.u32 1.1754944e-38, %v375_v37  ;;  %vm374_vm4 = vcmp.eq.f32.partialorder %v373_v43, 8.507059e+37  ;;  %v7264_v37 = vld [vmem:[#allocation42_spill] sm:$0xff]  ;;  %v7267_v43 = vld [vmem:[#allocation44_spill] sm:$0xff] }
  0xd1   :  { %v358_v7 = vadd.f32 %v350_v46, %v324_v45  ;;  %v7268_v45 = vld [vmem:[#allocation14_spill] sm:$0xff]  ;;  %v7271_v46 = vld [vmem:[#allocation17_spill] sm:$0xff] }
  0xd3   :  { %v3601_v20 = vpop.eup %3600 }
  0xd4   :  { %v3603_v23 = vpop.eup %3602  ;;  %v382_v25 = vadd.f32 1.0, %v3601_v20 }
  0xd5   :  { %v365_v27 = vmul.f32 %v3603_v23, %v363_v16  ;;  %vm370_vm1 = vweird.f32 %v3603_v23 }
  0xd6   :  { %3604 = vrcp.f32 %v382_v25  ;;  %v343_v29 = vpop.f32.mrf.mxu3  ;;  %vm371_vm3 = vmor %vm369_vm2, %vm370_vm1  ;;  %v392_v2 = vand.u32 2147483647, %v382_v25  ;;  %vm388_vm6 = vweird.f32 %v382_v25 }
  0xd7   :  { %v366_v31 = vsub.f32 1.0, %v365_v27  ;;  %v344_v39 = vadd.f32 %v343_v29, %v4434_v58  ;;  %v394_v58 = vand.u32 2147483648, %v382_v25  ;;  %v4493_v27 = vld [vmem:[#allocation7 + $0x68] sm:$0xff]  ;;  %v7261_v29 = vld [vmem:[#allocation40_spill] sm:$0xff] }
  0xd8   :  { %vm393_vm8 = vcmp.eq.f32.partialorder %v392_v2, 8.507059e+37 }
  0xd9   :  { %v367_v41 = vmul.f32 %v3603_v23, %v366_v31  ;;  %v359_v59 = vadd.f32 %v351_v35, %v344_v39  ;;  %v395_v44 = vor.u32 1.1754944e-38, %v394_v58  ;;  %v463_v31 = vld [vmem:[#allocation7] sm:$0xff]  ;;  %v7265_v39 = vld [vmem:[#allocation13_spill] sm:$0xff] }
  0xda   :  { %v7263_v35 = vld [vmem:[#allocation12_spill] sm:$0xff] }
  0xdb   :  { %v368_v49 = vadd.f32 %v3603_v23, %v367_v41  ;;  %v7266_v41 = vld [vmem:[#allocation43_spill] sm:$0xff] }
  0xdc   :  { %v3605_v53 = vpop.eup %3604 }
  0xdd   :  { %v384_v55 = vmul.f32 %v3605_v53, %v382_v25  ;;  %v372_v62 = vsel %vm371_vm3, %v3603_v23, %v368_v49  ;;  %vm389_vm5 = vweird.f32 %v3605_v53  ;;  %v4486_v23 = vld [vmem:[#allocation7 + $0x78] sm:$0xff]  ;;  %v4488_v25 = vld [vmem:[#allocation7 + $0x70] sm:$0xff] }
  0xde   :  { %v377_v57 = vsel %vm374_vm4, %v376_v51, %v372_v62  ;;  %vm390_vm7 = vmor %vm388_vm6, %vm389_vm5  ;;  %479 = vmatpush.msrb.mxu1 %v4486_v23  ;;  %v7272_v49 = vld [vmem:[#allocation18_spill] sm:$0xff]  ;;  %v7275_v51 = vld [vmem:[#allocation21_spill] sm:$0xff] }
  0xdf   :  { %v385_v0 = vsub.f32 1.0, %v384_v55  ;;  %v398_v1 = vmul.f32 %v377_v57, %v359_v59  ;;  %v7276_v55 = vld [vmem:[#allocation22_spill] sm:$0xff]  ;;  %v7277_v59 = vld [vmem:[#allocation23_spill] sm:$0xff]  ;;  %v7278_v62 = vld [vmem:[#allocation24_spill] sm:$0xff] }
  0xe0   :  { %480 = vmatpush.msrb.mxu1 %v4488_v25  ;;  %v7279_v57 = vld [vmem:[#allocation25_spill] sm:$0xff] }
  0xe1   :  { %v386_v10 = vmul.f32 %v3605_v53, %v385_v0  ;;  %v399_v5 = vadd.f32 %v398_v1, %v358_v7  ;;  %v7280_v0 = vld [vmem:[#allocation26_spill] sm:$0xff]  ;;  %v7281_v7 = vld [vmem:[#allocation27_spill] sm:$0xff]  ;;  %v3582_v1 = vld [vmem:[%s7060_s6] ss:$0 sm:$0xff] }
  0xe2   :  { %481 = vmatpush.msrb.mxu1 %v4493_v27 }
  0xe3   :  { %v387_v11 = vadd.f32 %v3605_v53, %v386_v10  ;;  %3606 = vtanh.f32 %v399_v5 }
  0xe5   :  { %v391_v8 = vsel %vm390_vm7, %v3605_v53, %v387_v11  ;;  %v7273_v53 = vld [vmem:[#allocation19_spill] sm:$0xff]  ;;  %v4610_v11 = vld [vmem:[%s7057_s3 + $0x1e0] sm:$0xff] }
  0xe6   :  { %v396_v12 = vsel %vm393_vm8, %v395_v44, %v391_v8  ;;  %v4615_v44 = vld [vmem:[%s7057_s3 + $0x1c0] sm:$0xff] }
  0xe7   :  { %v401_v14 = vsub.f32 1.0, %v396_v12  ;;  %v403_v19 = vmul.f32 %v396_v12, %v4195_v54  ;;  %v4508_v54 = vld [vmem:[#allocation7 + $0x60] sm:$0xff] }
  0xe8   :  { %482 = vmatpush.msrb.mxu1 %v4508_v54  ;;  %v4623_v8 = vld [vmem:[%s7057_s3 + $0x1a0] sm:$0xff] }
  0xe9   :  { %v3607_v15 = vpop.eup %3606 }
  0xea   :  { %v402_v16 = vmul.f32 %v3607_v15, %v401_v14  ;;  %v4639_v15 = vld [vmem:[%s7058_s4] sm:$0xf] }
  0xec   :  { %v4481_v20 = vadd.f32 %v403_v19, %v402_v16  ;;  %v772_v19 = vperm.slane %v4639_v15, 0 }
  0xee   :  { %441 = vmatmul.f32.vlgmr.msrb.gmra.mxu0 %v4481_v20  ;;  %515 = vmatmul.f32.vlgmr.msrb.gmra.mxu2 %v4481_v20 }
  0xef   :  { %623 = vmatmul.f32.vlgmr.msrb.gmra.mxu3 %v4481_v20  ;;  %849 = vmatpush.msrb.mxu0 %v4340_v3  ;;  %v4520_v3 = vld [vmem:[#allocation7 + $0x50] sm:$0xff] }
  0xf0   :  { %722 = vmatpush.msrb.mxu3 %v4266_v36  ;;  %923 = vmatpush.msrb.mxu2 %v4342_v4  ;;  %v4504_v36 = vld [vmem:[%s7054_s0 + $0x8] sm:$0xff] }
  0xf1   :  { %850 = vmatpush.msrb.mxu0 %v4344_v6  ;;  %v7250_v4 = vld [vmem:[#allocation29_spill] sm:$0xff] }
  0xf2   :  { %723 = vmatpush.msrb.mxu3 %v4276_v32  ;;  %924 = vmatpush.msrb.mxu2 %v4348_v9  ;;  %v4514_v32 = vld [vmem:[#allocation7 + $0x58] sm:$0xff]  ;;  %v4525_v6 = vld [vmem:[#allocation7 + $0x48] sm:$0xff]  ;;  %v4531_v9 = vld [vmem:[#allocation7 + $0x40] sm:$0xff] }
  0xf3   :  { %851 = vmatpush.msrb.mxu0 %v4350_v13  ;;  %483 = vmatpush.msrb.mxu1 %v4514_v32  ;;  %v4537_v13 = vld [vmem:[#allocation7 + $0x38] sm:$0xff] }
  0xf4   :  { %724 = vmatpush.msrb.mxu3 %v4285_v28  ;;  %925 = vmatpush.msrb.mxu2 %v4352_v17  ;;  %v7249_v28 = vld [vmem:[#allocation28_spill] sm:$0xff]  ;;  %v7251_v17 = vld [vmem:[#allocation30_spill] sm:$0xff] }
  0xf5   :  { %852 = vmatpush.msrb.mxu0 %v4358_v21  ;;  %484 = vmatpush.msrb.mxu1 %v4520_v3  ;;  %v4556_v21 = vld [vmem:[#allocation7 + $0x20] sm:$0xff] }
  0xf6   :  { %643 = vmatmul.f32.vlgmr.msra.gmra.mxu0 %v4481_v20  ;;  %683 = vmatmul.f32.vlgmr.msra.gmra.mxu2 %v4481_v20 }
  0xf7   :  { %3519 = vmatmul.msk.f32.vlgmr.msra.gmra.mxu3 %vm262_vm0, %v4504_v36  ;;  %926 = vmatpush.msrb.mxu2 %v4360_v26  ;;  %v7253_v26 = vld [vmem:[#allocation34_spill] sm:$0xff] }
  0xf8   :  { %725 = vmatpush.msrb.mxu3 %v7249_v28  ;;  %853 = vmatpush.msrb.mxu0 %v4364_v30  ;;  %v7254_v30 = vld [vmem:[#allocation31_spill] sm:$0xff] }
  0xf9   :  { %927 = vmatpush.msrb.mxu2 %v4366_v34  ;;  %485 = vmatpush.msrb.mxu1 %v4525_v6  ;;  %v7255_v34 = vld [vmem:[#allocation35_spill] sm:$0xff] }
  0xfa   :  { %742 = vmatpush.msra.mxu3 %v7250_v4  ;;  %854 = vmatpush.msrb.mxu0 %v4370_v38  ;;  %v7256_v38 = vld [vmem:[#allocation36_spill] sm:$0xff] }
  0xfb   :  { %928 = vmatpush.msrb.mxu2 %v4372_v40  ;;  %486 = vmatpush.msrb.mxu1 %v4531_v9  ;;  %v7257_v40 = vld [vmem:[#allocation32_spill] sm:$0xff] }
  0xfc   :  { %743 = vmatpush.msra.mxu3 %v4297_v22  ;;  %855 = vmatpush.msrb.mxu0 %v4376_v42  ;;  %v4545_v22 = vld [vmem:[#allocation7 + $0x30] sm:$0xff]  ;;  %v4652_v4 = vld [vmem:[%s7057_s3 + $0x160] sm:$0xff] }
  0xfd   :  { %929 = vmatpush.msrb.mxu2 %v4378_v47  ;;  %487 = vmatpush.msrb.mxu1 %v4537_v13  ;;  %v465_v42 = vld [vmem:[#allocation7 + $0x10] sm:$0xff]  ;;  %v7258_v47 = vld [vmem:[#allocation37_spill] sm:$0xff] }
  0xfe   :  { %744 = vmatpush.msra.mxu3 %v4300_v61  ;;  %856 = vmatpush.msrb.mxu0 %v4382_v48  ;;  %v4550_v61 = vld [vmem:[#allocation7 + $0x28] sm:$0xff]  ;;  %v7259_v48 = vld [vmem:[#allocation38_spill] sm:$0xff] }
  0xff   :  { %3520 = vmatmul.msk.f32.vlgmr.msrb.gmra.mxu3 %vm262_vm0, %v4504_v36  ;;  %930 = vmatpush.msrb.mxu2 %v4384_v50  ;;  %v464_v50 = vld [vmem:[#allocation7 + $0x8] sm:$0xff] }
 0x100   :  { %745 = vmatpush.msra.mxu3 %v4303_v56  ;;  %857 = vmatpush.msrb.mxu0 %v4388_v52  ;;  %v7252_v56 = vld [vmem:[#allocation33_spill] sm:$0xff]  ;;  %v7260_v52 = vld [vmem:[#allocation39_spill] sm:$0xff] }
 0x101   :  { %488 = vmatpush.msrb.mxu1 %v4545_v22  ;;  %931 = vmatpush.msrb.mxu2 %v7252_v56  ;;  %v4687_v56 = vld [vmem:[%s7057_s3 + $0x120] sm:$0xff] }
 0x102   :  { %762 = vmatpush.msrb.mxu3 %v4306_v18  ;;  %858 = vmatpush.msrb.mxu0 %v7253_v26  ;;  %v4562_v18 = vld [vmem:[#allocation7 + $0x18] sm:$0xff]  ;;  %v4692_v26 = vld [vmem:[%s7057_s3 + $0x1a8] sm:$0xff] }
 0x103   :  { %489 = vmatpush.msrb.mxu1 %v4550_v61  ;;  %932 = vmatpush.msrb.mxu2 %v7255_v34  ;;  %v4708_v34 = vld [vmem:[%s7057_s3 + $0x100] sm:$0xff] }
 0x104   :  { %763 = vmatpush.msrb.mxu3 %v7251_v17  ;;  %859 = vmatpush.msrb.mxu0 %v7256_v38  ;;  %v4675_v17 = vld [vmem:[%s7057_s3 + $0x1c8] sm:$0xff] }
 0x105   :  { %490 = vmatpush.msrb.mxu1 %v4556_v21  ;;  %933 = vmatpush.msrb.mxu2 %v7258_v47  ;;  %v4713_v38 = vld [vmem:[%s7057_s3 + $0x188] sm:$0xff] }
 0x106   :  { %764 = vmatpush.msrb.mxu3 %v7254_v30  ;;  %860 = vmatpush.msrb.mxu0 %v7259_v48  ;;  %v4697_v30 = vld [vmem:[%s7057_s3 + $0x1b8] sm:$0xff]  ;;  %v4731_v47 = vld [vmem:[%s7057_s3 + $0x168] sm:$0xff] }
 0x107   :  { %3521 = vmatmul.msk.f32.vlgmr.msra.gmra.mxu3 %vm262_vm0, %v4504_v36  ;;  %491 = vmatpush.msrb.mxu1 %v4562_v18  ;;  %v4736_v48 = vld [vmem:[%s7057_s3 + $0x178] sm:$0xff] }
 0x108   :  { %765 = vmatpush.msrb.mxu3 %v7257_v40  ;;  %934 = vmatpush.msrb.mxu2 %v7260_v52  ;;  %v4718_v40 = vld [vmem:[%s7057_s3 + $0x198] sm:$0xff]  ;;  %v4750_v52 = vld [vmem:[%s7057_s3 + $0x148] sm:$0xff] }
 0x109   :  { %492 = vmatpush.msrb.mxu1 %v465_v42  ;;  %861 = vmatpush.msrb.mxu0 %v7261_v29  ;;  %v4755_v29 = vld [vmem:[%s7057_s3 + $0x158] sm:$0xff] }
 0x10a   :  { %935 = vmatpush.msrb.mxu2 %v7262_v33  ;;  %1032 = vmatpush.msra.mxu3 %v4610_v11  ;;  %v4763_v33 = vld [vmem:[%s7057_s3 + $0xa0] sm:$0xff] }
 0x10b   :  { %493 = vmatpush.msrb.mxu1 %v464_v50  ;;  %862 = vmatpush.msrb.mxu0 %v4418_v60  ;;  %v7269_v60 = vld [vmem:[#allocation15_spill] sm:$0xff] }
 0x10c   :  { %936 = vmatpush.msrb.mxu2 %v4420_v63  ;;  %v7270_v63 = vld [vmem:[#allocation16_spill] sm:$0xff]  ;;  %1033 = vmatpush.msra.mxu3 %v4615_v44 }
 0x10d   :  { %494 = vmatpush.msrb.mxu1 %v463_v31  ;;  %863 = vmatpush.msrb.mxu0 %v4424_v24  ;;  %v7274_v24 = vld [vmem:[#allocation20_spill] sm:$0xff] }
 0x10e   :  { %937 = vmatpush.msrb.mxu2 %v7264_v37  ;;  %1034 = vmatpush.msra.mxu3 %v4623_v8  ;;  %v4773_v37 = vld [vmem:[%s7057_s3 + $0x138] sm:$0xff] }
 0x10f   :  { %3522 = vmatmul.msk.f32.vlgmr.msrb.gmra.mxu3 %vm262_vm0, %v4504_v36  ;;  %647 = vmatpush.msra.mxu1 %v7263_v35  ;;  %v4768_v35 = vld [vmem:[%s7057_s3 + $0x128] sm:$0xff] }
 0x110   :  { %864 = vmatpush.msrb.mxu0 %v7266_v41  ;;  %938 = vmatpush.msrb.mxu2 %v7267_v43  ;;  %v4783_v41 = vld [vmem:[%s7057_s3 + $0x80] sm:$0xff]  ;;  %v4788_v43 = vld [vmem:[%s7057_s3 + $0x108] sm:$0xff] }
 0x111   :  { %648 = vmatpush.msra.mxu1 %v7265_v39 }
 0x113   :  { %649 = vmatpush.msra.mxu1 %v7268_v45  ;;  %v4793_v45 = vld [vmem:[%s7057_s3 + $0x118] sm:$0xff] }
 0x115   :  { %650 = vmatpush.msra.mxu1 %v7269_v60 }
 0x117   :  { %651 = vmatpush.msra.mxu1 %v7270_v63  ;;  %v4803_v63 = vld [vmem:[%s7057_s3 + $0x60] sm:$0xff] }
 0x119   :  { %652 = vmatpush.msra.mxu1 %v7271_v46  ;;  %v4808_v46 = vld [vmem:[%s7057_s3 + $0xe8] sm:$0xff] }
 0x11b   :  { %653 = vmatpush.msra.mxu1 %v7272_v49  ;;  %v4813_v49 = vld [vmem:[%s7057_s3 + $0xf8] sm:$0xff] }
 0x11d   :  { %654 = vmatpush.msra.mxu1 %v7273_v53 }
 0x11f   :  { %655 = vmatpush.msra.mxu1 %v7274_v24  ;;  %v4824_v24 = vld [vmem:[%s7057_s3 + $0x40] sm:$0xff] }
 0x121   :  { %656 = vmatpush.msra.mxu1 %v7275_v51  ;;  %v4829_v51 = vld [vmem:[%s7057_s3 + $0xc8] sm:$0xff] }
 0x123   :  { %657 = vmatpush.msra.mxu1 %v7276_v55  ;;  %v4834_v55 = vld [vmem:[%s7057_s3 + $0xd8] sm:$0xff] }
 0x125   :  { %658 = vmatpush.msra.mxu1 %v7277_v59  ;;  %v4842_v59 = vld [vmem:[%s7057_s3 + $0x20] sm:$0xff] }
 0x127   :  { %659 = vmatpush.msra.mxu1 %v7278_v62  ;;  %v4847_v62 = vld [vmem:[%s7057_s3 + $0xa8] sm:$0xff] }
 0x129   :  { %660 = vmatpush.msra.mxu1 %v7279_v57  ;;  %v4852_v57 = vld [vmem:[%s7057_s3 + $0xb8] sm:$0xff] }
 0x12a   :  { %7282 = vst [vmem:[#allocation28_spill] sm:$0xff] %v4852_v57 }
 0x12b   :  { %661 = vmatpush.msra.mxu1 %v7280_v0 }
 0x12d   :  { %662 = vmatpush.msra.mxu1 %v7281_v7  ;;  %v4861_v7 = vld [vmem:[%s7057_s3] sm:$0xff] }
 0x16b   :  { %v442_v58 = vpop.f32.mrf.mxu0 }
 0x16c   :  { %v443_v10 = vadd.f32 %v3582_v1, %v442_v58  ;;  %v4866_v1 = vld [vmem:[%s7057_s3 + $0x88] sm:$0xff]  ;;  %v4871_v58 = vld [vmem:[%s7057_s3 + $0x98] sm:$0xff] }
 0x16d   :  { %7283 = vst [vmem:[#allocation29_spill] sm:$0xff] %v4866_v1 }
 0x16e   :  { %3608 = vtanh.f32 %v443_v10  ;;  %7284 = vst [vmem:[#allocation30_spill] sm:$0xff] %v4871_v58 }
 0x172   :  { %v624_v12 = vpop.f32.mrf.mxu3 }
 0x174   :  { %v3609_v2 = vpop.eup %3608 }
 0x175   :  { %v446_v5 = vmul.f32 %v3609_v2, %v4481_v20  ;;  %v516_v2 = vpop.f32.mrf.mxu2 }
 0x177   :  { %495 = vmatmul.f32.vlgmr.msrb.gmra.mxu1 %v446_v5 }
 0x178   :  { %903 = vmatpush.msrb.mxu1 %v4486_v23 }
 0x17a   :  { %904 = vmatpush.msrb.mxu1 %v4488_v25  ;;  %v707_v14 = vpop.f32.mrf.mxu3 }
 0x17b   :  { %v708_v16 = vadd.f32 %v707_v14, %v624_v12  ;;  %v4882_v12 = vld [vmem:[%s7057_s3 + $0x68] sm:$0xff]  ;;  %v4887_v14 = vld [vmem:[%s7057_s3 + $0x78] sm:$0xff] }
 0x17c   :  { %905 = vmatpush.msrb.mxu1 %v4493_v27  ;;  %v644_v27 = vpop.f32.mrf.mxu0  ;;  %7285 = vst [vmem:[#allocation33_spill] sm:$0xff] %v4882_v12 }
 0x17d   :  { %v780_v23 = vadd.f32 %v772_v19, %v708_v16  ;;  %7286 = vst [vmem:[#allocation34_spill] sm:$0xff] %v4887_v14  ;;  %v4889_v16 = vld [vmem:[#allocation2 + $0x60] sm:$0xff]  ;;  %v4896_v19 = vld [vmem:[%s7057_s3 + $0x48] sm:$0xff] }
 0x17e   :  { %906 = vmatpush.msrb.mxu1 %v4508_v54  ;;  %7287 = vst [vmem:[#allocation31_spill] sm:$0xff] %v4896_v19 }
 0x17f   :  { %663 = vmatmul.f32.vlgmr.msra.gmra.mxu1 %v4481_v20  ;;  %v3523_v36 = vmul.f32 -1.442695, %v780_v23  ;;  %v4901_v23 = vld [vmem:[%s7057_s3 + $0x58] sm:$0xff] }
 0x180   :  { %907 = vmatpush.msrb.mxu1 %v4514_v32  ;;  %v773_v32 = vperm.slane %v4639_v15, 1  ;;  %7288 = vst [vmem:[#allocation35_spill] sm:$0xff] %v4901_v23 }
 0x181   :  { %3610 = vpow2.f32 %v3523_v36  ;;  %v4910_v36 = vld [vmem:[%s7057_s3 + $0x28] sm:$0xff] }
 0x182   :  { %908 = vmatpush.msrb.mxu1 %v4520_v3  ;;  %v727_v25 = vpop.f32.mrf.mxu3  ;;  %v4646_v3 = vld [vmem:[%s7057_s3 + $0x180] sm:$0xff]  ;;  %7289 = vst [vmem:[#allocation36_spill] sm:$0xff] %v4910_v36 }
 0x183   :  { %v728_v54 = vadd.f32 %v727_v25, %v644_v27  ;;  %1035 = vmatpush.msra.mxu3 %v4646_v3  ;;  %v4903_v25 = vld [vmem:[#allocation2 + $0x40] sm:$0xff] }
 0x184   :  { %909 = vmatpush.msrb.mxu1 %v4525_v6  ;;  %v4657_v6 = vld [vmem:[%s7057_s3 + $0x1e8] sm:$0xff] }
 0x185   :  { %v781_v28 = vadd.f32 %v773_v32, %v728_v54  ;;  %1036 = vmatpush.msra.mxu3 %v4652_v4  ;;  %1052 = vmatpush.msra.mxu0 %v4657_v6  ;;  %v4912_v54 = vld [vmem:[#allocation2 + $0x20] sm:$0xff] }
 0x186   :  { %910 = vmatpush.msrb.mxu1 %v4531_v9  ;;  %v4662_v9 = vld [vmem:[%s7057_s3 + $0x1f8] sm:$0xff] }
 0x187   :  { %1092 = vmatpush.msra.mxu2 %v4662_v9  ;;  %1053 = vmatpush.msra.mxu0 %v4675_v17 }
 0x188   :  { %911 = vmatpush.msrb.mxu1 %v4537_v13  ;;  %v3524_v13 = vmul.f32 -1.442695, %v781_v28  ;;  %v4921_v28 = vld [vmem:[%s7057_s3 + $0x38] sm:$0xff] }
 0x189   :  { %1054 = vmatpush.msra.mxu0 %v4692_v26  ;;  %7290 = vst [vmem:[#allocation32_spill] sm:$0xff] %v4921_v28 }
 0x18a   :  { %912 = vmatpush.msrb.mxu1 %v4545_v22  ;;  %v3611_v22 = vpop.eup %3610  ;;  %3612 = vpow2.f32 %v3524_v13  ;;  %v4854_v0 = vpop.f32.mrf.mxu3  ;;  %v3583_v13 = vld [vmem:[%s7063_s9] ss:$0 sm:$0xff] }
 0x18b   :  { %1055 = vmatpush.msra.mxu0 %v4713_v38 }
 0x18c   :  { %913 = vmatpush.msrb.mxu1 %v4550_v61  ;;  %v4670_v61 = vld [vmem:[%s7057_s3 + $0x140] sm:$0xff] }
 0x18d   :  { %1037 = vmatpush.msra.mxu3 %v4670_v61  ;;  %1056 = vmatpush.msra.mxu0 %v4731_v47 }
 0x18e   :  { %914 = vmatpush.msrb.mxu1 %v4556_v21  ;;  %v4680_v21 = vld [vmem:[%s7057_s3 + $0x1d8] sm:$0xff] }
 0x18f   :  { %1093 = vmatpush.msra.mxu2 %v4680_v21  ;;  %1038 = vmatpush.msra.mxu3 %v4687_v56 }
 0x190   :  { %915 = vmatpush.msrb.mxu1 %v4562_v18  ;;  %v4700_v18 = vadd.f32 1.0, %v3611_v22  ;;  %1057 = vmatpush.msra.mxu0 %v4750_v52  ;;  %v4930_v22 = vld [vmem:[%s7057_s3 + $0x8] sm:$0xff] }
 0x191   :  { %1094 = vmatpush.msra.mxu2 %v4697_v30  ;;  %1039 = vmatpush.msra.mxu3 %v4708_v34  ;;  %7291 = vst [vmem:[#allocation37_spill] sm:$0xff] %v4930_v22 }
 0x192   :  { %916 = vmatpush.msrb.mxu1 %v465_v42  ;;  %v4726_v42 = vld [vmem:[%s7057_s3 + $0xe0] sm:$0xff]  ;;  %3614 = vrcp.f32 %v4700_v18  ;;  %1058 = vmatpush.msra.mxu0 %v4768_v35  ;;  %vm793_vm10 = vweird.f32 %v4700_v18 }
 0x193   :  { %1095 = vmatpush.msra.mxu2 %v4718_v40  ;;  %1040 = vmatpush.msra.mxu3 %v4726_v42 }
 0x194   :  { %917 = vmatpush.msrb.mxu1 %v464_v50  ;;  %v4745_v50 = vld [vmem:[%s7057_s3 + $0xc0] sm:$0xff]  ;;  %1059 = vmatpush.msra.mxu0 %v4788_v43 }
 0x195   :  { %1096 = vmatpush.msra.mxu2 %v4736_v48  ;;  %1041 = vmatpush.msra.mxu3 %v4745_v50 }
 0x196   :  { %918 = vmatpush.msrb.mxu1 %v463_v31  ;;  %v3613_v31 = vpop.eup %3612  ;;  %1060 = vmatpush.msra.mxu0 %v4808_v46 }
 0x197   :  { %1097 = vmatpush.msra.mxu2 %v4755_v29  ;;  %1042 = vmatpush.msra.mxu3 %v4763_v33  ;;  %v4777_v39 = vadd.f32 1.0, %v3613_v31  ;;  %v4932_v31 = vld [vmem:[#allocation2] sm:$0xff] }
 0x198   :  { %v4795_v60 = vpop.eup %3614  ;;  %1061 = vmatpush.msra.mxu0 %v4829_v51 }
 0x199   :  { %1098 = vmatpush.msra.mxu2 %v4773_v37  ;;  %1043 = vmatpush.msra.mxu3 %v4783_v41  ;;  %3616 = vrcp.f32 %v4777_v39  ;;  %v789_v53 = vmul.f32 %v4795_v60, %v4700_v18  ;;  %vm794_vm9 = vweird.f32 %v4795_v60  ;;  %vm812_vm14 = vweird.f32 %v4777_v39 }
 0x19a   :  { %1062 = vmatpush.msra.mxu0 %v4847_v62  ;;  %vm795_vm11 = vmor %vm793_vm10, %vm794_vm9 }
 0x19b   :  { %1099 = vmatpush.msra.mxu2 %v4793_v45  ;;  %1044 = vmatpush.msra.mxu3 %v4803_v63  ;;  %v790_v10 = vsub.f32 1.0, %v789_v53 }
 0x19c   :  { %1063 = vmatpush.msra.mxu0 %v4866_v1 }
 0x19d   :  { %1100 = vmatpush.msra.mxu2 %v4813_v49  ;;  %1045 = vmatpush.msra.mxu3 %v4824_v24  ;;  %v791_v27 = vmul.f32 %v4795_v60, %v790_v10  ;;  %v4939_v10 = vld [vmem:[%s7057_s3 + $0x18] sm:$0xff] }
 0x19e   :  { %1064 = vmatpush.msra.mxu0 %v4882_v12  ;;  %7292 = vst [vmem:[#allocation38_spill] sm:$0xff] %v4939_v10  ;;  %v767_v12 = vpop.f32.mrf.mxu3 }
 0x19f   :  { %1101 = vmatpush.msra.mxu2 %v4834_v55  ;;  %1046 = vmatpush.msra.mxu3 %v4842_v59  ;;  %v4876_v5 = vpop.eup %3616 }
 0x1a0   :  { %v808_v32 = vmul.f32 %v4876_v5, %v4777_v39  ;;  %1065 = vmatpush.msra.mxu0 %v4896_v19  ;;  %v792_v19 = vadd.f32 %v4795_v60, %v791_v27  ;;  %v684_v27 = vpop.f32.mrf.mxu2  ;;  %vm813_vm13 = vweird.f32 %v4876_v5 }
 0x1a1   :  { %1102 = vmatpush.msra.mxu2 %v4852_v57  ;;  %1047 = vmatpush.msra.mxu3 %v4861_v7  ;;  %vm814_vm15 = vmor %vm812_vm14, %vm813_vm13 }
 0x1a2   :  { %1066 = vmatpush.msra.mxu0 %v4910_v36  ;;  %v797_v36 = vand.u32 2147483647, %v4700_v18 }
 0x1a3   :  { %1103 = vmatpush.msra.mxu2 %v4871_v58  ;;  %1127 = vmatpush.msrb.mxu3 %v4889_v16  ;;  %v799_v58 = vand.u32 2147483648, %v4700_v18  ;;  %v774_v18 = vperm.slane %v4639_v15, 2 }
 0x1a4   :  { %1067 = vmatpush.msra.mxu0 %v4930_v22  ;;  %vm798_vm12 = vcmp.eq.f32.partialorder %v797_v36, 8.507059e+37 }
 0x1a5   :  { %1104 = vmatpush.msra.mxu2 %v4887_v14  ;;  %1128 = vmatpush.msrb.mxu3 %v4903_v25  ;;  %v809_v14 = vsub.f32 1.0, %v808_v32  ;;  %v796_v32 = vsel %vm795_vm11, %v4795_v60, %v792_v19  ;;  %v818_v60 = vand.u32 2147483648, %v4777_v39 }
 0x1a7   :  { %1105 = vmatpush.msra.mxu2 %v4901_v23  ;;  %1129 = vmatpush.msrb.mxu3 %v4912_v54  ;;  %v810_v22 = vmul.f32 %v4876_v5, %v809_v14  ;;  %v819_v14 = vor.u32 1.1754944e-38, %v818_v60  ;;  %v5014_v60 = vld [vmem:[%s7057_s3 + $0x170] sm:$0xff] }
 0x1a8   :  { %7297 = vst [vmem:[#allocation42_spill] sm:$0xff] %v5014_v60 }
 0x1a9   :  { %1106 = vmatpush.msra.mxu2 %v4921_v28  ;;  %1130 = vmatpush.msrb.mxu3 %v4932_v31  ;;  %v800_v28 = vor.u32 1.1754944e-38, %v799_v58 }
 0x1ab   :  { %1107 = vmatpush.msra.mxu2 %v4939_v10 }
 0x1f4   :  { %v496_v53 = vpop.f32.mrf.mxu1 }
 0x1f5   :  { %v517_v23 = vadd.f32 %v516_v2, %v496_v53  ;;  %v768_v2 = vadd.f32 %v767_v12, %v684_v27  ;;  %v775_v53 = vperm.slane %v4639_v15, 3  ;;  %v811_v12 = vadd.f32 %v4876_v5, %v810_v22 }
 0x1f7   :  { %v523_v1 = vadd.f32 %v3583_v13, %v517_v23  ;;  %v801_v23 = vsel %vm798_vm12, %v800_v28, %v796_v32  ;;  %v783_v10 = vadd.f32 %v775_v53, %v768_v2  ;;  %v815_v15 = vsel %vm814_vm15, %v4876_v5, %v811_v12  ;;  %v4977_v5 = vld [vmem:[%s7057_s3 + $0x1f0] sm:$0xff] }
 0x1f8   :  { %7293 = vst [vmem:[#allocation39_spill] sm:$0xff] %v4977_v5  ;;  %1072 = vmatpush.msra.mxu1 %v4977_v5  ;;  %v4991_v32 = vld [vmem:[%s7057_s3 + $0x1b0] sm:$0xff] }
 0x1f9   :  { %524 = vst [vmem:[%s7064_s10] sm:$0xff] %v523_v1  ;;  %v822_v19 = vmul.f32 %v801_v23, %v783_v10  ;;  %v816_v1 = vand.u32 2147483647, %v4777_v39  ;;  %v4972_v39 = vld [vmem:[#allocation2 + $0x48] sm:$0xff]  ;;  %v5003_v23 = vld [vmem:[%s7057_s3 + $0x190] sm:$0xff] }
 0x1fa   :  { %v4986_v10 = vld [vmem:[#allocation2 + $0x28] sm:$0xff]  ;;  %7295 = vst [vmem:[#allocation41_spill] sm:$0xff] %v4991_v32  ;;  %v5009_v12 = vld [vmem:[#allocation2 + $0x70] sm:$0xff] }
 0x1fb   :  { %vm817_vm1 = vcmp.eq.f32.partialorder %v816_v1, 8.507059e+37  ;;  %7296 = vst [vmem:[#allocation12_spill] sm:$0xff] %v5003_v23  ;;  %v5028_v1 = vld [vmem:[#allocation2 + $0x30] sm:$0xff] }
 0x1fc   :  { %v664_v13 = vpop.f32.mrf.mxu1 }
 0x1fd   :  { %v748_v57 = vadd.f32 %v4854_v0, %v664_v13  ;;  %v820_v0 = vsel %vm817_vm1, %v819_v14, %v815_v15  ;;  %v5005_v13 = vld [vmem:[#allocation2 + $0x8] sm:$0xff]  ;;  %v5035_v15 = vld [vmem:[#allocation2 + $0x78] sm:$0xff] }
 0x1fe   :  { %v825_v36 = vsub.f32 1.0, %v820_v0  ;;  %v827_v2 = vmul.f32 %v820_v0, %v4481_v20  ;;  %v4982_v20 = vld [vmem:[%s7057_s3 + $0x1d0] sm:$0xff]  ;;  %v5039_v14 = vld [vmem:[#allocation2 + $0x58] sm:$0xff] }
 0x1ff   :  { %v782_v27 = vadd.f32 %v774_v18, %v748_v57  ;;  %v4967_v57 = vld [vmem:[#allocation2 + $0x68] sm:$0xff]  ;;  %7294 = vst [vmem:[#allocation40_spill] sm:$0xff] %v4982_v20  ;;  %1073 = vmatpush.msra.mxu1 %v4982_v20  ;;  %v3526_v18 = vld [vmem:[%s7054_s0 + $0x10] sm:$0xff]  ;;  %v5042_v0 = vld [vmem:[#allocation2 + $0x38] sm:$0xff] }
 0x200   :  { %7299 = vst [vmem:[#allocation43_spill] sm:$0xff] %v5042_v0 }
 0x201   :  { %v823_v58 = vadd.f32 %v822_v19, %v782_v27  ;;  %1074 = vmatpush.msra.mxu1 %v4991_v32  ;;  %v5019_v19 = vld [vmem:[#allocation2 + $0x50] sm:$0xff] }
 0x202   :  { %v5024_v27 = vld [vmem:[%s7057_s3 + $0x150] sm:$0xff] }
 0x203   :  { %3618 = vtanh.f32 %v823_v58  ;;  %1075 = vmatpush.msra.mxu1 %v5003_v23  ;;  %7298 = vst [vmem:[#allocation13_spill] sm:$0xff] %v5024_v27  ;;  %v5033_v58 = vld [vmem:[#allocation2 + $0x10] sm:$0xff] }
 0x204   :  { %v5212_v23 = vld [vmem:[#allocation4 + $0x10] sm:$0xff] }
 0x205   :  { %1076 = vmatpush.msra.mxu1 %v5014_v60  ;;  %v5208_v60 = vld [vmem:[#allocation6 + $0x18] sm:$0xff]  ;;  %7319 = vst [vmem:[#allocation49_spill] sm:$0xff] %v5212_v23  ;;  %v5214_v32 = vld [vmem:[#allocation6 + $0x10] sm:$0xff] }
 0x206   :  { %7318 = vst [vmem:[#allocation48_spill] sm:$0xff] %v5208_v60 }
 0x207   :  { %1077 = vmatpush.msra.mxu1 %v5024_v27  ;;  %v5206_v27 = vld [vmem:[#allocation4 + $0x18] sm:$0xff]  ;;  %7320 = vst [vmem:[#allocation50_spill] sm:$0xff] %v5214_v32 }
 0x208   :  { %7317 = vst [vmem:[#allocation47_spill] sm:$0xff] %v5206_v27 }
 0x209   :  { %v3619_v28 = vpop.eup %3618 }
 0x20a   :  { %v826_v22 = vmul.f32 %v3619_v28, %v825_v36  ;;  %v5046_v36 = vld [vmem:[#allocation2 + $0x18] sm:$0xff]  ;;  %v5148_v28 = vld [vmem:[#allocation6 + $0x68] sm:$0xff] }
 0x20b   :  { %7300 = vst [vmem:[#allocation44_spill] sm:$0xff] %v5046_v36 }
 0x20c   :  { %v4965_v53 = vadd.f32 %v827_v2, %v826_v22  ;;  %v5152_v22 = vld [vmem:[#allocation4 + $0x60] sm:$0xff] }
 0x20d   :  { %v5154_v2 = vld [vmem:[#allocation6 + $0x60] sm:$0xff] }
 0x20e   :  { %865 = vmatmul.f32.vlgmr.msrb.gmra.mxu0 %v4965_v53  ;;  %939 = vmatmul.f32.vlgmr.msrb.gmra.mxu2 %v4965_v53 }
 0x20f   :  { %1048 = vmatmul.f32.vlgmr.msra.gmra.mxu3 %v4965_v53 }
 0x210   :  { %1147 = vmatpush.msra.mxu3 %v4967_v57 }
 0x212   :  { %1148 = vmatpush.msra.mxu3 %v4972_v39 }
 0x214   :  { %1149 = vmatpush.msra.mxu3 %v4986_v10 }
 0x216   :  { %1068 = vmatmul.f32.vlgmr.msra.gmra.mxu0 %v4965_v53  ;;  %1108 = vmatmul.f32.vlgmr.msra.gmra.mxu2 %v4965_v53 }
 0x217   :  { %3527 = vmatmul.msk.f32.vlgmr.msrb.gmra.mxu3 %vm262_vm0, %v3526_v18 }
 0x218   :  { %1150 = vmatpush.msra.mxu3 %v5005_v13 }
 0x21a   :  { %1167 = vmatpush.msrb.mxu3 %v5009_v12 }
 0x21c   :  { %1168 = vmatpush.msrb.mxu3 %v5019_v19 }
 0x21e   :  { %1169 = vmatpush.msrb.mxu3 %v5028_v1 }
 0x21f   :  { %3528 = vmatmul.msk.f32.vlgmr.msra.gmra.mxu3 %vm262_vm0, %v3526_v18 }
 0x220   :  { %1170 = vmatpush.msrb.mxu3 %v5033_v58 }
 0x222   :  { %1187 = vmatpush.msra.mxu3 %v5035_v15 }
 0x224   :  { %1188 = vmatpush.msra.mxu3 %v5039_v14 }
 0x226   :  { %1189 = vmatpush.msra.mxu3 %v5042_v0 }
 0x227   :  { %3529 = vmatmul.msk.f32.vlgmr.msrb.gmra.mxu3 %vm262_vm0, %v3526_v18 }
 0x228   :  { %1190 = vmatpush.msra.mxu3 %v5046_v36 }
 0x22a   :  { %1457 = vmatpush.msrb.mxu3 %v4610_v11  ;;  %v5074_v11 = vld [vmem:[%s7057_s3 + $0x130] sm:$0xff] }
 0x22b   :  { %7301 = vst [vmem:[#allocation14_spill] sm:$0xff] %v5074_v11  ;;  %1078 = vmatpush.msra.mxu1 %v5074_v11  ;;  %v5202_v11 = vld [vmem:[#allocation6 + $0x20] sm:$0xff] }
 0x22c   :  { %1458 = vmatpush.msrb.mxu3 %v4615_v44  ;;  %v5080_v44 = vld [vmem:[%s7057_s3 + $0x110] sm:$0xff]  ;;  %7316 = vst [vmem:[#allocation46_spill] sm:$0xff] %v5202_v11 }
 0x22d   :  { %7302 = vst [vmem:[#allocation15_spill] sm:$0xff] %v5080_v44  ;;  %1079 = vmatpush.msra.mxu1 %v5080_v44  ;;  %v5200_v44 = vld [vmem:[#allocation4 + $0x20] sm:$0xff] }
 0x22e   :  { %1459 = vmatpush.msrb.mxu3 %v4623_v8  ;;  %v5085_v8 = vld [vmem:[%s7057_s3 + $0xf0] sm:$0xff]  ;;  %7315 = vst [vmem:[#allocation45_spill] sm:$0xff] %v5200_v44 }
 0x22f   :  { %3530 = vmatmul.msk.f32.vlgmr.msra.gmra.mxu3 %vm262_vm0, %v3526_v18  ;;  %7303 = vst [vmem:[#allocation16_spill] sm:$0xff] %v5085_v8  ;;  %1080 = vmatpush.msra.mxu1 %v5085_v8  ;;  %v5158_v18 = vld [vmem:[#allocation4 + $0x58] sm:$0xff]  ;;  %v5196_v8 = vld [vmem:[#allocation6 + $0x28] sm:$0xff] }
 0x230   :  { %1460 = vmatpush.msrb.mxu3 %v4646_v3  ;;  %v5092_v3 = vld [vmem:[%s7057_s3 + $0xd0] sm:$0xff]  ;;  %7314 = vst [vmem:[#allocation27_spill] sm:$0xff] %v5196_v8 }
 0x231   :  { %7304 = vst [vmem:[#allocation17_spill] sm:$0xff] %v5092_v3  ;;  %1081 = vmatpush.msra.mxu1 %v5092_v3  ;;  %v5194_v3 = vld [vmem:[#allocation4 + $0x28] sm:$0xff] }
 0x232   :  { %1461 = vmatpush.msrb.mxu3 %v4652_v4  ;;  %v5098_v4 = vld [vmem:[%s7057_s3 + $0xb0] sm:$0xff]  ;;  %7313 = vst [vmem:[#allocation26_spill] sm:$0xff] %v5194_v3 }
 0x233   :  { %7305 = vst [vmem:[#allocation18_spill] sm:$0xff] %v5098_v4  ;;  %1082 = vmatpush.msra.mxu1 %v5098_v4  ;;  %v5190_v4 = vld [vmem:[#allocation6 + $0x30] sm:$0xff] }
 0x234   :  { %1462 = vmatpush.msrb.mxu3 %v4670_v61  ;;  %v5103_v61 = vld [vmem:[%s7057_s3 + $0x90] sm:$0xff]  ;;  %7312 = vst [vmem:[#allocation25_spill] sm:$0xff] %v5190_v4 }
 0x235   :  { %7306 = vst [vmem:[#allocation19_spill] sm:$0xff] %v5103_v61  ;;  %1083 = vmatpush.msra.mxu1 %v5103_v61  ;;  %v5188_v61 = vld [vmem:[#allocation4 + $0x30] sm:$0xff] }
 0x236   :  { %1463 = vmatpush.msrb.mxu3 %v4687_v56  ;;  %v5110_v56 = vld [vmem:[%s7057_s3 + $0x70] sm:$0xff]  ;;  %7311 = vst [vmem:[#allocation24_spill] sm:$0xff] %v5188_v61 }
 0x237   :  { %7307 = vst [vmem:[#allocation20_spill] sm:$0xff] %v5110_v56  ;;  %1084 = vmatpush.msra.mxu1 %v5110_v56  ;;  %v5184_v56 = vld [vmem:[#allocation6 + $0x38] sm:$0xff] }
 0x238   :  { %1464 = vmatpush.msrb.mxu3 %v4708_v34  ;;  %v5116_v34 = vld [vmem:[%s7057_s3 + $0x50] sm:$0xff] }
 0x239   :  { %7308 = vst [vmem:[#allocation21_spill] sm:$0xff] %v5116_v34  ;;  %1085 = vmatpush.msra.mxu1 %v5116_v34  ;;  %v5182_v34 = vld [vmem:[#allocation4 + $0x38] sm:$0xff] }
 0x23a   :  { %1465 = vmatpush.msrb.mxu3 %v4726_v42  ;;  %v5122_v42 = vld [vmem:[%s7057_s3 + $0x30] sm:$0xff] }
 0x23b   :  { %7309 = vst [vmem:[#allocation22_spill] sm:$0xff] %v5122_v42  ;;  %1086 = vmatpush.msra.mxu1 %v5122_v42  ;;  %v5178_v42 = vld [vmem:[#allocation6 + $0x40] sm:$0xff] }
 0x23c   :  { %1466 = vmatpush.msrb.mxu3 %v4745_v50  ;;  %v5128_v50 = vld [vmem:[%s7057_s3 + $0x10] sm:$0xff] }
 0x23d   :  { %7310 = vst [vmem:[#allocation23_spill] sm:$0xff] %v5128_v50  ;;  %1087 = vmatpush.msra.mxu1 %v5128_v50  ;;  %v5176_v50 = vld [vmem:[#allocation4 + $0x40] sm:$0xff] }
 0x23e   :  { %1467 = vmatpush.msrb.mxu3 %v4763_v33  ;;  %v3584_v33 = vld [vmem:[%s7060_s6] ss:$0 sm:$0xff] }
 0x240   :  { %1468 = vmatpush.msrb.mxu3 %v4783_v41 }
 0x242   :  { %1469 = vmatpush.msrb.mxu3 %v4803_v63 }
 0x244   :  { %1470 = vmatpush.msrb.mxu3 %v4824_v24 }
 0x246   :  { %1471 = vmatpush.msrb.mxu3 %v4842_v59 }
 0x248   :  { %1472 = vmatpush.msrb.mxu3 %v4861_v7  ;;  %v5135_v7 = vld [vmem:[#allocation4 + $0x78] sm:$0xff] }
 0x249   :  { %1274 = vmatpush.msrb.mxu0 %v5135_v7 }
 0x24a   :  { %1552 = vmatpush.msra.mxu3 %v4889_v16  ;;  %v5137_v16 = vld [vmem:[#allocation6 + $0x78] sm:$0xff] }
 0x24b   :  { %1348 = vmatpush.msrb.mxu2 %v5137_v16 }
 0x24c   :  { %1553 = vmatpush.msra.mxu3 %v4903_v25  ;;  %v5139_v25 = vld [vmem:[#allocation4 + $0x70] sm:$0xff] }
 0x24d   :  { %1275 = vmatpush.msrb.mxu0 %v5139_v25 }
 0x24e   :  { %1554 = vmatpush.msra.mxu3 %v4912_v54  ;;  %v5143_v54 = vld [vmem:[#allocation6 + $0x70] sm:$0xff] }
 0x24f   :  { %1349 = vmatpush.msrb.mxu2 %v5143_v54 }
 0x250   :  { %1555 = vmatpush.msra.mxu3 %v4932_v31  ;;  %v5146_v31 = vld [vmem:[#allocation4 + $0x68] sm:$0xff] }
 0x251   :  { %1276 = vmatpush.msrb.mxu0 %v5146_v31  ;;  %1350 = vmatpush.msrb.mxu2 %v5148_v28 }
 0x253   :  { %1277 = vmatpush.msrb.mxu0 %v5152_v22  ;;  %1351 = vmatpush.msrb.mxu2 %v5154_v2 }
 0x255   :  { %1278 = vmatpush.msrb.mxu0 %v5158_v18 }
 0x28b   :  { %v866_v41 = vpop.f32.mrf.mxu0 }
 0x28c   :  { %v867_v63 = vadd.f32 %v3584_v33, %v866_v41  ;;  %v5160_v33 = vld [vmem:[#allocation6 + $0x58] sm:$0xff]  ;;  %v5164_v41 = vld [vmem:[#allocation4 + $0x50] sm:$0xff] }
 0x28d   :  { %1352 = vmatpush.msrb.mxu2 %v5160_v33  ;;  %1279 = vmatpush.msrb.mxu0 %v5164_v41 }
 0x28e   :  { %3620 = vtanh.f32 %v867_v63  ;;  %v5166_v63 = vld [vmem:[#allocation6 + $0x50] sm:$0xff] }
 0x28f   :  { %1353 = vmatpush.msrb.mxu2 %v5166_v63 }
 0x292   :  { %v1049_v20 = vpop.f32.mrf.mxu3 }
 0x294   :  { %v3621_v24 = vpop.eup %3620 }
 0x295   :  { %v870_v59 = vmul.f32 %v3621_v24, %v4965_v53  ;;  %v5170_v24 = vld [vmem:[#allocation4 + $0x48] sm:$0xff] }
 0x296   :  { %1280 = vmatpush.msrb.mxu0 %v5170_v24 }
 0x297   :  { %919 = vmatmul.f32.vlgmr.msrb.gmra.mxu1 %v870_v59  ;;  %v5172_v59 = vld [vmem:[#allocation6 + $0x48] sm:$0xff] }
 0x298   :  { %1354 = vmatpush.msrb.mxu2 %v5172_v59  ;;  %1281 = vmatpush.msrb.mxu0 %v5176_v50 }
 0x29a   :  { %1355 = vmatpush.msrb.mxu2 %v5178_v42  ;;  %1282 = vmatpush.msrb.mxu0 %v5182_v34  ;;  %v1132_v5 = vpop.f32.mrf.mxu3 }
 0x29c   :  { %1356 = vmatpush.msrb.mxu2 %v5184_v56  ;;  %1283 = vmatpush.msrb.mxu0 %v5188_v61  ;;  %v5229_v61 = vld [vmem:[#allocation6 + $0x8] sm:$0xff] }
 0x29e   :  { %1357 = vmatpush.msrb.mxu2 %v5190_v4  ;;  %1284 = vmatpush.msrb.mxu0 %v5194_v3  ;;  %v1069_v4 = vpop.f32.mrf.mxu0 }
 0x29f   :  { %1088 = vmatmul.f32.vlgmr.msra.gmra.mxu1 %v4965_v53 }
 0x2a0   :  { %1358 = vmatpush.msrb.mxu2 %v5196_v8  ;;  %1285 = vmatpush.msrb.mxu0 %v5200_v44  ;;  %v5223_v44 = vld [vmem:[%s7058_s4] sm:$0xf] }
 0x2a1   :  { %v1197_v8 = vperm.slane %v5223_v44, 0 }
 0x2a2   :  { %1359 = vmatpush.msrb.mxu2 %v5202_v11  ;;  %1286 = vmatpush.msrb.mxu0 %v5206_v27  ;;  %v1133_v11 = vadd.f32 %v1132_v5, %v1049_v20  ;;  %v1152_v3 = vpop.f32.mrf.mxu3  ;;  %v5233_v5 = vld [vmem:[#allocation4] sm:$0xff] }
 0x2a3   :  { %v1153_v0 = vadd.f32 %v1152_v3, %v1069_v4  ;;  %v5235_v20 = vld [vmem:[#allocation6] sm:$0xff]  ;;  %v7330_v4 = vld [vmem:[#allocation37_spill] sm:$0xff] }
 0x2a4   :  { %1360 = vmatpush.msrb.mxu2 %v5208_v60  ;;  %1287 = vmatpush.msrb.mxu0 %v5212_v23  ;;  %v1205_v36 = vadd.f32 %v1197_v8, %v1133_v11  ;;  %v1198_v60 = vperm.slane %v5223_v44, 1 }
 0x2a6   :  { %1361 = vmatpush.msrb.mxu2 %v5214_v32  ;;  %v3531_v27 = vmul.f32 -1.442695, %v1205_v36  ;;  %v1206_v23 = vadd.f32 %v1198_v60, %v1153_v0  ;;  %v5227_v32 = vld [vmem:[#allocation4 + $0x8] sm:$0xff] }
 0x2a7   :  { %1288 = vmatpush.msrb.mxu0 %v5227_v32 }
 0x2a8   :  { %3622 = vpow2.f32 %v3531_v27  ;;  %1362 = vmatpush.msrb.mxu2 %v5229_v61  ;;  %v3532_v36 = vmul.f32 -1.442695, %v1206_v23 }
 0x2a9   :  { %1289 = vmatpush.msrb.mxu0 %v5233_v5 }
 0x2aa   :  { %1363 = vmatpush.msrb.mxu2 %v5235_v20  ;;  %3624 = vpow2.f32 %v3532_v36  ;;  %v7331_v36 = vld [vmem:[#allocation38_spill] sm:$0xff] }
 0x2ab   :  { %1477 = vmatpush.msra.mxu0 %v4657_v6 }
 0x2ac   :  { %1517 = vmatpush.msra.mxu2 %v4662_v9 }
 0x2ad   :  { %1478 = vmatpush.msra.mxu0 %v4675_v17 }
 0x2ae   :  { %v3623_v60 = vpop.eup %3622  ;;  %1518 = vmatpush.msra.mxu2 %v4680_v21 }
 0x2af   :  { %v1212_v27 = vadd.f32 1.0, %v3623_v60  ;;  %1479 = vmatpush.msra.mxu0 %v4692_v26  ;;  %v1172_v26 = vpop.f32.mrf.mxu3 }
 0x2b0   :  { %1519 = vmatpush.msra.mxu2 %v4697_v30  ;;  %v3625_v6 = vpop.eup %3624  ;;  %v7321_v30 = vld [vmem:[#allocation28_spill] sm:$0xff] }
 0x2b1   :  { %1480 = vmatpush.msra.mxu0 %v4713_v38  ;;  %3626 = vrcp.f32 %v1212_v27  ;;  %v5253_v9 = vadd.f32 1.0, %v3625_v6  ;;  %v1224_v3 = vand.u32 2147483648, %v1212_v27  ;;  %vm1218_vm3 = vweird.f32 %v1212_v27 }
 0x2b2   :  { %1520 = vmatpush.msra.mxu2 %v4718_v40  ;;  %v940_v40 = vpop.f32.mrf.mxu2  ;;  %v1222_v60 = vand.u32 2147483647, %v1212_v27 }
 0x2b3   :  { %1481 = vmatpush.msra.mxu0 %v4731_v47  ;;  %3628 = vrcp.f32 %v5253_v9  ;;  %v7322_v47 = vld [vmem:[#allocation29_spill] sm:$0xff]  ;;  %vm1237_vm7 = vweird.f32 %v5253_v9 }
 0x2b4   :  { %1521 = vmatpush.msra.mxu2 %v4736_v48  ;;  %v7323_v48 = vld [vmem:[#allocation30_spill] sm:$0xff]  ;;  %vm1223_vm5 = vcmp.eq.f32.partialorder %v1222_v60, 8.507059e+37 }
 0x2b5   :  { %1482 = vmatpush.msra.mxu0 %v4750_v52  ;;  %v7348_v60 = vld [vmem:[#allocation42_spill] sm:$0xff] }
 0x2b6   :  { %1522 = vmatpush.msra.mxu2 %v4755_v29  ;;  %v7324_v29 = vld [vmem:[#allocation33_spill] sm:$0xff] }
 0x2b7   :  { %1483 = vmatpush.msra.mxu0 %v4768_v35  ;;  %v3627_v17 = vpop.eup %3626  ;;  %v7325_v35 = vld [vmem:[#allocation34_spill] sm:$0xff]  ;;  %v1192_v8 = vpop.f32.mrf.mxu3 }
 0x2b8   :  { %1523 = vmatpush.msra.mxu2 %v4773_v37  ;;  %v1214_v21 = vmul.f32 %v3627_v17, %v1212_v27  ;;  %vm1219_vm2 = vweird.f32 %v3627_v17 }
 0x2b9   :  { %1484 = vmatpush.msra.mxu0 %v4788_v43  ;;  %v3629_v52 = vpop.eup %3628  ;;  %vm1220_vm4 = vmor %vm1218_vm3, %vm1219_vm2 }
 0x2ba   :  { %1524 = vmatpush.msra.mxu2 %v4793_v45  ;;  %v1215_v38 = vsub.f32 1.0, %v1214_v21  ;;  %v1233_v43 = vmul.f32 %v3629_v52, %v5253_v9  ;;  %v7326_v45 = vld [vmem:[#allocation31_spill] sm:$0xff]  ;;  %v1109_v21 = vpop.f32.mrf.mxu2  ;;  %vm1238_vm6 = vweird.f32 %v3629_v52 }
 0x2bb   :  { %1485 = vmatpush.msra.mxu0 %v4808_v46  ;;  %v7327_v46 = vld [vmem:[#allocation35_spill] sm:$0xff]  ;;  %vm1239_vm8 = vmor %vm1237_vm7, %vm1238_vm6 }
 0x2bc   :  { %1525 = vmatpush.msra.mxu2 %v4813_v49  ;;  %v1216_v37 = vmul.f32 %v3627_v17, %v1215_v38  ;;  %v3585_v49 = vld [vmem:[%s7063_s9] ss:$0 sm:$0xff]  ;;  %v1234_v11 = vsub.f32 1.0, %v1233_v43  ;;  %v1200_v38 = vperm.slane %v5223_v44, 3 }
 0x2bd   :  { %1486 = vmatpush.msra.mxu0 %v4829_v51 }
 0x2be   :  { %1526 = vmatpush.msra.mxu2 %v4834_v55  ;;  %v7328_v55 = vld [vmem:[#allocation36_spill] sm:$0xff]  ;;  %v1217_v23 = vadd.f32 %v3627_v17, %v1216_v37 }
 0x2bf   :  { %1487 = vmatpush.msra.mxu0 %v4847_v62  ;;  %v7329_v62 = vld [vmem:[#allocation32_spill] sm:$0xff] }
 0x2c0   :  { %1527 = vmatpush.msra.mxu2 %v7321_v30  ;;  %v1193_v30 = vadd.f32 %v1192_v8, %v1109_v21  ;;  %v7350_v21 = vld [vmem:[#allocation14_spill] sm:$0xff] }
 0x2c1   :  { %1488 = vmatpush.msra.mxu0 %v7322_v47  ;;  %v1221_v47 = vsel %vm1220_vm4, %v3627_v17, %v1217_v23  ;;  %v1241_v17 = vand.u32 2147483647, %v5253_v9 }
 0x2c2   :  { %1528 = vmatpush.msra.mxu2 %v7323_v48  ;;  %v1225_v48 = vor.u32 1.1754944e-38, %v1224_v3  ;;  %v1208_v43 = vadd.f32 %v1200_v38, %v1193_v30  ;;  %v7351_v30 = vld [vmem:[#allocation15_spill] sm:$0xff]  ;;  %v7354_v38 = vld [vmem:[#allocation18_spill] sm:$0xff] }
 0x2c3   :  { %1489 = vmatpush.msra.mxu0 %v7324_v29  ;;  %v1199_v29 = vperm.slane %v5223_v44, 2  ;;  %vm1242_vm9 = vcmp.eq.f32.partialorder %v1241_v17, 8.507059e+37 }
 0x2c4   :  { %1529 = vmatpush.msra.mxu2 %v7325_v35  ;;  %v1226_v35 = vsel %vm1223_vm5, %v1225_v48, %v1221_v47  ;;  %v7357_v47 = vld [vmem:[#allocation21_spill] sm:$0xff]  ;;  %v7359_v48 = vld [vmem:[#allocation23_spill] sm:$0xff] }
 0x2c5   :  { %1490 = vmatpush.msra.mxu0 %v7326_v45 }
 0x2c6   :  { %1530 = vmatpush.msra.mxu2 %v7327_v46  ;;  %v1243_v46 = vand.u32 2147483648, %v5253_v9  ;;  %v5292_v9 = vld [vmem:[#allocation7 + $0x78] sm:$0xff] }
 0x2c7   :  { %1491 = vmatpush.msra.mxu0 %v7328_v55  ;;  %1328 = vmatpush.msrb.mxu1 %v5292_v9 }
 0x2c8   :  { %1531 = vmatpush.msra.mxu2 %v7329_v62  ;;  %v1244_v23 = vor.u32 1.1754944e-38, %v1243_v46  ;;  %v5421_v46 = vld [vmem:[%s7057_s3 + $0x1c0] sm:$0xff] }
 0x2c9   :  { %1492 = vmatpush.msra.mxu0 %v7330_v4  ;;  %v5299_v4 = vld [vmem:[#allocation7 + $0x68] sm:$0xff] }
 0x2ca   :  { %1532 = vmatpush.msra.mxu2 %v7331_v36  ;;  %v7347_v36 = vld [vmem:[#allocation12_spill] sm:$0xff] }
 0x314   :  { %v920_v51 = vpop.f32.mrf.mxu1 }
 0x315   :  { %v941_v0 = vadd.f32 %v940_v40, %v920_v51  ;;  %v1235_v40 = vmul.f32 %v3629_v52, %v1234_v11 }
 0x317   :  { %v947_v6 = vadd.f32 %v3585_v49, %v941_v0  ;;  %v1236_v45 = vadd.f32 %v3629_v52, %v1235_v40  ;;  %v1247_v49 = vmul.f32 %v1226_v35, %v1208_v43  ;;  %v7358_v40 = vld [vmem:[#allocation22_spill] sm:$0xff] }
 0x319   :  { %3525 = vst [vmem:[%s7064_s10 + $0x8] sm:$0xff] %v947_v6  ;;  %v1240_v62 = vsel %vm1239_vm8, %v3629_v52, %v1236_v45  ;;  %v5294_v52 = vld [vmem:[#allocation7 + $0x70] sm:$0xff]  ;;  %v7349_v6 = vld [vmem:[#allocation13_spill] sm:$0xff]  ;;  %v5416_v45 = vld [vmem:[%s7057_s3 + $0x1e0] sm:$0xff] }
 0x31a   :  { %v1245_v44 = vsel %vm1242_vm9, %v1244_v23, %v1240_v62  ;;  %1329 = vmatpush.msrb.mxu1 %v5294_v52 }
 0x31b   :  { %v1250_v0 = vsub.f32 1.0, %v1245_v44  ;;  %v1252_v8 = vmul.f32 %v1245_v44, %v4965_v53  ;;  %v5310_v53 = vld [vmem:[%s7054_s0 + $0x18] sm:$0xff] }
 0x31c   :  { %v1089_v37 = vpop.f32.mrf.mxu1  ;;  %1330 = vmatpush.msrb.mxu1 %v5299_v4 }
 0x31d   :  { %v1173_v27 = vadd.f32 %v1172_v26, %v1089_v37 }
 0x31f   :  { %v1207_v51 = vadd.f32 %v1199_v29, %v1173_v27  ;;  %v3586_v29 = vld [vmem:[%s7060_s6] ss:$0 sm:$0xff] }
 0x321   :  { %v1248_v55 = vadd.f32 %v1247_v49, %v1207_v51  ;;  %v5429_v49 = vld [vmem:[%s7057_s3 + $0x1a0] sm:$0xff] }
 0x323   :  { %3630 = vtanh.f32 %v1248_v55  ;;  %v5445_v55 = vld [vmem:[%s7058_s4] sm:$0xf] }
 0x324   :  { %v1622_v23 = vperm.slane %v5445_v55, 0 }
 0x329   :  { %v3631_v11 = vpop.eup %3630 }
 0x32a   :  { %v1251_v26 = vmul.f32 %v3631_v11, %v1250_v0 }
 0x32c   :  { %v5287_v3 = vadd.f32 %v1252_v8, %v1251_v26 }
 0x32e   :  { %1290 = vmatmul.f32.vlgmr.msrb.gmra.mxu0 %v5287_v3  ;;  %1364 = vmatmul.f32.vlgmr.msrb.gmra.mxu2 %v5287_v3 }
 0x32f   :  { %1473 = vmatmul.f32.vlgmr.msrb.gmra.mxu3 %v5287_v3  ;;  %1699 = vmatpush.msrb.mxu0 %v5135_v7  ;;  %v5331_v7 = vld [vmem:[#allocation7 + $0x48] sm:$0xff] }
 0x330   :  { %1572 = vmatpush.msrb.mxu3 %v4967_v57  ;;  %1773 = vmatpush.msrb.mxu2 %v5137_v16  ;;  %v5314_v57 = vld [vmem:[#allocation7 + $0x60] sm:$0xff] }
 0x331   :  { %1700 = vmatpush.msrb.mxu0 %v5139_v25  ;;  %1331 = vmatpush.msrb.mxu1 %v5314_v57  ;;  %v5337_v16 = vld [vmem:[#allocation7 + $0x40] sm:$0xff]  ;;  %v7334_v25 = vld [vmem:[#allocation25_spill] sm:$0xff] }
 0x332   :  { %1573 = vmatpush.msrb.mxu3 %v4972_v39  ;;  %1774 = vmatpush.msrb.mxu2 %v5143_v54  ;;  %v5320_v39 = vld [vmem:[#allocation7 + $0x58] sm:$0xff]  ;;  %v7338_v54 = vld [vmem:[#allocation45_spill] sm:$0xff] }
 0x333   :  { %1701 = vmatpush.msrb.mxu0 %v5146_v31  ;;  %1332 = vmatpush.msrb.mxu1 %v5320_v39  ;;  %v1313_v31 = vld [vmem:[#allocation7 + $0x8] sm:$0xff] }
 0x334   :  { %1574 = vmatpush.msrb.mxu3 %v4986_v10  ;;  %1775 = vmatpush.msrb.mxu2 %v5148_v28  ;;  %v5326_v10 = vld [vmem:[#allocation7 + $0x50] sm:$0xff] }
 0x335   :  { %1702 = vmatpush.msrb.mxu0 %v5152_v22  ;;  %1333 = vmatpush.msrb.mxu1 %v5326_v10  ;;  %v7339_v28 = vld [vmem:[#allocation46_spill] sm:$0xff]  ;;  %v7340_v22 = vld [vmem:[#allocation47_spill] sm:$0xff] }
 0x336   :  { %1493 = vmatmul.f32.vlgmr.msra.gmra.mxu0 %v5287_v3  ;;  %1533 = vmatmul.f32.vlgmr.msra.gmra.mxu2 %v5287_v3 }
 0x337   :  { %3535 = vmatmul.msk.f32.vlgmr.msra.gmra.mxu3 %vm262_vm0, %v5310_v53  ;;  %1776 = vmatpush.msrb.mxu2 %v5154_v2  ;;  %v1312_v2 = vld [vmem:[#allocation7] sm:$0xff] }
 0x338   :  { %1575 = vmatpush.msrb.mxu3 %v5005_v13  ;;  %1703 = vmatpush.msrb.mxu0 %v5158_v18  ;;  %v5343_v13 = vld [vmem:[#allocation7 + $0x38] sm:$0xff]  ;;  %v7341_v18 = vld [vmem:[#allocation48_spill] sm:$0xff] }
 0x339   :  { %1777 = vmatpush.msrb.mxu2 %v5160_v33  ;;  %1334 = vmatpush.msrb.mxu1 %v5331_v7  ;;  %v7342_v33 = vld [vmem:[#allocation49_spill] sm:$0xff] }
 0x33a   :  { %1592 = vmatpush.msra.mxu3 %v5009_v12  ;;  %1704 = vmatpush.msrb.mxu0 %v5164_v41  ;;  %v5351_v12 = vld [vmem:[#allocation7 + $0x30] sm:$0xff] }
 0x33b   :  { %1778 = vmatpush.msrb.mxu2 %v5166_v63  ;;  %1335 = vmatpush.msrb.mxu1 %v5337_v16  ;;  %v7343_v41 = vld [vmem:[#allocation50_spill] sm:$0xff]  ;;  %v7344_v63 = vld [vmem:[#allocation39_spill] sm:$0xff] }
 0x33c   :  { %1593 = vmatpush.msra.mxu3 %v5019_v19  ;;  %1705 = vmatpush.msrb.mxu0 %v5170_v24  ;;  %v5356_v19 = vld [vmem:[#allocation7 + $0x28] sm:$0xff]  ;;  %v7345_v24 = vld [vmem:[#allocation40_spill] sm:$0xff] }
 0x33d   :  { %1779 = vmatpush.msrb.mxu2 %v5172_v59  ;;  %1336 = vmatpush.msrb.mxu1 %v5343_v13  ;;  %v7346_v59 = vld [vmem:[#allocation41_spill] sm:$0xff] }
 0x33e   :  { %1594 = vmatpush.msra.mxu3 %v5028_v1  ;;  %1706 = vmatpush.msrb.mxu0 %v5176_v50  ;;  %v5362_v1 = vld [vmem:[#allocation7 + $0x20] sm:$0xff]  ;;  %v7333_v50 = vld [vmem:[#allocation43_spill] sm:$0xff] }
 0x33f   :  { %3536 = vmatmul.msk.f32.vlgmr.msrb.gmra.mxu3 %vm262_vm0, %v5310_v53  ;;  %1780 = vmatpush.msrb.mxu2 %v5178_v42  ;;  %v7335_v42 = vld [vmem:[#allocation26_spill] sm:$0xff] }
 0x340   :  { %1595 = vmatpush.msra.mxu3 %v5033_v58  ;;  %1707 = vmatpush.msrb.mxu0 %v5182_v34  ;;  %v7332_v58 = vld [vmem:[#allocation24_spill] sm:$0xff]  ;;  %v7337_v34 = vld [vmem:[#allocation27_spill] sm:$0xff] }
 0x341   :  { %1337 = vmatpush.msrb.mxu1 %v5351_v12  ;;  %1781 = vmatpush.msrb.mxu2 %v5184_v56  ;;  %v1314_v56 = vld [vmem:[#allocation7 + $0x10] sm:$0xff] }
 0x342   :  { %1612 = vmatpush.msrb.mxu3 %v5035_v15  ;;  %1708 = vmatpush.msrb.mxu0 %v7332_v58  ;;  %v5368_v15 = vld [vmem:[#allocation7 + $0x18] sm:$0xff] }
 0x343   :  { %1338 = vmatpush.msrb.mxu1 %v5356_v19  ;;  %1782 = vmatpush.msrb.mxu2 %v7334_v25  ;;  %v5503_v58 = vld [vmem:[%s7057_s3 + $0x1b8] sm:$0xff]  ;;  %v5519_v25 = vld [vmem:[%s7057_s3 + $0x188] sm:$0xff] }
 0x344   :  { %1613 = vmatpush.msrb.mxu3 %v5039_v14  ;;  %1709 = vmatpush.msrb.mxu0 %v7335_v42  ;;  %v7336_v14 = vld [vmem:[#allocation44_spill] sm:$0xff]  ;;  %v5524_v42 = vld [vmem:[%s7057_s3 + $0x198] sm:$0xff] }
 0x345   :  { %1339 = vmatpush.msrb.mxu1 %v5362_v1  ;;  %1783 = vmatpush.msrb.mxu2 %v7337_v34  ;;  %v5542_v34 = vld [vmem:[%s7057_s3 + $0x178] sm:$0xff] }
 0x346   :  { %1614 = vmatpush.msrb.mxu3 %v7333_v50  ;;  %1710 = vmatpush.msrb.mxu0 %v7338_v54  ;;  %v5551_v54 = vld [vmem:[%s7057_s3 + $0xc0] sm:$0xff] }
 0x347   :  { %3537 = vmatmul.msk.f32.vlgmr.msra.gmra.mxu3 %vm262_vm0, %v5310_v53  ;;  %1340 = vmatpush.msrb.mxu1 %v5368_v15 }
 0x348   :  { %1615 = vmatpush.msrb.mxu3 %v7336_v14  ;;  %1784 = vmatpush.msrb.mxu2 %v7339_v28  ;;  %v5532_v14 = vld [vmem:[%s7057_s3 + $0xe0] sm:$0xff]  ;;  %v5561_v28 = vld [vmem:[%s7057_s3 + $0x158] sm:$0xff] }
 0x349   :  { %1341 = vmatpush.msrb.mxu1 %v1314_v56  ;;  %1711 = vmatpush.msrb.mxu0 %v7340_v22 }
 0x34a   :  { %1785 = vmatpush.msrb.mxu2 %v7341_v18  ;;  %1882 = vmatpush.msra.mxu3 %v5416_v45  ;;  %v5574_v18 = vld [vmem:[%s7057_s3 + $0x128] sm:$0xff] }
 0x34b   :  { %1342 = vmatpush.msrb.mxu1 %v1313_v31  ;;  %1712 = vmatpush.msrb.mxu0 %v7342_v33  ;;  %v5579_v33 = vld [vmem:[%s7057_s3 + $0x138] sm:$0xff] }
 0x34c   :  { %1786 = vmatpush.msrb.mxu2 %v7343_v41  ;;  %1883 = vmatpush.msra.mxu3 %v5421_v46 }
 0x34d   :  { %1343 = vmatpush.msrb.mxu1 %v1312_v2  ;;  %1713 = vmatpush.msrb.mxu0 %v5227_v32  ;;  %v7352_v32 = vld [vmem:[#allocation16_spill] sm:$0xff] }
 0x34e   :  { %1787 = vmatpush.msrb.mxu2 %v5229_v61  ;;  %v7353_v61 = vld [vmem:[#allocation17_spill] sm:$0xff]  ;;  %1884 = vmatpush.msra.mxu3 %v5429_v49 }
 0x34f   :  { %3538 = vmatmul.msk.f32.vlgmr.msrb.gmra.mxu3 %vm262_vm0, %v5310_v53  ;;  %1497 = vmatpush.msra.mxu1 %v7344_v63  ;;  %v5458_v53 = vld [vmem:[%s7057_s3 + $0x160] sm:$0xff] }
 0x350   :  { %1714 = vmatpush.msrb.mxu0 %v5233_v5  ;;  %1788 = vmatpush.msrb.mxu2 %v5235_v20  ;;  %v7355_v5 = vld [vmem:[#allocation19_spill] sm:$0xff]  ;;  %v7356_v20 = vld [vmem:[#allocation20_spill] sm:$0xff] }
 0x351   :  { %1498 = vmatpush.msra.mxu1 %v7345_v24  ;;  %v5589_v63 = vld [vmem:[%s7057_s3 + $0x80] sm:$0xff]  ;;  %v5594_v24 = vld [vmem:[%s7057_s3 + $0x108] sm:$0xff] }
 0x353   :  { %1499 = vmatpush.msra.mxu1 %v7346_v59  ;;  %v5599_v59 = vld [vmem:[%s7057_s3 + $0x118] sm:$0xff] }
 0x355   :  { %1500 = vmatpush.msra.mxu1 %v7347_v36 }
 0x357   :  { %1501 = vmatpush.msra.mxu1 %v7348_v60  ;;  %v5609_v60 = vld [vmem:[%s7057_s3 + $0x60] sm:$0xff] }
 0x359   :  { %1502 = vmatpush.msra.mxu1 %v7349_v6  ;;  %v5614_v6 = vld [vmem:[%s7057_s3 + $0xe8] sm:$0xff] }
 0x35b   :  { %1503 = vmatpush.msra.mxu1 %v7350_v21  ;;  %v5619_v21 = vld [vmem:[%s7057_s3 + $0xf8] sm:$0xff] }
 0x35d   :  { %1504 = vmatpush.msra.mxu1 %v7351_v30 }
 0x35f   :  { %1505 = vmatpush.msra.mxu1 %v7352_v32  ;;  %v5630_v32 = vld [vmem:[%s7057_s3 + $0x40] sm:$0xff] }
 0x361   :  { %1506 = vmatpush.msra.mxu1 %v7353_v61  ;;  %v5635_v61 = vld [vmem:[%s7057_s3 + $0xc8] sm:$0xff] }
 0x363   :  { %1507 = vmatpush.msra.mxu1 %v7354_v38  ;;  %v5640_v38 = vld [vmem:[%s7057_s3 + $0xd8] sm:$0xff] }
 0x365   :  { %1508 = vmatpush.msra.mxu1 %v7355_v5  ;;  %v5648_v5 = vld [vmem:[%s7057_s3 + $0x20] sm:$0xff] }
 0x367   :  { %1509 = vmatpush.msra.mxu1 %v7356_v20  ;;  %v5653_v20 = vld [vmem:[%s7057_s3 + $0xa8] sm:$0xff] }
 0x369   :  { %1510 = vmatpush.msra.mxu1 %v7357_v47  ;;  %v5658_v47 = vld [vmem:[%s7057_s3 + $0xb8] sm:$0xff] }
 0x36a   :  { %7360 = vst [vmem:[#allocation28_spill] sm:$0xff] %v5658_v47 }
 0x36b   :  { %1511 = vmatpush.msra.mxu1 %v7358_v40 }
 0x36d   :  { %1512 = vmatpush.msra.mxu1 %v7359_v48  ;;  %v5667_v48 = vld [vmem:[%s7057_s3] sm:$0xff] }
 0x3ab   :  { %v1291_v35 = vpop.f32.mrf.mxu0 }
 0x3ac   :  { %v1292_v37 = vadd.f32 %v3586_v29, %v1291_v35  ;;  %v5672_v29 = vld [vmem:[%s7057_s3 + $0x88] sm:$0xff]  ;;  %v5677_v35 = vld [vmem:[%s7057_s3 + $0x98] sm:$0xff] }
 0x3ad   :  { %7361 = vst [vmem:[#allocation29_spill] sm:$0xff] %v5672_v29 }
 0x3ae   :  { %3632 = vtanh.f32 %v1292_v37  ;;  %7362 = vst [vmem:[#allocation30_spill] sm:$0xff] %v5677_v35 }
 0x3b2   :  { %v1474_v51 = vpop.f32.mrf.mxu3 }
 0x3b3   :  { %v1494_v11 = vpop.f32.mrf.mxu0 }
 0x3b4   :  { %v3633_v43 = vpop.eup %3632 }
 0x3b5   :  { %v1295_v27 = vmul.f32 %v3633_v43, %v5287_v3  ;;  %v1365_v43 = vpop.f32.mrf.mxu2 }
 0x3b7   :  { %1344 = vmatmul.f32.vlgmr.msrb.gmra.mxu1 %v1295_v27 }
 0x3b8   :  { %1753 = vmatpush.msrb.mxu1 %v5292_v9  ;;  %v1623_v9 = vperm.slane %v5445_v55, 1 }
 0x3ba   :  { %1754 = vmatpush.msrb.mxu1 %v5294_v52  ;;  %v1557_v17 = vpop.f32.mrf.mxu3 }
 0x3bb   :  { %v1558_v62 = vadd.f32 %v1557_v17, %v1474_v51  ;;  %v5688_v51 = vld [vmem:[%s7057_s3 + $0x68] sm:$0xff]  ;;  %v5693_v17 = vld [vmem:[%s7057_s3 + $0x78] sm:$0xff] }
 0x3bc   :  { %1755 = vmatpush.msrb.mxu1 %v5299_v4  ;;  %v5452_v4 = vld [vmem:[%s7057_s3 + $0x180] sm:$0xff]  ;;  %7363 = vst [vmem:[#allocation33_spill] sm:$0xff] %v5688_v51 }
 0x3bd   :  { %v1630_v44 = vadd.f32 %v1622_v23, %v1558_v62  ;;  %1885 = vmatpush.msra.mxu3 %v5452_v4  ;;  %7364 = vst [vmem:[#allocation34_spill] sm:$0xff] %v5693_v17  ;;  %v5695_v62 = vld [vmem:[#allocation2 + $0x60] sm:$0xff]  ;;  %v5702_v23 = vld [vmem:[%s7057_s3 + $0x48] sm:$0xff] }
 0x3be   :  { %1756 = vmatpush.msrb.mxu1 %v5314_v57  ;;  %v5463_v57 = vld [vmem:[%s7057_s3 + $0x1e8] sm:$0xff]  ;;  %7365 = vst [vmem:[#allocation31_spill] sm:$0xff] %v5702_v23 }
 0x3bf   :  { %1513 = vmatmul.f32.vlgmr.msra.gmra.mxu1 %v5287_v3  ;;  %v3539_v26 = vmul.f32 -1.442695, %v1630_v44  ;;  %1886 = vmatpush.msra.mxu3 %v5458_v53  ;;  %v5707_v44 = vld [vmem:[%s7057_s3 + $0x58] sm:$0xff] }
 0x3c0   :  { %1757 = vmatpush.msrb.mxu1 %v5320_v39  ;;  %v5468_v39 = vld [vmem:[%s7057_s3 + $0x1f8] sm:$0xff]  ;;  %1902 = vmatpush.msra.mxu0 %v5463_v57  ;;  %7366 = vst [vmem:[#allocation35_spill] sm:$0xff] %v5707_v44 }
 0x3c1   :  { %3634 = vpow2.f32 %v3539_v26  ;;  %1942 = vmatpush.msra.mxu2 %v5468_v39  ;;  %v5716_v26 = vld [vmem:[%s7057_s3 + $0x28] sm:$0xff] }
 0x3c2   :  { %1758 = vmatpush.msrb.mxu1 %v5326_v10  ;;  %v1577_v0 = vpop.f32.mrf.mxu3  ;;  %7367 = vst [vmem:[#allocation36_spill] sm:$0xff] %v5716_v26 }
 0x3c3   :  { %v1578_v8 = vadd.f32 %v1577_v0, %v1494_v11  ;;  %v5709_v0 = vld [vmem:[#allocation2 + $0x40] sm:$0xff] }
 0x3c4   :  { %1759 = vmatpush.msrb.mxu1 %v5331_v7 }
 0x3c5   :  { %v1631_v52 = vadd.f32 %v1623_v9, %v1578_v8  ;;  %v5718_v8 = vld [vmem:[#allocation2 + $0x20] sm:$0xff] }
 0x3c6   :  { %1760 = vmatpush.msrb.mxu1 %v5337_v16  ;;  %v5476_v16 = vld [vmem:[%s7057_s3 + $0x140] sm:$0xff] }
 0x3c7   :  { %v3540_v10 = vmul.f32 -1.442695, %v1631_v52  ;;  %v3635_v7 = vpop.eup %3634  ;;  %1887 = vmatpush.msra.mxu3 %v5476_v16  ;;  %v5727_v52 = vld [vmem:[%s7057_s3 + $0x38] sm:$0xff] }
 0x3c8   :  { %1761 = vmatpush.msrb.mxu1 %v5343_v13  ;;  %v5481_v13 = vld [vmem:[%s7057_s3 + $0x1c8] sm:$0xff]  ;;  %v5506_v50 = vadd.f32 1.0, %v3635_v7  ;;  %7368 = vst [vmem:[#allocation32_spill] sm:$0xff] %v5727_v52 }
 0x3c9   :  { %1903 = vmatpush.msra.mxu0 %v5481_v13  ;;  %3636 = vpow2.f32 %v3540_v10  ;;  %v3587_v10 = vld [vmem:[%s7063_s9] ss:$0 sm:$0xff]  ;;  %v5736_v7 = vld [vmem:[%s7057_s3 + $0x8] sm:$0xff] }
 0x3ca   :  { %1762 = vmatpush.msrb.mxu1 %v5351_v12  ;;  %v5486_v12 = vld [vmem:[%s7057_s3 + $0x1d8] sm:$0xff]  ;;  %3638 = vrcp.f32 %v5506_v50  ;;  %v5660_v40 = vpop.f32.mrf.mxu3  ;;  %7369 = vst [vmem:[#allocation37_spill] sm:$0xff] %v5736_v7  ;;  %vm1643_vm11 = vweird.f32 %v5506_v50 }
 0x3cb   :  { %1943 = vmatpush.msra.mxu2 %v5486_v12 }
 0x3cc   :  { %1763 = vmatpush.msrb.mxu1 %v5356_v19  ;;  %v5493_v19 = vld [vmem:[%s7057_s3 + $0x120] sm:$0xff] }
 0x3cd   :  { %1888 = vmatpush.msra.mxu3 %v5493_v19  ;;  %1944 = vmatpush.msra.mxu2 %v5503_v58 }
 0x3ce   :  { %1764 = vmatpush.msrb.mxu1 %v5362_v1  ;;  %v5498_v1 = vld [vmem:[%s7057_s3 + $0x1a8] sm:$0xff] }
 0x3cf   :  { %1904 = vmatpush.msra.mxu0 %v5498_v1  ;;  %1945 = vmatpush.msra.mxu2 %v5524_v42  ;;  %v3637_v22 = vpop.eup %3636 }
 0x3d0   :  { %1765 = vmatpush.msrb.mxu1 %v5368_v15  ;;  %v5514_v15 = vld [vmem:[%s7057_s3 + $0x100] sm:$0xff]  ;;  %v5583_v41 = vadd.f32 1.0, %v3637_v22  ;;  %v5601_v36 = vpop.eup %3638 }
 0x3d1   :  { %1889 = vmatpush.msra.mxu3 %v5514_v15  ;;  %1905 = vmatpush.msra.mxu0 %v5519_v25  ;;  %v1639_v30 = vmul.f32 %v5601_v36, %v5506_v50  ;;  %v5738_v22 = vld [vmem:[#allocation2] sm:$0xff]  ;;  %vm1644_vm10 = vweird.f32 %v5601_v36 }
 0x3d2   :  { %1766 = vmatpush.msrb.mxu1 %v1314_v56  ;;  %v5537_v56 = vld [vmem:[%s7057_s3 + $0x168] sm:$0xff]  ;;  %1946 = vmatpush.msra.mxu2 %v5542_v34  ;;  %3640 = vrcp.f32 %v5583_v41  ;;  %vm1645_vm12 = vmor %vm1643_vm11, %vm1644_vm10  ;;  %vm1662_vm15 = vweird.f32 %v5583_v41 }
 0x3d3   :  { %1890 = vmatpush.msra.mxu3 %v5532_v14  ;;  %1906 = vmatpush.msra.mxu0 %v5537_v56  ;;  %v1640_v37 = vsub.f32 1.0, %v1639_v30 }
 0x3d4   :  { %1767 = vmatpush.msrb.mxu1 %v1313_v31  ;;  %v5556_v31 = vld [vmem:[%s7057_s3 + $0x148] sm:$0xff]  ;;  %1947 = vmatpush.msra.mxu2 %v5561_v28 }
 0x3d5   :  { %1891 = vmatpush.msra.mxu3 %v5551_v54  ;;  %1907 = vmatpush.msra.mxu0 %v5556_v31  ;;  %v1641_v11 = vmul.f32 %v5601_v36, %v1640_v37  ;;  %v5745_v37 = vld [vmem:[%s7057_s3 + $0x18] sm:$0xff] }
 0x3d6   :  { %1768 = vmatpush.msrb.mxu1 %v1312_v2  ;;  %v5569_v2 = vld [vmem:[%s7057_s3 + $0xa0] sm:$0xff]  ;;  %1948 = vmatpush.msra.mxu2 %v5579_v33  ;;  %7370 = vst [vmem:[#allocation38_spill] sm:$0xff] %v5745_v37 }
 0x3d7   :  { %1892 = vmatpush.msra.mxu3 %v5569_v2  ;;  %1908 = vmatpush.msra.mxu0 %v5574_v18 }
 0x3d8   :  { %1949 = vmatpush.msra.mxu2 %v5599_v59  ;;  %v5682_v27 = vpop.eup %3640 }
 0x3d9   :  { %1893 = vmatpush.msra.mxu3 %v5589_v63  ;;  %1909 = vmatpush.msra.mxu0 %v5594_v24  ;;  %v1658_v9 = vmul.f32 %v5682_v27, %v5583_v41  ;;  %vm1663_vm14 = vweird.f32 %v5682_v27 }
 0x3da   :  { %1950 = vmatpush.msra.mxu2 %v5619_v21  ;;  %vm1664_vm1 = vmor %vm1662_vm15, %vm1663_vm14 }
 0x3db   :  { %1894 = vmatpush.msra.mxu3 %v5609_v60  ;;  %1910 = vmatpush.msra.mxu0 %v5614_v6 }
 0x3dc   :  { %1951 = vmatpush.msra.mxu2 %v5640_v38 }
 0x3dd   :  { %1895 = vmatpush.msra.mxu3 %v5630_v32  ;;  %1911 = vmatpush.msra.mxu0 %v5635_v61 }
 0x3de   :  { %1952 = vmatpush.msra.mxu2 %v5658_v47 }
 0x3df   :  { %1896 = vmatpush.msra.mxu3 %v5648_v5  ;;  %1912 = vmatpush.msra.mxu0 %v5653_v20 }
 0x3e0   :  { %1953 = vmatpush.msra.mxu2 %v5677_v35  ;;  %v1649_v35 = vand.u32 2147483648, %v5506_v50 }
 0x3e1   :  { %1897 = vmatpush.msra.mxu3 %v5667_v48  ;;  %1913 = vmatpush.msra.mxu0 %v5672_v29 }
 0x3e2   :  { %1954 = vmatpush.msra.mxu2 %v5693_v17  ;;  %v1659_v17 = vsub.f32 1.0, %v1658_v9 }
 0x3e3   :  { %1914 = vmatpush.msra.mxu0 %v5688_v51  ;;  %1977 = vmatpush.msrb.mxu3 %v5695_v62  ;;  %v1617_v51 = vpop.f32.mrf.mxu3 }
 0x3e4   :  { %1955 = vmatpush.msra.mxu2 %v5707_v44 }
 0x3e5   :  { %1915 = vmatpush.msra.mxu0 %v5702_v23  ;;  %1978 = vmatpush.msrb.mxu3 %v5709_v0  ;;  %v1642_v23 = vadd.f32 %v5601_v36, %v1641_v11  ;;  %v1534_v11 = vpop.f32.mrf.mxu2 }
 0x3e6   :  { %1956 = vmatpush.msra.mxu2 %v5727_v52  ;;  %v1650_v52 = vor.u32 1.1754944e-38, %v1649_v35 }
 0x3e7   :  { %1916 = vmatpush.msra.mxu0 %v5716_v26  ;;  %1979 = vmatpush.msrb.mxu3 %v5718_v8  ;;  %v1647_v26 = vand.u32 2147483647, %v5506_v50  ;;  %v1646_v9 = vsel %vm1645_vm12, %v5601_v36, %v1642_v23  ;;  %v1624_v50 = vperm.slane %v5445_v55, 2  ;;  %v1668_v36 = vand.u32 2147483648, %v5583_v41 }
 0x3e8   :  { %1957 = vmatpush.msra.mxu2 %v5745_v37 }
 0x3e9   :  { %1917 = vmatpush.msra.mxu0 %v5736_v7  ;;  %1980 = vmatpush.msrb.mxu3 %v5738_v22  ;;  %v1660_v7 = vmul.f32 %v5682_v27, %v1659_v17  ;;  %vm1648_vm13 = vcmp.eq.f32.partialorder %v1647_v26, 8.507059e+37  ;;  %v1669_v17 = vor.u32 1.1754944e-38, %v1668_v36  ;;  %v5820_v36 = vld [vmem:[%s7057_s3 + $0x170] sm:$0xff] }
 0x3ea   :  { %7375 = vst [vmem:[#allocation44_spill] sm:$0xff] %v5820_v36 }
 0x434   :  { %v1345_v30 = vpop.f32.mrf.mxu1 }
 0x435   :  { %v1366_v44 = vadd.f32 %v1365_v43, %v1345_v30  ;;  %v1618_v43 = vadd.f32 %v1617_v51, %v1534_v11  ;;  %v1625_v30 = vperm.slane %v5445_v55, 3  ;;  %v1661_v51 = vadd.f32 %v5682_v27, %v1660_v7 }
 0x437   :  { %v1372_v29 = vadd.f32 %v3587_v10, %v1366_v44  ;;  %v1651_v44 = vsel %vm1648_vm13, %v1650_v52, %v1646_v9  ;;  %v1633_v37 = vadd.f32 %v1625_v30, %v1618_v43  ;;  %v1665_v55 = vsel %vm1664_vm1, %v5682_v27, %v1661_v51  ;;  %v5783_v27 = vld [vmem:[%s7057_s3 + $0x1f0] sm:$0xff] }
 0x438   :  { %7371 = vst [vmem:[#allocation24_spill] sm:$0xff] %v5783_v27  ;;  %1922 = vmatpush.msra.mxu1 %v5783_v27  ;;  %v5797_v9 = vld [vmem:[%s7057_s3 + $0x1b0] sm:$0xff] }
 0x439   :  { %3533 = vst [vmem:[%s7064_s10 + $0x10] sm:$0xff] %v1372_v29  ;;  %v1672_v23 = vmul.f32 %v1651_v44, %v1633_v37  ;;  %v1666_v29 = vand.u32 2147483647, %v5583_v41  ;;  %v5778_v41 = vld [vmem:[#allocation2 + $0x48] sm:$0xff]  ;;  %v5809_v44 = vld [vmem:[%s7057_s3 + $0x190] sm:$0xff] }
 0x43a   :  { %v5792_v37 = vld [vmem:[#allocation2 + $0x28] sm:$0xff]  ;;  %7373 = vst [vmem:[#allocation25_spill] sm:$0xff] %v5797_v9  ;;  %v5815_v51 = vld [vmem:[#allocation2 + $0x70] sm:$0xff] }
 0x43b   :  { %vm1667_vm2 = vcmp.eq.f32.partialorder %v1666_v29, 8.507059e+37  ;;  %7374 = vst [vmem:[#allocation26_spill] sm:$0xff] %v5809_v44  ;;  %v5834_v29 = vld [vmem:[#allocation2 + $0x30] sm:$0xff] }
 0x43c   :  { %v1514_v10 = vpop.f32.mrf.mxu1 }
 0x43d   :  { %v1598_v47 = vadd.f32 %v5660_v40, %v1514_v10  ;;  %v1670_v40 = vsel %vm1667_vm2, %v1669_v17, %v1665_v55  ;;  %v5811_v10 = vld [vmem:[#allocation2 + $0x8] sm:$0xff]  ;;  %v5841_v55 = vld [vmem:[#allocation2 + $0x78] sm:$0xff] }
 0x43e   :  { %v1675_v26 = vsub.f32 1.0, %v1670_v40  ;;  %v1677_v7 = vmul.f32 %v1670_v40, %v5287_v3  ;;  %v5788_v3 = vld [vmem:[%s7057_s3 + $0x1d0] sm:$0xff]  ;;  %v5845_v17 = vld [vmem:[#allocation2 + $0x58] sm:$0xff] }
 0x43f   :  { %v1632_v11 = vadd.f32 %v1624_v50, %v1598_v47  ;;  %v5773_v47 = vld [vmem:[#allocation2 + $0x68] sm:$0xff]  ;;  %7372 = vst [vmem:[#allocation43_spill] sm:$0xff] %v5788_v3  ;;  %1923 = vmatpush.msra.mxu1 %v5788_v3  ;;  %v3542_v50 = vld [vmem:[%s7054_s0 + $0x20] sm:$0xff]  ;;  %v5848_v40 = vld [vmem:[#allocation2 + $0x38] sm:$0xff] }
 0x440   :  { %7377 = vst [vmem:[#allocation45_spill] sm:$0xff] %v5848_v40 }
 0x441   :  { %v1673_v35 = vadd.f32 %v1672_v23, %v1632_v11  ;;  %1924 = vmatpush.msra.mxu1 %v5797_v9  ;;  %v5825_v23 = vld [vmem:[#allocation2 + $0x50] sm:$0xff] }
 0x442   :  { %v5830_v11 = vld [vmem:[%s7057_s3 + $0x150] sm:$0xff] }
 0x443   :  { %3642 = vtanh.f32 %v1673_v35  ;;  %1925 = vmatpush.msra.mxu1 %v5809_v44  ;;  %7376 = vst [vmem:[#allocation27_spill] sm:$0xff] %v5830_v11  ;;  %v5839_v35 = vld [vmem:[#allocation2 + $0x10] sm:$0xff] }
 0x444   :  { %v6018_v44 = vld [vmem:[#allocation4 + $0x10] sm:$0xff] }
 0x445   :  { %1926 = vmatpush.msra.mxu1 %v5820_v36  ;;  %v6014_v36 = vld [vmem:[#allocation6 + $0x18] sm:$0xff]  ;;  %7397 = vst [vmem:[#allocation22_spill] sm:$0xff] %v6018_v44  ;;  %v6020_v9 = vld [vmem:[#allocation6 + $0x10] sm:$0xff] }
 0x446   :  { %7396 = vst [vmem:[#allocation21_spill] sm:$0xff] %v6014_v36 }
 0x447   :  { %1927 = vmatpush.msra.mxu1 %v5830_v11  ;;  %v6012_v11 = vld [vmem:[#allocation4 + $0x18] sm:$0xff]  ;;  %7398 = vst [vmem:[#allocation23_spill] sm:$0xff] %v6020_v9 }
 0x448   :  { %7395 = vst [vmem:[#allocation20_spill] sm:$0xff] %v6012_v11 }
 0x449   :  { %v3643_v52 = vpop.eup %3642 }
 0x44a   :  { %v1676_v43 = vmul.f32 %v3643_v52, %v1675_v26  ;;  %v5852_v26 = vld [vmem:[#allocation2 + $0x18] sm:$0xff]  ;;  %v5954_v52 = vld [vmem:[#allocation6 + $0x68] sm:$0xff] }
 0x44b   :  { %7378 = vst [vmem:[#allocation46_spill] sm:$0xff] %v5852_v26 }
 0x44c   :  { %v5771_v30 = vadd.f32 %v1677_v7, %v1676_v43  ;;  %v5958_v43 = vld [vmem:[#allocation4 + $0x60] sm:$0xff] }
 0x44d   :  { %v5960_v7 = vld [vmem:[#allocation6 + $0x60] sm:$0xff] }
 0x44e   :  { %1715 = vmatmul.f32.vlgmr.msrb.gmra.mxu0 %v5771_v30  ;;  %1789 = vmatmul.f32.vlgmr.msrb.gmra.mxu2 %v5771_v30 }
 0x44f   :  { %1898 = vmatmul.f32.vlgmr.msra.gmra.mxu3 %v5771_v30 }
 0x450   :  { %1997 = vmatpush.msra.mxu3 %v5773_v47 }
 0x452   :  { %1998 = vmatpush.msra.mxu3 %v5778_v41 }
 0x454   :  { %1999 = vmatpush.msra.mxu3 %v5792_v37 }
 0x456   :  { %1918 = vmatmul.f32.vlgmr.msra.gmra.mxu0 %v5771_v30  ;;  %1958 = vmatmul.f32.vlgmr.msra.gmra.mxu2 %v5771_v30 }
 0x457   :  { %3543 = vmatmul.msk.f32.vlgmr.msrb.gmra.mxu3 %vm262_vm0, %v3542_v50 }
 0x458   :  { %2000 = vmatpush.msra.mxu3 %v5811_v10 }
 0x45a   :  { %2017 = vmatpush.msrb.mxu3 %v5815_v51 }
 0x45c   :  { %2018 = vmatpush.msrb.mxu3 %v5825_v23 }
 0x45e   :  { %2019 = vmatpush.msrb.mxu3 %v5834_v29 }
 0x45f   :  { %3544 = vmatmul.msk.f32.vlgmr.msra.gmra.mxu3 %vm262_vm0, %v3542_v50 }
 0x460   :  { %2020 = vmatpush.msrb.mxu3 %v5839_v35 }
 0x462   :  { %2037 = vmatpush.msra.mxu3 %v5841_v55 }
 0x464   :  { %2038 = vmatpush.msra.mxu3 %v5845_v17 }
 0x466   :  { %2039 = vmatpush.msra.mxu3 %v5848_v40 }
 0x467   :  { %3545 = vmatmul.msk.f32.vlgmr.msrb.gmra.mxu3 %vm262_vm0, %v3542_v50 }
 0x468   :  { %2040 = vmatpush.msra.mxu3 %v5852_v26 }
 0x46a   :  { %2307 = vmatpush.msrb.mxu3 %v5416_v45  ;;  %v5880_v45 = vld [vmem:[%s7057_s3 + $0x130] sm:$0xff] }
 0x46b   :  { %7379 = vst [vmem:[#allocation47_spill] sm:$0xff] %v5880_v45  ;;  %1928 = vmatpush.msra.mxu1 %v5880_v45  ;;  %v6008_v45 = vld [vmem:[#allocation6 + $0x20] sm:$0xff] }
 0x46c   :  { %2308 = vmatpush.msrb.mxu3 %v5421_v46  ;;  %v5886_v46 = vld [vmem:[%s7057_s3 + $0x110] sm:$0xff]  ;;  %7394 = vst [vmem:[#allocation19_spill] sm:$0xff] %v6008_v45 }
 0x46d   :  { %7380 = vst [vmem:[#allocation48_spill] sm:$0xff] %v5886_v46  ;;  %1929 = vmatpush.msra.mxu1 %v5886_v46  ;;  %v6006_v46 = vld [vmem:[#allocation4 + $0x20] sm:$0xff] }
 0x46e   :  { %2309 = vmatpush.msrb.mxu3 %v5429_v49  ;;  %v5891_v49 = vld [vmem:[%s7057_s3 + $0xf0] sm:$0xff]  ;;  %7393 = vst [vmem:[#allocation18_spill] sm:$0xff] %v6006_v46 }
 0x46f   :  { %3546 = vmatmul.msk.f32.vlgmr.msra.gmra.mxu3 %vm262_vm0, %v3542_v50  ;;  %7381 = vst [vmem:[#allocation49_spill] sm:$0xff] %v5891_v49  ;;  %1930 = vmatpush.msra.mxu1 %v5891_v49  ;;  %v5964_v50 = vld [vmem:[#allocation4 + $0x58] sm:$0xff]  ;;  %v6002_v49 = vld [vmem:[#allocation6 + $0x28] sm:$0xff] }
 0x470   :  { %2310 = vmatpush.msrb.mxu3 %v5452_v4  ;;  %v5898_v4 = vld [vmem:[%s7057_s3 + $0xd0] sm:$0xff]  ;;  %7392 = vst [vmem:[#allocation17_spill] sm:$0xff] %v6002_v49 }
 0x471   :  { %7382 = vst [vmem:[#allocation50_spill] sm:$0xff] %v5898_v4  ;;  %1931 = vmatpush.msra.mxu1 %v5898_v4  ;;  %v6000_v4 = vld [vmem:[#allocation4 + $0x28] sm:$0xff] }
 0x472   :  { %2311 = vmatpush.msrb.mxu3 %v5458_v53  ;;  %v5904_v53 = vld [vmem:[%s7057_s3 + $0xb0] sm:$0xff]  ;;  %7391 = vst [vmem:[#allocation16_spill] sm:$0xff] %v6000_v4 }
 0x473   :  { %7383 = vst [vmem:[#allocation39_spill] sm:$0xff] %v5904_v53  ;;  %1932 = vmatpush.msra.mxu1 %v5904_v53  ;;  %v5996_v53 = vld [vmem:[#allocation6 + $0x30] sm:$0xff] }
 0x474   :  { %2312 = vmatpush.msrb.mxu3 %v5476_v16  ;;  %v5909_v16 = vld [vmem:[%s7057_s3 + $0x90] sm:$0xff]  ;;  %7390 = vst [vmem:[#allocation15_spill] sm:$0xff] %v5996_v53 }
 0x475   :  { %7384 = vst [vmem:[#allocation40_spill] sm:$0xff] %v5909_v16  ;;  %1933 = vmatpush.msra.mxu1 %v5909_v16  ;;  %v5994_v16 = vld [vmem:[#allocation4 + $0x30] sm:$0xff] }
 0x476   :  { %2313 = vmatpush.msrb.mxu3 %v5493_v19  ;;  %v5916_v19 = vld [vmem:[%s7057_s3 + $0x70] sm:$0xff]  ;;  %7389 = vst [vmem:[#allocation14_spill] sm:$0xff] %v5994_v16 }
 0x477   :  { %7385 = vst [vmem:[#allocation41_spill] sm:$0xff] %v5916_v19  ;;  %1934 = vmatpush.msra.mxu1 %v5916_v19  ;;  %v5990_v19 = vld [vmem:[#allocation6 + $0x38] sm:$0xff] }
 0x478   :  { %2314 = vmatpush.msrb.mxu3 %v5514_v15  ;;  %v5922_v15 = vld [vmem:[%s7057_s3 + $0x50] sm:$0xff] }
 0x479   :  { %7386 = vst [vmem:[#allocation12_spill] sm:$0xff] %v5922_v15  ;;  %1935 = vmatpush.msra.mxu1 %v5922_v15  ;;  %v5988_v15 = vld [vmem:[#allocation4 + $0x38] sm:$0xff] }
 0x47a   :  { %2315 = vmatpush.msrb.mxu3 %v5532_v14  ;;  %v5928_v14 = vld [vmem:[%s7057_s3 + $0x30] sm:$0xff] }
 0x47b   :  { %7387 = vst [vmem:[#allocation42_spill] sm:$0xff] %v5928_v14  ;;  %1936 = vmatpush.msra.mxu1 %v5928_v14  ;;  %v5984_v14 = vld [vmem:[#allocation6 + $0x40] sm:$0xff] }
 0x47c   :  { %2316 = vmatpush.msrb.mxu3 %v5551_v54  ;;  %v5934_v54 = vld [vmem:[%s7057_s3 + $0x10] sm:$0xff] }
 0x47d   :  { %7388 = vst [vmem:[#allocation13_spill] sm:$0xff] %v5934_v54  ;;  %1937 = vmatpush.msra.mxu1 %v5934_v54  ;;  %v5982_v54 = vld [vmem:[#allocation4 + $0x40] sm:$0xff] }
 0x47e   :  { %2317 = vmatpush.msrb.mxu3 %v5569_v2  ;;  %v3588_v2 = vld [vmem:[%s7060_s6] ss:$0 sm:$0xff] }
 0x480   :  { %2318 = vmatpush.msrb.mxu3 %v5589_v63 }
 0x482   :  { %2319 = vmatpush.msrb.mxu3 %v5609_v60 }
 0x484   :  { %2320 = vmatpush.msrb.mxu3 %v5630_v32 }
 0x486   :  { %2321 = vmatpush.msrb.mxu3 %v5648_v5 }
 0x488   :  { %2322 = vmatpush.msrb.mxu3 %v5667_v48  ;;  %v5941_v48 = vld [vmem:[#allocation4 + $0x78] sm:$0xff] }
 0x489   :  { %2124 = vmatpush.msrb.mxu0 %v5941_v48 }
 0x48a   :  { %2402 = vmatpush.msra.mxu3 %v5695_v62  ;;  %v5943_v62 = vld [vmem:[#allocation6 + $0x78] sm:$0xff] }
 0x48b   :  { %2198 = vmatpush.msrb.mxu2 %v5943_v62 }
 0x48c   :  { %2403 = vmatpush.msra.mxu3 %v5709_v0  ;;  %v5945_v0 = vld [vmem:[#allocation4 + $0x70] sm:$0xff] }
 0x48d   :  { %2125 = vmatpush.msrb.mxu0 %v5945_v0 }
 0x48e   :  { %2404 = vmatpush.msra.mxu3 %v5718_v8  ;;  %v5949_v8 = vld [vmem:[#allocation6 + $0x70] sm:$0xff] }
 0x48f   :  { %2199 = vmatpush.msrb.mxu2 %v5949_v8 }
 0x490   :  { %2405 = vmatpush.msra.mxu3 %v5738_v22  ;;  %v5952_v22 = vld [vmem:[#allocation4 + $0x68] sm:$0xff] }
 0x491   :  { %2126 = vmatpush.msrb.mxu0 %v5952_v22  ;;  %2200 = vmatpush.msrb.mxu2 %v5954_v52 }
 0x493   :  { %2127 = vmatpush.msrb.mxu0 %v5958_v43  ;;  %2201 = vmatpush.msrb.mxu2 %v5960_v7 }
 0x495   :  { %2128 = vmatpush.msrb.mxu0 %v5964_v50 }
 0x4cb   :  { %v1716_v63 = vpop.f32.mrf.mxu0 }
 0x4cc   :  { %v1717_v60 = vadd.f32 %v3588_v2, %v1716_v63  ;;  %v5966_v2 = vld [vmem:[#allocation6 + $0x58] sm:$0xff]  ;;  %v5970_v63 = vld [vmem:[#allocation4 + $0x50] sm:$0xff] }
 0x4cd   :  { %2202 = vmatpush.msrb.mxu2 %v5966_v2  ;;  %2129 = vmatpush.msrb.mxu0 %v5970_v63 }
 0x4ce   :  { %3644 = vtanh.f32 %v1717_v60  ;;  %v5972_v60 = vld [vmem:[#allocation6 + $0x50] sm:$0xff] }
 0x4cf   :  { %2203 = vmatpush.msrb.mxu2 %v5972_v60 }
 0x4d2   :  { %v1899_v3 = vpop.f32.mrf.mxu3 }
 0x4d4   :  { %v3645_v32 = vpop.eup %3644 }
 0x4d5   :  { %v1720_v5 = vmul.f32 %v3645_v32, %v5771_v30  ;;  %v5976_v32 = vld [vmem:[#allocation4 + $0x48] sm:$0xff] }
 0x4d6   :  { %2130 = vmatpush.msrb.mxu0 %v5976_v32 }
 0x4d7   :  { %1769 = vmatmul.f32.vlgmr.msrb.gmra.mxu1 %v1720_v5  ;;  %v5978_v5 = vld [vmem:[#allocation6 + $0x48] sm:$0xff] }
 0x4d8   :  { %2204 = vmatpush.msrb.mxu2 %v5978_v5  ;;  %2131 = vmatpush.msrb.mxu0 %v5982_v54 }
 0x4da   :  { %2205 = vmatpush.msrb.mxu2 %v5984_v14  ;;  %2132 = vmatpush.msrb.mxu0 %v5988_v15  ;;  %v1982_v27 = vpop.f32.mrf.mxu3 }
 0x4dc   :  { %2206 = vmatpush.msrb.mxu2 %v5990_v19  ;;  %2133 = vmatpush.msrb.mxu0 %v5994_v16  ;;  %v6035_v16 = vld [vmem:[#allocation6 + $0x8] sm:$0xff] }
 0x4de   :  { %2207 = vmatpush.msrb.mxu2 %v5996_v53  ;;  %2134 = vmatpush.msrb.mxu0 %v6000_v4  ;;  %v1919_v53 = vpop.f32.mrf.mxu0 }
 0x4df   :  { %1938 = vmatmul.f32.vlgmr.msra.gmra.mxu1 %v5771_v30 }
 0x4e0   :  { %2208 = vmatpush.msrb.mxu2 %v6002_v49  ;;  %2135 = vmatpush.msrb.mxu0 %v6006_v46  ;;  %v6029_v46 = vld [vmem:[%s7058_s4] sm:$0xf] }
 0x4e1   :  { %v2047_v49 = vperm.slane %v6029_v46, 0 }
 0x4e2   :  { %2209 = vmatpush.msrb.mxu2 %v6008_v45  ;;  %2136 = vmatpush.msrb.mxu0 %v6012_v11  ;;  %v1983_v45 = vadd.f32 %v1982_v27, %v1899_v3  ;;  %v2002_v4 = vpop.f32.mrf.mxu3  ;;  %v6039_v27 = vld [vmem:[#allocation4] sm:$0xff] }
 0x4e3   :  { %v2003_v40 = vadd.f32 %v2002_v4, %v1919_v53  ;;  %v6041_v3 = vld [vmem:[#allocation6] sm:$0xff]  ;;  %v7408_v53 = vld [vmem:[#allocation37_spill] sm:$0xff] }
 0x4e4   :  { %2210 = vmatpush.msrb.mxu2 %v6014_v36  ;;  %2137 = vmatpush.msrb.mxu0 %v6018_v44  ;;  %v2055_v26 = vadd.f32 %v2047_v49, %v1983_v45  ;;  %v2048_v36 = vperm.slane %v6029_v46, 1 }
 0x4e6   :  { %2211 = vmatpush.msrb.mxu2 %v6020_v9  ;;  %v3547_v11 = vmul.f32 -1.442695, %v2055_v26  ;;  %v2056_v44 = vadd.f32 %v2048_v36, %v2003_v40  ;;  %v6033_v9 = vld [vmem:[#allocation4 + $0x8] sm:$0xff] }
 0x4e7   :  { %2138 = vmatpush.msrb.mxu0 %v6033_v9 }
 0x4e8   :  { %3646 = vpow2.f32 %v3547_v11  ;;  %2212 = vmatpush.msrb.mxu2 %v6035_v16  ;;  %v3548_v26 = vmul.f32 -1.442695, %v2056_v44 }
 0x4e9   :  { %2139 = vmatpush.msrb.mxu0 %v6039_v27 }
 0x4ea   :  { %2213 = vmatpush.msrb.mxu2 %v6041_v3  ;;  %3648 = vpow2.f32 %v3548_v26  ;;  %v7409_v26 = vld [vmem:[#allocation38_spill] sm:$0xff] }
 0x4eb   :  { %2327 = vmatpush.msra.mxu0 %v5463_v57 }
 0x4ec   :  { %2367 = vmatpush.msra.mxu2 %v5468_v39 }
 0x4ed   :  { %2328 = vmatpush.msra.mxu0 %v5481_v13 }
 0x4ee   :  { %v3647_v36 = vpop.eup %3646  ;;  %2368 = vmatpush.msra.mxu2 %v5486_v12 }
 0x4ef   :  { %v2062_v11 = vadd.f32 1.0, %v3647_v36  ;;  %2329 = vmatpush.msra.mxu0 %v5498_v1  ;;  %v2022_v1 = vpop.f32.mrf.mxu3 }
 0x4f0   :  { %2369 = vmatpush.msra.mxu2 %v5503_v58  ;;  %v3649_v57 = vpop.eup %3648  ;;  %v7399_v58 = vld [vmem:[#allocation28_spill] sm:$0xff] }
 0x4f1   :  { %2330 = vmatpush.msra.mxu0 %v5519_v25  ;;  %3650 = vrcp.f32 %v2062_v11  ;;  %v6059_v39 = vadd.f32 1.0, %v3649_v57  ;;  %v2074_v4 = vand.u32 2147483648, %v2062_v11  ;;  %vm2068_vm4 = vweird.f32 %v2062_v11 }
 0x4f2   :  { %2370 = vmatpush.msra.mxu2 %v5524_v42  ;;  %v1790_v42 = vpop.f32.mrf.mxu2  ;;  %v2072_v36 = vand.u32 2147483647, %v2062_v11 }
 0x4f3   :  { %2331 = vmatpush.msra.mxu0 %v5537_v56  ;;  %3652 = vrcp.f32 %v6059_v39  ;;  %v7400_v56 = vld [vmem:[#allocation29_spill] sm:$0xff]  ;;  %vm2087_vm8 = vweird.f32 %v6059_v39 }
 0x4f4   :  { %2371 = vmatpush.msra.mxu2 %v5542_v34  ;;  %v7401_v34 = vld [vmem:[#allocation30_spill] sm:$0xff]  ;;  %vm2073_vm6 = vcmp.eq.f32.partialorder %v2072_v36, 8.507059e+37  ;;  %v7426_v36 = vld [vmem:[#allocation44_spill] sm:$0xff] }
 0x4f5   :  { %2332 = vmatpush.msra.mxu0 %v5556_v31 }
 0x4f6   :  { %2372 = vmatpush.msra.mxu2 %v5561_v28  ;;  %v7402_v28 = vld [vmem:[#allocation33_spill] sm:$0xff] }
 0x4f7   :  { %2333 = vmatpush.msra.mxu0 %v5574_v18  ;;  %v3651_v13 = vpop.eup %3650  ;;  %v7403_v18 = vld [vmem:[#allocation34_spill] sm:$0xff]  ;;  %v2042_v49 = vpop.f32.mrf.mxu3 }
 0x4f8   :  { %2373 = vmatpush.msra.mxu2 %v5579_v33  ;;  %v2064_v12 = vmul.f32 %v3651_v13, %v2062_v11  ;;  %vm2069_vm3 = vweird.f32 %v3651_v13 }
 0x4f9   :  { %2334 = vmatpush.msra.mxu0 %v5594_v24  ;;  %v3653_v31 = vpop.eup %3652  ;;  %vm2070_vm5 = vmor %vm2068_vm4, %vm2069_vm3 }
 0x4fa   :  { %2374 = vmatpush.msra.mxu2 %v5599_v59  ;;  %v2065_v25 = vsub.f32 1.0, %v2064_v12  ;;  %v2083_v24 = vmul.f32 %v3653_v31, %v6059_v39  ;;  %v7404_v59 = vld [vmem:[#allocation31_spill] sm:$0xff]  ;;  %v1959_v12 = vpop.f32.mrf.mxu2  ;;  %vm2088_vm7 = vweird.f32 %v3653_v31 }
 0x4fb   :  { %2335 = vmatpush.msra.mxu0 %v5614_v6  ;;  %v7405_v6 = vld [vmem:[#allocation35_spill] sm:$0xff]  ;;  %vm2089_vm9 = vmor %vm2087_vm8, %vm2088_vm7 }
 0x4fc   :  { %2375 = vmatpush.msra.mxu2 %v5619_v21  ;;  %v2066_v33 = vmul.f32 %v3651_v13, %v2065_v25  ;;  %v3589_v21 = vld [vmem:[%s7063_s9] ss:$0 sm:$0xff]  ;;  %v2084_v45 = vsub.f32 1.0, %v2083_v24  ;;  %v2050_v25 = vperm.slane %v6029_v46, 3 }
 0x4fd   :  { %2336 = vmatpush.msra.mxu0 %v5635_v61 }
 0x4fe   :  { %2376 = vmatpush.msra.mxu2 %v5640_v38  ;;  %v7406_v38 = vld [vmem:[#allocation36_spill] sm:$0xff]  ;;  %v2067_v44 = vadd.f32 %v3651_v13, %v2066_v33 }
 0x4ff   :  { %2337 = vmatpush.msra.mxu0 %v5653_v20  ;;  %v7407_v20 = vld [vmem:[#allocation32_spill] sm:$0xff] }
 0x500   :  { %2377 = vmatpush.msra.mxu2 %v7399_v58  ;;  %v2043_v58 = vadd.f32 %v2042_v49, %v1959_v12  ;;  %v7428_v12 = vld [vmem:[#allocation47_spill] sm:$0xff] }
 0x501   :  { %2338 = vmatpush.msra.mxu0 %v7400_v56  ;;  %v2071_v56 = vsel %vm2070_vm5, %v3651_v13, %v2067_v44  ;;  %v2091_v13 = vand.u32 2147483647, %v6059_v39 }
 0x502   :  { %2378 = vmatpush.msra.mxu2 %v7401_v34  ;;  %v2075_v34 = vor.u32 1.1754944e-38, %v2074_v4  ;;  %v2058_v24 = vadd.f32 %v2050_v25, %v2043_v58  ;;  %v7429_v58 = vld [vmem:[#allocation48_spill] sm:$0xff]  ;;  %v7432_v25 = vld [vmem:[#allocation39_spill] sm:$0xff] }
 0x503   :  { %2339 = vmatpush.msra.mxu0 %v7402_v28  ;;  %v2049_v28 = vperm.slane %v6029_v46, 2  ;;  %vm2092_vm10 = vcmp.eq.f32.partialorder %v2091_v13, 8.507059e+37 }
 0x504   :  { %2379 = vmatpush.msra.mxu2 %v7403_v18  ;;  %v2076_v18 = vsel %vm2073_vm6, %v2075_v34, %v2071_v56  ;;  %v7435_v56 = vld [vmem:[#allocation12_spill] sm:$0xff]  ;;  %v7437_v34 = vld [vmem:[#allocation13_spill] sm:$0xff] }
 0x505   :  { %2340 = vmatpush.msra.mxu0 %v7404_v59 }
 0x506   :  { %2380 = vmatpush.msra.mxu2 %v7405_v6  ;;  %v2093_v6 = vand.u32 2147483648, %v6059_v39  ;;  %v6098_v39 = vld [vmem:[#allocation7 + $0x78] sm:$0xff] }
 0x507   :  { %2341 = vmatpush.msra.mxu0 %v7406_v38  ;;  %2178 = vmatpush.msrb.mxu1 %v6098_v39 }
 0x508   :  { %2381 = vmatpush.msra.mxu2 %v7407_v20  ;;  %v2094_v44 = vor.u32 1.1754944e-38, %v2093_v6  ;;  %v6227_v6 = vld [vmem:[%s7057_s3 + $0x1c0] sm:$0xff] }
 0x509   :  { %2342 = vmatpush.msra.mxu0 %v7408_v53  ;;  %v6105_v53 = vld [vmem:[#allocation7 + $0x68] sm:$0xff] }
 0x50a   :  { %2382 = vmatpush.msra.mxu2 %v7409_v26  ;;  %v7425_v26 = vld [vmem:[#allocation26_spill] sm:$0xff] }
 0x554   :  { %v1770_v61 = vpop.f32.mrf.mxu1 }
 0x555   :  { %v1791_v40 = vadd.f32 %v1790_v42, %v1770_v61  ;;  %v2085_v42 = vmul.f32 %v3653_v31, %v2084_v45 }
 0x557   :  { %v1797_v57 = vadd.f32 %v3589_v21, %v1791_v40  ;;  %v2086_v59 = vadd.f32 %v3653_v31, %v2085_v42  ;;  %v2097_v21 = vmul.f32 %v2076_v18, %v2058_v24  ;;  %v7436_v42 = vld [vmem:[#allocation42_spill] sm:$0xff] }
 0x559   :  { %3541 = vst [vmem:[%s7064_s10 + $0x18] sm:$0xff] %v1797_v57  ;;  %v2090_v20 = vsel %vm2089_vm9, %v3653_v31, %v2086_v59  ;;  %v6100_v31 = vld [vmem:[#allocation7 + $0x70] sm:$0xff]  ;;  %v7427_v57 = vld [vmem:[#allocation27_spill] sm:$0xff]  ;;  %v6222_v59 = vld [vmem:[%s7057_s3 + $0x1e0] sm:$0xff] }
 0x55a   :  { %v2095_v46 = vsel %vm2092_vm10, %v2094_v44, %v2090_v20  ;;  %2179 = vmatpush.msrb.mxu1 %v6100_v31 }
 0x55b   :  { %v2100_v40 = vsub.f32 1.0, %v2095_v46  ;;  %v2102_v49 = vmul.f32 %v2095_v46, %v5771_v30  ;;  %v6116_v30 = vld [vmem:[%s7054_s0 + $0x28] sm:$0xff] }
 0x55c   :  { %v1939_v33 = vpop.f32.mrf.mxu1  ;;  %2180 = vmatpush.msrb.mxu1 %v6105_v53 }
 0x55d   :  { %v2023_v11 = vadd.f32 %v2022_v1, %v1939_v33 }
 0x55f   :  { %v2057_v61 = vadd.f32 %v2049_v28, %v2023_v11  ;;  %v3590_v28 = vld [vmem:[%s7060_s6] ss:$0 sm:$0xff] }
 0x561   :  { %v2098_v38 = vadd.f32 %v2097_v21, %v2057_v61  ;;  %v6235_v21 = vld [vmem:[%s7057_s3 + $0x1a0] sm:$0xff] }
 0x563   :  { %3654 = vtanh.f32 %v2098_v38  ;;  %v6251_v38 = vld [vmem:[%s7058_s4] sm:$0xf] }
 0x564   :  { %v2472_v44 = vperm.slane %v6251_v38, 0 }
 0x569   :  { %v3655_v45 = vpop.eup %3654 }
 0x56a   :  { %v2101_v1 = vmul.f32 %v3655_v45, %v2100_v40 }
 0x56c   :  { %v6093_v4 = vadd.f32 %v2102_v49, %v2101_v1 }
 0x56e   :  { %2140 = vmatmul.f32.vlgmr.msrb.gmra.mxu0 %v6093_v4  ;;  %2214 = vmatmul.f32.vlgmr.msrb.gmra.mxu2 %v6093_v4 }
 0x56f   :  { %2323 = vmatmul.f32.vlgmr.msrb.gmra.mxu3 %v6093_v4  ;;  %2549 = vmatpush.msrb.mxu0 %v5941_v48  ;;  %v6137_v48 = vld [vmem:[#allocation7 + $0x48] sm:$0xff] }
 0x570   :  { %2422 = vmatpush.msrb.mxu3 %v5773_v47  ;;  %2623 = vmatpush.msrb.mxu2 %v5943_v62  ;;  %v6120_v47 = vld [vmem:[#allocation7 + $0x60] sm:$0xff] }
 0x571   :  { %2550 = vmatpush.msrb.mxu0 %v5945_v0  ;;  %2181 = vmatpush.msrb.mxu1 %v6120_v47  ;;  %v6143_v62 = vld [vmem:[#allocation7 + $0x40] sm:$0xff]  ;;  %v7412_v0 = vld [vmem:[#allocation15_spill] sm:$0xff] }
 0x572   :  { %2423 = vmatpush.msrb.mxu3 %v5778_v41  ;;  %2624 = vmatpush.msrb.mxu2 %v5949_v8  ;;  %v6126_v41 = vld [vmem:[#allocation7 + $0x58] sm:$0xff]  ;;  %v7416_v8 = vld [vmem:[#allocation18_spill] sm:$0xff] }
 0x573   :  { %2551 = vmatpush.msrb.mxu0 %v5952_v22  ;;  %2182 = vmatpush.msrb.mxu1 %v6126_v41  ;;  %v2163_v22 = vld [vmem:[#allocation7 + $0x8] sm:$0xff] }
 0x574   :  { %2424 = vmatpush.msrb.mxu3 %v5792_v37  ;;  %2625 = vmatpush.msrb.mxu2 %v5954_v52  ;;  %v6132_v37 = vld [vmem:[#allocation7 + $0x50] sm:$0xff]  ;;  %v7417_v52 = vld [vmem:[#allocation19_spill] sm:$0xff] }
 0x575   :  { %2552 = vmatpush.msrb.mxu0 %v5958_v43  ;;  %2183 = vmatpush.msrb.mxu1 %v6132_v37  ;;  %v7418_v43 = vld [vmem:[#allocation20_spill] sm:$0xff] }
 0x576   :  { %2343 = vmatmul.f32.vlgmr.msra.gmra.mxu0 %v6093_v4  ;;  %2383 = vmatmul.f32.vlgmr.msra.gmra.mxu2 %v6093_v4 }
 0x577   :  { %3551 = vmatmul.msk.f32.vlgmr.msra.gmra.mxu3 %vm262_vm0, %v6116_v30  ;;  %2626 = vmatpush.msrb.mxu2 %v5960_v7  ;;  %v2162_v7 = vld [vmem:[#allocation7] sm:$0xff] }
 0x578   :  { %2425 = vmatpush.msrb.mxu3 %v5811_v10  ;;  %2553 = vmatpush.msrb.mxu0 %v5964_v50  ;;  %v6149_v10 = vld [vmem:[#allocation7 + $0x38] sm:$0xff]  ;;  %v7419_v50 = vld [vmem:[#allocation21_spill] sm:$0xff] }
 0x579   :  { %2627 = vmatpush.msrb.mxu2 %v5966_v2  ;;  %2184 = vmatpush.msrb.mxu1 %v6137_v48  ;;  %v7420_v2 = vld [vmem:[#allocation22_spill] sm:$0xff] }
 0x57a   :  { %2442 = vmatpush.msra.mxu3 %v5815_v51  ;;  %2554 = vmatpush.msrb.mxu0 %v5970_v63  ;;  %v6157_v51 = vld [vmem:[#allocation7 + $0x30] sm:$0xff]  ;;  %v7421_v63 = vld [vmem:[#allocation23_spill] sm:$0xff] }
 0x57b   :  { %2628 = vmatpush.msrb.mxu2 %v5972_v60  ;;  %2185 = vmatpush.msrb.mxu1 %v6143_v62  ;;  %v7422_v60 = vld [vmem:[#allocation24_spill] sm:$0xff] }
 0x57c   :  { %2443 = vmatpush.msra.mxu3 %v5825_v23  ;;  %2555 = vmatpush.msrb.mxu0 %v5976_v32  ;;  %v6162_v23 = vld [vmem:[#allocation7 + $0x28] sm:$0xff]  ;;  %v7423_v32 = vld [vmem:[#allocation43_spill] sm:$0xff] }
 0x57d   :  { %2629 = vmatpush.msrb.mxu2 %v5978_v5  ;;  %2186 = vmatpush.msrb.mxu1 %v6149_v10  ;;  %v7424_v5 = vld [vmem:[#allocation25_spill] sm:$0xff] }
 0x57e   :  { %2444 = vmatpush.msra.mxu3 %v5834_v29  ;;  %2556 = vmatpush.msrb.mxu0 %v5982_v54  ;;  %v6168_v29 = vld [vmem:[#allocation7 + $0x20] sm:$0xff]  ;;  %v7411_v54 = vld [vmem:[#allocation45_spill] sm:$0xff] }
 0x57f   :  { %3552 = vmatmul.msk.f32.vlgmr.msrb.gmra.mxu3 %vm262_vm0, %v6116_v30  ;;  %2630 = vmatpush.msrb.mxu2 %v5984_v14  ;;  %v7413_v14 = vld [vmem:[#allocation16_spill] sm:$0xff] }
 0x580   :  { %2445 = vmatpush.msra.mxu3 %v5839_v35  ;;  %2557 = vmatpush.msrb.mxu0 %v5988_v15  ;;  %v7410_v35 = vld [vmem:[#allocation14_spill] sm:$0xff]  ;;  %v7415_v15 = vld [vmem:[#allocation17_spill] sm:$0xff] }
 0x581   :  { %2187 = vmatpush.msrb.mxu1 %v6157_v51  ;;  %2631 = vmatpush.msrb.mxu2 %v5990_v19  ;;  %v2164_v19 = vld [vmem:[#allocation7 + $0x10] sm:$0xff] }
 0x582   :  { %2462 = vmatpush.msrb.mxu3 %v5841_v55  ;;  %2558 = vmatpush.msrb.mxu0 %v7410_v35  ;;  %v6174_v55 = vld [vmem:[#allocation7 + $0x18] sm:$0xff] }
 0x583   :  { %2188 = vmatpush.msrb.mxu1 %v6162_v23  ;;  %2632 = vmatpush.msrb.mxu2 %v7412_v0  ;;  %v6309_v35 = vld [vmem:[%s7057_s3 + $0x1b8] sm:$0xff]  ;;  %v6325_v0 = vld [vmem:[%s7057_s3 + $0x188] sm:$0xff] }
 0x584   :  { %2463 = vmatpush.msrb.mxu3 %v5845_v17  ;;  %2559 = vmatpush.msrb.mxu0 %v7413_v14  ;;  %v7414_v17 = vld [vmem:[#allocation46_spill] sm:$0xff]  ;;  %v6330_v14 = vld [vmem:[%s7057_s3 + $0x198] sm:$0xff] }
 0x585   :  { %2189 = vmatpush.msrb.mxu1 %v6168_v29  ;;  %2633 = vmatpush.msrb.mxu2 %v7415_v15  ;;  %v6348_v15 = vld [vmem:[%s7057_s3 + $0x178] sm:$0xff] }
 0x586   :  { %2464 = vmatpush.msrb.mxu3 %v7411_v54  ;;  %2560 = vmatpush.msrb.mxu0 %v7416_v8  ;;  %v6357_v8 = vld [vmem:[%s7057_s3 + $0xc0] sm:$0xff] }
 0x587   :  { %3553 = vmatmul.msk.f32.vlgmr.msra.gmra.mxu3 %vm262_vm0, %v6116_v30  ;;  %2190 = vmatpush.msrb.mxu1 %v6174_v55 }
 0x588   :  { %2465 = vmatpush.msrb.mxu3 %v7414_v17  ;;  %2634 = vmatpush.msrb.mxu2 %v7417_v52  ;;  %v6338_v17 = vld [vmem:[%s7057_s3 + $0xe0] sm:$0xff]  ;;  %v6367_v52 = vld [vmem:[%s7057_s3 + $0x158] sm:$0xff] }
 0x589   :  { %2191 = vmatpush.msrb.mxu1 %v2164_v19  ;;  %2561 = vmatpush.msrb.mxu0 %v7418_v43 }
 0x58a   :  { %2635 = vmatpush.msrb.mxu2 %v7419_v50  ;;  %2732 = vmatpush.msra.mxu3 %v6222_v59  ;;  %v6380_v50 = vld [vmem:[%s7057_s3 + $0x128] sm:$0xff] }
 0x58b   :  { %2192 = vmatpush.msrb.mxu1 %v2163_v22  ;;  %2562 = vmatpush.msrb.mxu0 %v7420_v2  ;;  %v6385_v2 = vld [vmem:[%s7057_s3 + $0x138] sm:$0xff] }
 0x58c   :  { %2636 = vmatpush.msrb.mxu2 %v7421_v63  ;;  %2733 = vmatpush.msra.mxu3 %v6227_v6 }
 0x58d   :  { %2193 = vmatpush.msrb.mxu1 %v2162_v7  ;;  %2563 = vmatpush.msrb.mxu0 %v6033_v9  ;;  %v7430_v9 = vld [vmem:[#allocation49_spill] sm:$0xff] }
 0x58e   :  { %2637 = vmatpush.msrb.mxu2 %v6035_v16  ;;  %v7431_v16 = vld [vmem:[#allocation50_spill] sm:$0xff]  ;;  %2734 = vmatpush.msra.mxu3 %v6235_v21 }
 0x58f   :  { %3554 = vmatmul.msk.f32.vlgmr.msrb.gmra.mxu3 %vm262_vm0, %v6116_v30  ;;  %2347 = vmatpush.msra.mxu1 %v7422_v60  ;;  %v6264_v30 = vld [vmem:[%s7057_s3 + $0x160] sm:$0xff] }
 0x590   :  { %2564 = vmatpush.msrb.mxu0 %v6039_v27  ;;  %2638 = vmatpush.msrb.mxu2 %v6041_v3  ;;  %v7433_v27 = vld [vmem:[#allocation40_spill] sm:$0xff]  ;;  %v7434_v3 = vld [vmem:[#allocation41_spill] sm:$0xff] }
 0x591   :  { %2348 = vmatpush.msra.mxu1 %v7423_v32  ;;  %v6395_v60 = vld [vmem:[%s7057_s3 + $0x80] sm:$0xff]  ;;  %v6400_v32 = vld [vmem:[%s7057_s3 + $0x108] sm:$0xff] }
 0x593   :  { %2349 = vmatpush.msra.mxu1 %v7424_v5  ;;  %v6405_v5 = vld [vmem:[%s7057_s3 + $0x118] sm:$0xff] }
 0x595   :  { %2350 = vmatpush.msra.mxu1 %v7425_v26 }
 0x597   :  { %2351 = vmatpush.msra.mxu1 %v7426_v36  ;;  %v6415_v36 = vld [vmem:[%s7057_s3 + $0x60] sm:$0xff] }
 0x599   :  { %2352 = vmatpush.msra.mxu1 %v7427_v57  ;;  %v6420_v57 = vld [vmem:[%s7057_s3 + $0xe8] sm:$0xff] }
 0x59b   :  { %2353 = vmatpush.msra.mxu1 %v7428_v12  ;;  %v6425_v12 = vld [vmem:[%s7057_s3 + $0xf8] sm:$0xff] }
 0x59d   :  { %2354 = vmatpush.msra.mxu1 %v7429_v58 }
 0x59f   :  { %2355 = vmatpush.msra.mxu1 %v7430_v9  ;;  %v6436_v9 = vld [vmem:[%s7057_s3 + $0x40] sm:$0xff] }
 0x5a1   :  { %2356 = vmatpush.msra.mxu1 %v7431_v16  ;;  %v6441_v16 = vld [vmem:[%s7057_s3 + $0xc8] sm:$0xff] }
 0x5a3   :  { %2357 = vmatpush.msra.mxu1 %v7432_v25  ;;  %v6446_v25 = vld [vmem:[%s7057_s3 + $0xd8] sm:$0xff] }
 0x5a5   :  { %2358 = vmatpush.msra.mxu1 %v7433_v27  ;;  %v6454_v27 = vld [vmem:[%s7057_s3 + $0x20] sm:$0xff] }
 0x5a7   :  { %2359 = vmatpush.msra.mxu1 %v7434_v3  ;;  %v6459_v3 = vld [vmem:[%s7057_s3 + $0xa8] sm:$0xff] }
 0x5a9   :  { %2360 = vmatpush.msra.mxu1 %v7435_v56  ;;  %v6464_v56 = vld [vmem:[%s7057_s3 + $0xb8] sm:$0xff] }
 0x5aa   :  { %7438 = vst [vmem:[#allocation28_spill] sm:$0xff] %v6464_v56 }
 0x5ab   :  { %2361 = vmatpush.msra.mxu1 %v7436_v42 }
 0x5ad   :  { %2362 = vmatpush.msra.mxu1 %v7437_v34  ;;  %v6473_v34 = vld [vmem:[%s7057_s3] sm:$0xff] }
 0x5eb   :  { %v2141_v18 = vpop.f32.mrf.mxu0 }
 0x5ec   :  { %v2142_v33 = vadd.f32 %v3590_v28, %v2141_v18  ;;  %v6478_v28 = vld [vmem:[%s7057_s3 + $0x88] sm:$0xff]  ;;  %v6483_v18 = vld [vmem:[%s7057_s3 + $0x98] sm:$0xff] }
 0x5ed   :  { %7439 = vst [vmem:[#allocation29_spill] sm:$0xff] %v6478_v28 }
 0x5ee   :  { %3656 = vtanh.f32 %v2142_v33  ;;  %7440 = vst [vmem:[#allocation30_spill] sm:$0xff] %v6483_v18 }
 0x5f2   :  { %v2324_v61 = vpop.f32.mrf.mxu3 }
 0x5f3   :  { %v2344_v45 = vpop.f32.mrf.mxu0 }
 0x5f4   :  { %v3657_v24 = vpop.eup %3656 }
 0x5f5   :  { %v2145_v11 = vmul.f32 %v3657_v24, %v6093_v4  ;;  %v2215_v24 = vpop.f32.mrf.mxu2 }
 0x5f7   :  { %2194 = vmatmul.f32.vlgmr.msrb.gmra.mxu1 %v2145_v11 }
 0x5f8   :  { %2603 = vmatpush.msrb.mxu1 %v6098_v39  ;;  %v2473_v39 = vperm.slane %v6251_v38, 1 }
 0x5fa   :  { %2604 = vmatpush.msrb.mxu1 %v6100_v31  ;;  %v2407_v13 = vpop.f32.mrf.mxu3 }
 0x5fb   :  { %v2408_v20 = vadd.f32 %v2407_v13, %v2324_v61  ;;  %v6494_v61 = vld [vmem:[%s7057_s3 + $0x68] sm:$0xff]  ;;  %v6499_v13 = vld [vmem:[%s7057_s3 + $0x78] sm:$0xff] }
 0x5fc   :  { %2605 = vmatpush.msrb.mxu1 %v6105_v53  ;;  %v6258_v53 = vld [vmem:[%s7057_s3 + $0x180] sm:$0xff]  ;;  %7441 = vst [vmem:[#allocation33_spill] sm:$0xff] %v6494_v61 }
 0x5fd   :  { %v2480_v46 = vadd.f32 %v2472_v44, %v2408_v20  ;;  %2735 = vmatpush.msra.mxu3 %v6258_v53  ;;  %7442 = vst [vmem:[#allocation34_spill] sm:$0xff] %v6499_v13  ;;  %v6501_v20 = vld [vmem:[#allocation2 + $0x60] sm:$0xff]  ;;  %v6508_v44 = vld [vmem:[%s7057_s3 + $0x48] sm:$0xff] }
 0x5fe   :  { %2606 = vmatpush.msrb.mxu1 %v6120_v47  ;;  %v6269_v47 = vld [vmem:[%s7057_s3 + $0x1e8] sm:$0xff]  ;;  %7443 = vst [vmem:[#allocation31_spill] sm:$0xff] %v6508_v44 }
 0x5ff   :  { %2363 = vmatmul.f32.vlgmr.msra.gmra.mxu1 %v6093_v4  ;;  %v3555_v1 = vmul.f32 -1.442695, %v2480_v46  ;;  %2736 = vmatpush.msra.mxu3 %v6264_v30  ;;  %v6513_v46 = vld [vmem:[%s7057_s3 + $0x58] sm:$0xff] }
 0x600   :  { %2607 = vmatpush.msrb.mxu1 %v6126_v41  ;;  %v6274_v41 = vld [vmem:[%s7057_s3 + $0x1f8] sm:$0xff]  ;;  %2752 = vmatpush.msra.mxu0 %v6269_v47  ;;  %7444 = vst [vmem:[#allocation35_spill] sm:$0xff] %v6513_v46 }
 0x601   :  { %3658 = vpow2.f32 %v3555_v1  ;;  %2792 = vmatpush.msra.mxu2 %v6274_v41  ;;  %v6522_v1 = vld [vmem:[%s7057_s3 + $0x28] sm:$0xff] }
 0x602   :  { %2608 = vmatpush.msrb.mxu1 %v6132_v37  ;;  %v2427_v40 = vpop.f32.mrf.mxu3  ;;  %7445 = vst [vmem:[#allocation36_spill] sm:$0xff] %v6522_v1 }
 0x603   :  { %v2428_v49 = vadd.f32 %v2427_v40, %v2344_v45  ;;  %v6515_v40 = vld [vmem:[#allocation2 + $0x40] sm:$0xff] }
 0x604   :  { %2609 = vmatpush.msrb.mxu1 %v6137_v48 }
 0x605   :  { %v2481_v31 = vadd.f32 %v2473_v39, %v2428_v49  ;;  %v6524_v49 = vld [vmem:[#allocation2 + $0x20] sm:$0xff] }
 0x606   :  { %2610 = vmatpush.msrb.mxu1 %v6143_v62  ;;  %v6282_v62 = vld [vmem:[%s7057_s3 + $0x140] sm:$0xff] }
 0x607   :  { %v3556_v37 = vmul.f32 -1.442695, %v2481_v31  ;;  %v3659_v48 = vpop.eup %3658  ;;  %2737 = vmatpush.msra.mxu3 %v6282_v62  ;;  %v6533_v31 = vld [vmem:[%s7057_s3 + $0x38] sm:$0xff] }
 0x608   :  { %2611 = vmatpush.msrb.mxu1 %v6149_v10  ;;  %v6287_v10 = vld [vmem:[%s7057_s3 + $0x1c8] sm:$0xff]  ;;  %v6312_v54 = vadd.f32 1.0, %v3659_v48  ;;  %7446 = vst [vmem:[#allocation32_spill] sm:$0xff] %v6533_v31 }
 0x609   :  { %2753 = vmatpush.msra.mxu0 %v6287_v10  ;;  %3660 = vpow2.f32 %v3556_v37  ;;  %v3591_v37 = vld [vmem:[%s7063_s9] ss:$0 sm:$0xff]  ;;  %v6542_v48 = vld [vmem:[%s7057_s3 + $0x8] sm:$0xff] }
 0x60a   :  { %2612 = vmatpush.msrb.mxu1 %v6157_v51  ;;  %v6292_v51 = vld [vmem:[%s7057_s3 + $0x1d8] sm:$0xff]  ;;  %3662 = vrcp.f32 %v6312_v54  ;;  %v6466_v42 = vpop.f32.mrf.mxu3  ;;  %7447 = vst [vmem:[#allocation37_spill] sm:$0xff] %v6542_v48  ;;  %vm2493_vm12 = vweird.f32 %v6312_v54 }
 0x60b   :  { %2793 = vmatpush.msra.mxu2 %v6292_v51 }
 0x60c   :  { %2613 = vmatpush.msrb.mxu1 %v6162_v23  ;;  %v6299_v23 = vld [vmem:[%s7057_s3 + $0x120] sm:$0xff] }
 0x60d   :  { %2738 = vmatpush.msra.mxu3 %v6299_v23  ;;  %2794 = vmatpush.msra.mxu2 %v6309_v35 }
 0x60e   :  { %2614 = vmatpush.msrb.mxu1 %v6168_v29  ;;  %v6304_v29 = vld [vmem:[%s7057_s3 + $0x1a8] sm:$0xff] }
 0x60f   :  { %2754 = vmatpush.msra.mxu0 %v6304_v29  ;;  %2795 = vmatpush.msra.mxu2 %v6330_v14  ;;  %v3661_v43 = vpop.eup %3660 }
 0x610   :  { %2615 = vmatpush.msrb.mxu1 %v6174_v55  ;;  %v6320_v55 = vld [vmem:[%s7057_s3 + $0x100] sm:$0xff]  ;;  %v6389_v63 = vadd.f32 1.0, %v3661_v43  ;;  %v6407_v26 = vpop.eup %3662 }
 0x611   :  { %2739 = vmatpush.msra.mxu3 %v6320_v55  ;;  %2755 = vmatpush.msra.mxu0 %v6325_v0  ;;  %v2489_v58 = vmul.f32 %v6407_v26, %v6312_v54  ;;  %v6544_v43 = vld [vmem:[#allocation2] sm:$0xff]  ;;  %vm2494_vm11 = vweird.f32 %v6407_v26 }
 0x612   :  { %2616 = vmatpush.msrb.mxu1 %v2164_v19  ;;  %v6343_v19 = vld [vmem:[%s7057_s3 + $0x168] sm:$0xff]  ;;  %2796 = vmatpush.msra.mxu2 %v6348_v15  ;;  %3664 = vrcp.f32 %v6389_v63  ;;  %vm2495_vm13 = vmor %vm2493_vm12, %vm2494_vm11  ;;  %vm2512_vm1 = vweird.f32 %v6389_v63 }
 0x613   :  { %2740 = vmatpush.msra.mxu3 %v6338_v17  ;;  %2756 = vmatpush.msra.mxu0 %v6343_v19  ;;  %v2490_v33 = vsub.f32 1.0, %v2489_v58 }
 0x614   :  { %2617 = vmatpush.msrb.mxu1 %v2163_v22  ;;  %v6362_v22 = vld [vmem:[%s7057_s3 + $0x148] sm:$0xff]  ;;  %2797 = vmatpush.msra.mxu2 %v6367_v52 }
 0x615   :  { %2741 = vmatpush.msra.mxu3 %v6357_v8  ;;  %2757 = vmatpush.msra.mxu0 %v6362_v22  ;;  %v2491_v45 = vmul.f32 %v6407_v26, %v2490_v33  ;;  %v6551_v33 = vld [vmem:[%s7057_s3 + $0x18] sm:$0xff] }
 0x616   :  { %2618 = vmatpush.msrb.mxu1 %v2162_v7  ;;  %v6375_v7 = vld [vmem:[%s7057_s3 + $0xa0] sm:$0xff]  ;;  %2798 = vmatpush.msra.mxu2 %v6385_v2  ;;  %7448 = vst [vmem:[#allocation38_spill] sm:$0xff] %v6551_v33 }
 0x617   :  { %2742 = vmatpush.msra.mxu3 %v6375_v7  ;;  %2758 = vmatpush.msra.mxu0 %v6380_v50 }
 0x618   :  { %2799 = vmatpush.msra.mxu2 %v6405_v5  ;;  %v6488_v11 = vpop.eup %3664 }
 0x619   :  { %2743 = vmatpush.msra.mxu3 %v6395_v60  ;;  %2759 = vmatpush.msra.mxu0 %v6400_v32  ;;  %v2508_v39 = vmul.f32 %v6488_v11, %v6389_v63  ;;  %vm2513_vm15 = vweird.f32 %v6488_v11 }
 0x61a   :  { %2800 = vmatpush.msra.mxu2 %v6425_v12  ;;  %vm2514_vm2 = vmor %vm2512_vm1, %vm2513_vm15 }
 0x61b   :  { %2744 = vmatpush.msra.mxu3 %v6415_v36  ;;  %2760 = vmatpush.msra.mxu0 %v6420_v57 }
 0x61c   :  { %2801 = vmatpush.msra.mxu2 %v6446_v25 }
 0x61d   :  { %2745 = vmatpush.msra.mxu3 %v6436_v9  ;;  %2761 = vmatpush.msra.mxu0 %v6441_v16 }
 0x61e   :  { %2802 = vmatpush.msra.mxu2 %v6464_v56 }
 0x61f   :  { %2746 = vmatpush.msra.mxu3 %v6454_v27  ;;  %2762 = vmatpush.msra.mxu0 %v6459_v3 }
 0x620   :  { %2803 = vmatpush.msra.mxu2 %v6483_v18  ;;  %v2499_v18 = vand.u32 2147483648, %v6312_v54 }
 0x621   :  { %2747 = vmatpush.msra.mxu3 %v6473_v34  ;;  %2763 = vmatpush.msra.mxu0 %v6478_v28 }
 0x622   :  { %2804 = vmatpush.msra.mxu2 %v6499_v13  ;;  %v2509_v13 = vsub.f32 1.0, %v2508_v39 }
 0x623   :  { %2764 = vmatpush.msra.mxu0 %v6494_v61  ;;  %2827 = vmatpush.msrb.mxu3 %v6501_v20  ;;  %v2467_v61 = vpop.f32.mrf.mxu3 }
 0x624   :  { %2805 = vmatpush.msra.mxu2 %v6513_v46 }
 0x625   :  { %2765 = vmatpush.msra.mxu0 %v6508_v44  ;;  %2828 = vmatpush.msrb.mxu3 %v6515_v40  ;;  %v2492_v44 = vadd.f32 %v6407_v26, %v2491_v45  ;;  %v2384_v45 = vpop.f32.mrf.mxu2 }
 0x626   :  { %2806 = vmatpush.msra.mxu2 %v6533_v31  ;;  %v2500_v31 = vor.u32 1.1754944e-38, %v2499_v18 }
 0x627   :  { %2766 = vmatpush.msra.mxu0 %v6522_v1  ;;  %2829 = vmatpush.msrb.mxu3 %v6524_v49  ;;  %v2497_v1 = vand.u32 2147483647, %v6312_v54  ;;  %v2496_v39 = vsel %vm2495_vm13, %v6407_v26, %v2492_v44  ;;  %v2474_v54 = vperm.slane %v6251_v38, 2  ;;  %v2518_v26 = vand.u32 2147483648, %v6389_v63 }
 0x628   :  { %2807 = vmatpush.msra.mxu2 %v6551_v33 }
 0x629   :  { %2767 = vmatpush.msra.mxu0 %v6542_v48  ;;  %2830 = vmatpush.msrb.mxu3 %v6544_v43  ;;  %v2510_v48 = vmul.f32 %v6488_v11, %v2509_v13  ;;  %vm2498_vm14 = vcmp.eq.f32.partialorder %v2497_v1, 8.507059e+37  ;;  %v2519_v13 = vor.u32 1.1754944e-38, %v2518_v26  ;;  %v6626_v26 = vld [vmem:[%s7057_s3 + $0x170] sm:$0xff] }
 0x62a   :  { %7453 = vst [vmem:[#allocation46_spill] sm:$0xff] %v6626_v26 }
 0x674   :  { %v2195_v58 = vpop.f32.mrf.mxu1 }
 0x675   :  { %v2216_v46 = vadd.f32 %v2215_v24, %v2195_v58  ;;  %v2468_v24 = vadd.f32 %v2467_v61, %v2384_v45  ;;  %v2475_v58 = vperm.slane %v6251_v38, 3  ;;  %v2511_v61 = vadd.f32 %v6488_v11, %v2510_v48 }
 0x677   :  { %v2222_v28 = vadd.f32 %v3591_v37, %v2216_v46  ;;  %v2501_v46 = vsel %vm2498_vm14, %v2500_v31, %v2496_v39  ;;  %v2483_v33 = vadd.f32 %v2475_v58, %v2468_v24  ;;  %v2515_v38 = vsel %vm2514_vm2, %v6488_v11, %v2511_v61  ;;  %v6589_v11 = vld [vmem:[%s7057_s3 + $0x1f0] sm:$0xff] }
 0x678   :  { %7449 = vst [vmem:[#allocation14_spill] sm:$0xff] %v6589_v11  ;;  %2772 = vmatpush.msra.mxu1 %v6589_v11  ;;  %v6603_v39 = vld [vmem:[%s7057_s3 + $0x1b0] sm:$0xff] }
 0x679   :  { %3549 = vst [vmem:[%s7064_s10 + $0x20] sm:$0xff] %v2222_v28  ;;  %v2522_v44 = vmul.f32 %v2501_v46, %v2483_v33  ;;  %v2516_v28 = vand.u32 2147483647, %v6389_v63  ;;  %v6584_v63 = vld [vmem:[#allocation2 + $0x48] sm:$0xff]  ;;  %v6615_v46 = vld [vmem:[%s7057_s3 + $0x190] sm:$0xff] }
 0x67a   :  { %v6598_v33 = vld [vmem:[#allocation2 + $0x28] sm:$0xff]  ;;  %7451 = vst [vmem:[#allocation15_spill] sm:$0xff] %v6603_v39  ;;  %v6621_v61 = vld [vmem:[#allocation2 + $0x70] sm:$0xff] }
 0x67b   :  { %vm2517_vm3 = vcmp.eq.f32.partialorder %v2516_v28, 8.507059e+37  ;;  %7452 = vst [vmem:[#allocation16_spill] sm:$0xff] %v6615_v46  ;;  %v6640_v28 = vld [vmem:[#allocation2 + $0x30] sm:$0xff] }
 0x67c   :  { %v2364_v37 = vpop.f32.mrf.mxu1 }
 0x67d   :  { %v2448_v56 = vadd.f32 %v6466_v42, %v2364_v37  ;;  %v2520_v42 = vsel %vm2517_vm3, %v2519_v13, %v2515_v38  ;;  %v6617_v37 = vld [vmem:[#allocation2 + $0x8] sm:$0xff]  ;;  %v6647_v38 = vld [vmem:[#allocation2 + $0x78] sm:$0xff] }
 0x67e   :  { %v2525_v1 = vsub.f32 1.0, %v2520_v42  ;;  %v2527_v48 = vmul.f32 %v2520_v42, %v6093_v4  ;;  %v6594_v4 = vld [vmem:[%s7057_s3 + $0x1d0] sm:$0xff]  ;;  %v6651_v13 = vld [vmem:[#allocation2 + $0x58] sm:$0xff] }
 0x67f   :  { %v2482_v45 = vadd.f32 %v2474_v54, %v2448_v56  ;;  %v6579_v56 = vld [vmem:[#allocation2 + $0x68] sm:$0xff]  ;;  %7450 = vst [vmem:[#allocation45_spill] sm:$0xff] %v6594_v4  ;;  %2773 = vmatpush.msra.mxu1 %v6594_v4  ;;  %v3558_v54 = vld [vmem:[%s7054_s0 + $0x30] sm:$0xff]  ;;  %v6654_v42 = vld [vmem:[#allocation2 + $0x38] sm:$0xff] }
 0x680   :  { %7455 = vst [vmem:[#allocation18_spill] sm:$0xff] %v6654_v42 }
 0x681   :  { %v2523_v18 = vadd.f32 %v2522_v44, %v2482_v45  ;;  %2774 = vmatpush.msra.mxu1 %v6603_v39  ;;  %v6631_v44 = vld [vmem:[#allocation2 + $0x50] sm:$0xff] }
 0x682   :  { %v6636_v45 = vld [vmem:[%s7057_s3 + $0x150] sm:$0xff] }
 0x683   :  { %3666 = vtanh.f32 %v2523_v18  ;;  %2775 = vmatpush.msra.mxu1 %v6615_v46  ;;  %7454 = vst [vmem:[#allocation17_spill] sm:$0xff] %v6636_v45  ;;  %v6645_v18 = vld [vmem:[#allocation2 + $0x10] sm:$0xff] }
 0x684   :  { %v6824_v46 = vld [vmem:[#allocation4 + $0x10] sm:$0xff] }
 0x685   :  { %2776 = vmatpush.msra.mxu1 %v6626_v26  ;;  %v6820_v26 = vld [vmem:[#allocation6 + $0x18] sm:$0xff]  ;;  %7475 = vst [vmem:[#allocation42_spill] sm:$0xff] %v6824_v46  ;;  %v6826_v39 = vld [vmem:[#allocation6 + $0x10] sm:$0xff] }
 0x686   :  { %7474 = vst [vmem:[#allocation12_spill] sm:$0xff] %v6820_v26 }
 0x687   :  { %2777 = vmatpush.msra.mxu1 %v6636_v45  ;;  %v6818_v45 = vld [vmem:[#allocation4 + $0x18] sm:$0xff]  ;;  %7476 = vst [vmem:[#allocation13_spill] sm:$0xff] %v6826_v39 }
 0x688   :  { %7473 = vst [vmem:[#allocation41_spill] sm:$0xff] %v6818_v45 }
 0x689   :  { %v3667_v31 = vpop.eup %3666 }
 0x68a   :  { %v2526_v24 = vmul.f32 %v3667_v31, %v2525_v1  ;;  %v6658_v1 = vld [vmem:[#allocation2 + $0x18] sm:$0xff]  ;;  %v6760_v31 = vld [vmem:[#allocation6 + $0x68] sm:$0xff] }
 0x68b   :  { %7456 = vst [vmem:[#allocation19_spill] sm:$0xff] %v6658_v1 }
 0x68c   :  { %v6577_v58 = vadd.f32 %v2527_v48, %v2526_v24  ;;  %v6764_v24 = vld [vmem:[#allocation4 + $0x60] sm:$0xff] }
 0x68d   :  { %v6766_v48 = vld [vmem:[#allocation6 + $0x60] sm:$0xff] }
 0x68e   :  { %2565 = vmatmul.f32.vlgmr.msrb.gmra.mxu0 %v6577_v58  ;;  %2639 = vmatmul.f32.vlgmr.msrb.gmra.mxu2 %v6577_v58 }
 0x68f   :  { %2748 = vmatmul.f32.vlgmr.msra.gmra.mxu3 %v6577_v58 }
 0x690   :  { %2847 = vmatpush.msra.mxu3 %v6579_v56 }
 0x692   :  { %2848 = vmatpush.msra.mxu3 %v6584_v63 }
 0x694   :  { %2849 = vmatpush.msra.mxu3 %v6598_v33 }
 0x696   :  { %2768 = vmatmul.f32.vlgmr.msra.gmra.mxu0 %v6577_v58  ;;  %2808 = vmatmul.f32.vlgmr.msra.gmra.mxu2 %v6577_v58 }
 0x697   :  { %3559 = vmatmul.msk.f32.vlgmr.msrb.gmra.mxu3 %vm262_vm0, %v3558_v54 }
 0x698   :  { %2850 = vmatpush.msra.mxu3 %v6617_v37 }
 0x69a   :  { %2867 = vmatpush.msrb.mxu3 %v6621_v61 }
 0x69c   :  { %2868 = vmatpush.msrb.mxu3 %v6631_v44 }
 0x69e   :  { %2869 = vmatpush.msrb.mxu3 %v6640_v28 }
 0x69f   :  { %3560 = vmatmul.msk.f32.vlgmr.msra.gmra.mxu3 %vm262_vm0, %v3558_v54 }
 0x6a0   :  { %2870 = vmatpush.msrb.mxu3 %v6645_v18 }
 0x6a2   :  { %2887 = vmatpush.msra.mxu3 %v6647_v38 }
 0x6a4   :  { %2888 = vmatpush.msra.mxu3 %v6651_v13 }
 0x6a6   :  { %2889 = vmatpush.msra.mxu3 %v6654_v42 }
 0x6a7   :  { %3561 = vmatmul.msk.f32.vlgmr.msrb.gmra.mxu3 %vm262_vm0, %v3558_v54 }
 0x6a8   :  { %2890 = vmatpush.msra.mxu3 %v6658_v1 }
 0x6aa   :  { %3157 = vmatpush.msrb.mxu3 %v6222_v59  ;;  %v6686_v59 = vld [vmem:[%s7057_s3 + $0x130] sm:$0xff] }
 0x6ab   :  { %7457 = vst [vmem:[#allocation20_spill] sm:$0xff] %v6686_v59  ;;  %2778 = vmatpush.msra.mxu1 %v6686_v59  ;;  %v6814_v59 = vld [vmem:[#allocation6 + $0x20] sm:$0xff] }
 0x6ac   :  { %3158 = vmatpush.msrb.mxu3 %v6227_v6  ;;  %v6692_v6 = vld [vmem:[%s7057_s3 + $0x110] sm:$0xff]  ;;  %7472 = vst [vmem:[#allocation40_spill] sm:$0xff] %v6814_v59 }
 0x6ad   :  { %7458 = vst [vmem:[#allocation21_spill] sm:$0xff] %v6692_v6  ;;  %2779 = vmatpush.msra.mxu1 %v6692_v6  ;;  %v6812_v6 = vld [vmem:[#allocation4 + $0x20] sm:$0xff] }
 0x6ae   :  { %3159 = vmatpush.msrb.mxu3 %v6235_v21  ;;  %v6697_v21 = vld [vmem:[%s7057_s3 + $0xf0] sm:$0xff]  ;;  %7471 = vst [vmem:[#allocation39_spill] sm:$0xff] %v6812_v6 }
 0x6af   :  { %3562 = vmatmul.msk.f32.vlgmr.msra.gmra.mxu3 %vm262_vm0, %v3558_v54  ;;  %7459 = vst [vmem:[#allocation22_spill] sm:$0xff] %v6697_v21  ;;  %2780 = vmatpush.msra.mxu1 %v6697_v21  ;;  %v6770_v54 = vld [vmem:[#allocation4 + $0x58] sm:$0xff]  ;;  %v6808_v21 = vld [vmem:[#allocation6 + $0x28] sm:$0xff] }
 0x6b0   :  { %3160 = vmatpush.msrb.mxu3 %v6258_v53  ;;  %v6704_v53 = vld [vmem:[%s7057_s3 + $0xd0] sm:$0xff]  ;;  %7470 = vst [vmem:[#allocation50_spill] sm:$0xff] %v6808_v21 }
 0x6b1   :  { %7460 = vst [vmem:[#allocation23_spill] sm:$0xff] %v6704_v53  ;;  %2781 = vmatpush.msra.mxu1 %v6704_v53  ;;  %v6806_v53 = vld [vmem:[#allocation4 + $0x28] sm:$0xff] }
 0x6b2   :  { %3161 = vmatpush.msrb.mxu3 %v6264_v30  ;;  %v6710_v30 = vld [vmem:[%s7057_s3 + $0xb0] sm:$0xff]  ;;  %7469 = vst [vmem:[#allocation49_spill] sm:$0xff] %v6806_v53 }
 0x6b3   :  { %7461 = vst [vmem:[#allocation24_spill] sm:$0xff] %v6710_v30  ;;  %2782 = vmatpush.msra.mxu1 %v6710_v30  ;;  %v6802_v30 = vld [vmem:[#allocation6 + $0x30] sm:$0xff] }
 0x6b4   :  { %3162 = vmatpush.msrb.mxu3 %v6282_v62  ;;  %v6715_v62 = vld [vmem:[%s7057_s3 + $0x90] sm:$0xff]  ;;  %7468 = vst [vmem:[#allocation48_spill] sm:$0xff] %v6802_v30 }
 0x6b5   :  { %7462 = vst [vmem:[#allocation43_spill] sm:$0xff] %v6715_v62  ;;  %2783 = vmatpush.msra.mxu1 %v6715_v62  ;;  %v6800_v62 = vld [vmem:[#allocation4 + $0x30] sm:$0xff] }
 0x6b6   :  { %3163 = vmatpush.msrb.mxu3 %v6299_v23  ;;  %v6722_v23 = vld [vmem:[%s7057_s3 + $0x70] sm:$0xff]  ;;  %7467 = vst [vmem:[#allocation47_spill] sm:$0xff] %v6800_v62 }
 0x6b7   :  { %7463 = vst [vmem:[#allocation25_spill] sm:$0xff] %v6722_v23  ;;  %2784 = vmatpush.msra.mxu1 %v6722_v23  ;;  %v6796_v23 = vld [vmem:[#allocation6 + $0x38] sm:$0xff] }
 0x6b8   :  { %3164 = vmatpush.msrb.mxu3 %v6320_v55  ;;  %v6728_v55 = vld [vmem:[%s7057_s3 + $0x50] sm:$0xff] }
 0x6b9   :  { %7464 = vst [vmem:[#allocation26_spill] sm:$0xff] %v6728_v55  ;;  %2785 = vmatpush.msra.mxu1 %v6728_v55  ;;  %v6794_v55 = vld [vmem:[#allocation4 + $0x38] sm:$0xff] }
 0x6ba   :  { %3165 = vmatpush.msrb.mxu3 %v6338_v17  ;;  %v6734_v17 = vld [vmem:[%s7057_s3 + $0x30] sm:$0xff] }
 0x6bb   :  { %7465 = vst [vmem:[#allocation44_spill] sm:$0xff] %v6734_v17  ;;  %2786 = vmatpush.msra.mxu1 %v6734_v17  ;;  %v6790_v17 = vld [vmem:[#allocation6 + $0x40] sm:$0xff] }
 0x6bc   :  { %3166 = vmatpush.msrb.mxu3 %v6357_v8  ;;  %v6740_v8 = vld [vmem:[%s7057_s3 + $0x10] sm:$0xff] }
 0x6bd   :  { %7466 = vst [vmem:[#allocation27_spill] sm:$0xff] %v6740_v8  ;;  %2787 = vmatpush.msra.mxu1 %v6740_v8  ;;  %v6788_v8 = vld [vmem:[#allocation4 + $0x40] sm:$0xff] }
 0x6be   :  { %3167 = vmatpush.msrb.mxu3 %v6375_v7  ;;  %v3592_v7 = vld [vmem:[%s7060_s6] ss:$0 sm:$0xff] }
 0x6c0   :  { %3168 = vmatpush.msrb.mxu3 %v6395_v60 }
 0x6c2   :  { %3169 = vmatpush.msrb.mxu3 %v6415_v36 }
 0x6c4   :  { %3170 = vmatpush.msrb.mxu3 %v6436_v9 }
 0x6c6   :  { %3171 = vmatpush.msrb.mxu3 %v6454_v27 }
 0x6c8   :  { %3172 = vmatpush.msrb.mxu3 %v6473_v34  ;;  %v6747_v34 = vld [vmem:[#allocation4 + $0x78] sm:$0xff] }
 0x6c9   :  { %2974 = vmatpush.msrb.mxu0 %v6747_v34 }
 0x6ca   :  { %3252 = vmatpush.msra.mxu3 %v6501_v20  ;;  %v6749_v20 = vld [vmem:[#allocation6 + $0x78] sm:$0xff] }
 0x6cb   :  { %3048 = vmatpush.msrb.mxu2 %v6749_v20 }
 0x6cc   :  { %3253 = vmatpush.msra.mxu3 %v6515_v40  ;;  %v6751_v40 = vld [vmem:[#allocation4 + $0x70] sm:$0xff] }
 0x6cd   :  { %2975 = vmatpush.msrb.mxu0 %v6751_v40 }
 0x6ce   :  { %3254 = vmatpush.msra.mxu3 %v6524_v49  ;;  %v6755_v49 = vld [vmem:[#allocation6 + $0x70] sm:$0xff] }
 0x6cf   :  { %3049 = vmatpush.msrb.mxu2 %v6755_v49 }
 0x6d0   :  { %3255 = vmatpush.msra.mxu3 %v6544_v43  ;;  %v6758_v43 = vld [vmem:[#allocation4 + $0x68] sm:$0xff] }
 0x6d1   :  { %2976 = vmatpush.msrb.mxu0 %v6758_v43  ;;  %3050 = vmatpush.msrb.mxu2 %v6760_v31 }
 0x6d3   :  { %2977 = vmatpush.msrb.mxu0 %v6764_v24  ;;  %3051 = vmatpush.msrb.mxu2 %v6766_v48 }
 0x6d5   :  { %2978 = vmatpush.msrb.mxu0 %v6770_v54 }
 0x70b   :  { %v2566_v60 = vpop.f32.mrf.mxu0 }
 0x70c   :  { %v2567_v36 = vadd.f32 %v3592_v7, %v2566_v60  ;;  %v6772_v7 = vld [vmem:[#allocation6 + $0x58] sm:$0xff]  ;;  %v6776_v60 = vld [vmem:[#allocation4 + $0x50] sm:$0xff] }
 0x70d   :  { %3052 = vmatpush.msrb.mxu2 %v6772_v7  ;;  %2979 = vmatpush.msrb.mxu0 %v6776_v60 }
 0x70e   :  { %3668 = vtanh.f32 %v2567_v36  ;;  %v6778_v36 = vld [vmem:[#allocation6 + $0x50] sm:$0xff] }
 0x70f   :  { %3053 = vmatpush.msrb.mxu2 %v6778_v36 }
 0x712   :  { %v2749_v4 = vpop.f32.mrf.mxu3 }
 0x714   :  { %v3669_v9 = vpop.eup %3668 }
 0x715   :  { %v2570_v27 = vmul.f32 %v3669_v9, %v6577_v58  ;;  %v6782_v9 = vld [vmem:[#allocation4 + $0x48] sm:$0xff] }
 0x716   :  { %2980 = vmatpush.msrb.mxu0 %v6782_v9 }
 0x717   :  { %2619 = vmatmul.f32.vlgmr.msrb.gmra.mxu1 %v2570_v27  ;;  %v6784_v27 = vld [vmem:[#allocation6 + $0x48] sm:$0xff] }
 0x718   :  { %3054 = vmatpush.msrb.mxu2 %v6784_v27  ;;  %2981 = vmatpush.msrb.mxu0 %v6788_v8 }
 0x71a   :  { %3055 = vmatpush.msrb.mxu2 %v6790_v17  ;;  %2982 = vmatpush.msrb.mxu0 %v6794_v55  ;;  %v2832_v11 = vpop.f32.mrf.mxu3 }
 0x71c   :  { %3056 = vmatpush.msrb.mxu2 %v6796_v23  ;;  %2983 = vmatpush.msrb.mxu0 %v6800_v62  ;;  %v6841_v62 = vld [vmem:[#allocation6 + $0x8] sm:$0xff] }
 0x71e   :  { %3057 = vmatpush.msrb.mxu2 %v6802_v30  ;;  %2984 = vmatpush.msrb.mxu0 %v6806_v53  ;;  %v2769_v30 = vpop.f32.mrf.mxu0 }
 0x71f   :  { %2788 = vmatmul.f32.vlgmr.msra.gmra.mxu1 %v6577_v58 }
 0x720   :  { %3058 = vmatpush.msrb.mxu2 %v6808_v21  ;;  %2985 = vmatpush.msrb.mxu0 %v6812_v6  ;;  %v6835_v6 = vld [vmem:[%s7058_s4] sm:$0xf] }
 0x721   :  { %v2897_v21 = vperm.slane %v6835_v6, 0 }
 0x722   :  { %3059 = vmatpush.msrb.mxu2 %v6814_v59  ;;  %2986 = vmatpush.msrb.mxu0 %v6818_v45  ;;  %v2833_v59 = vadd.f32 %v2832_v11, %v2749_v4  ;;  %v2852_v53 = vpop.f32.mrf.mxu3  ;;  %v6845_v11 = vld [vmem:[#allocation4] sm:$0xff] }
 0x723   :  { %v2853_v42 = vadd.f32 %v2852_v53, %v2769_v30  ;;  %v6847_v4 = vld [vmem:[#allocation6] sm:$0xff]  ;;  %v7486_v30 = vld [vmem:[#allocation37_spill] sm:$0xff] }
 0x724   :  { %3060 = vmatpush.msrb.mxu2 %v6820_v26  ;;  %2987 = vmatpush.msrb.mxu0 %v6824_v46  ;;  %v2905_v1 = vadd.f32 %v2897_v21, %v2833_v59  ;;  %v2898_v26 = vperm.slane %v6835_v6, 1 }
 0x726   :  { %3061 = vmatpush.msrb.mxu2 %v6826_v39  ;;  %v3563_v45 = vmul.f32 -1.442695, %v2905_v1  ;;  %v2906_v46 = vadd.f32 %v2898_v26, %v2853_v42  ;;  %v6839_v39 = vld [vmem:[#allocation4 + $0x8] sm:$0xff] }
 0x727   :  { %2988 = vmatpush.msrb.mxu0 %v6839_v39 }
 0x728   :  { %3670 = vpow2.f32 %v3563_v45  ;;  %3062 = vmatpush.msrb.mxu2 %v6841_v62  ;;  %v3564_v1 = vmul.f32 -1.442695, %v2906_v46 }
 0x729   :  { %2989 = vmatpush.msrb.mxu0 %v6845_v11 }
 0x72a   :  { %3063 = vmatpush.msrb.mxu2 %v6847_v4  ;;  %3672 = vpow2.f32 %v3564_v1  ;;  %v7487_v1 = vld [vmem:[#allocation38_spill] sm:$0xff] }
 0x72b   :  { %3177 = vmatpush.msra.mxu0 %v6269_v47 }
 0x72c   :  { %3217 = vmatpush.msra.mxu2 %v6274_v41 }
 0x72d   :  { %3178 = vmatpush.msra.mxu0 %v6287_v10 }
 0x72e   :  { %v3671_v26 = vpop.eup %3670  ;;  %3218 = vmatpush.msra.mxu2 %v6292_v51 }
 0x72f   :  { %v2912_v45 = vadd.f32 1.0, %v3671_v26  ;;  %3179 = vmatpush.msra.mxu0 %v6304_v29  ;;  %v2872_v29 = vpop.f32.mrf.mxu3 }
 0x730   :  { %3219 = vmatpush.msra.mxu2 %v6309_v35  ;;  %v3673_v47 = vpop.eup %3672  ;;  %v7477_v35 = vld [vmem:[#allocation28_spill] sm:$0xff] }
 0x731   :  { %3180 = vmatpush.msra.mxu0 %v6325_v0  ;;  %3674 = vrcp.f32 %v2912_v45  ;;  %v6865_v41 = vadd.f32 1.0, %v3673_v47  ;;  %v2924_v53 = vand.u32 2147483648, %v2912_v45  ;;  %vm2918_vm5 = vweird.f32 %v2912_v45 }
 0x732   :  { %3220 = vmatpush.msra.mxu2 %v6330_v14  ;;  %v2640_v14 = vpop.f32.mrf.mxu2  ;;  %v2922_v26 = vand.u32 2147483647, %v2912_v45 }
 0x733   :  { %3181 = vmatpush.msra.mxu0 %v6343_v19  ;;  %3676 = vrcp.f32 %v6865_v41  ;;  %v7478_v19 = vld [vmem:[#allocation29_spill] sm:$0xff]  ;;  %vm2937_vm9 = vweird.f32 %v6865_v41 }
 0x734   :  { %3221 = vmatpush.msra.mxu2 %v6348_v15  ;;  %v7479_v15 = vld [vmem:[#allocation30_spill] sm:$0xff]  ;;  %vm2923_vm7 = vcmp.eq.f32.partialorder %v2922_v26, 8.507059e+37 }
 0x735   :  { %3182 = vmatpush.msra.mxu0 %v6362_v22  ;;  %v7504_v26 = vld [vmem:[#allocation46_spill] sm:$0xff] }
 0x736   :  { %3222 = vmatpush.msra.mxu2 %v6367_v52  ;;  %v7480_v52 = vld [vmem:[#allocation33_spill] sm:$0xff] }
 0x737   :  { %3183 = vmatpush.msra.mxu0 %v6380_v50  ;;  %v3675_v10 = vpop.eup %3674  ;;  %v7481_v50 = vld [vmem:[#allocation34_spill] sm:$0xff]  ;;  %v2892_v21 = vpop.f32.mrf.mxu3 }
 0x738   :  { %3223 = vmatpush.msra.mxu2 %v6385_v2  ;;  %v2914_v51 = vmul.f32 %v3675_v10, %v2912_v45  ;;  %vm2919_vm4 = vweird.f32 %v3675_v10 }
 0x739   :  { %3184 = vmatpush.msra.mxu0 %v6400_v32  ;;  %v3677_v22 = vpop.eup %3676  ;;  %vm2920_vm6 = vmor %vm2918_vm5, %vm2919_vm4 }
 0x73a   :  { %3224 = vmatpush.msra.mxu2 %v6405_v5  ;;  %v2915_v0 = vsub.f32 1.0, %v2914_v51  ;;  %v2933_v32 = vmul.f32 %v3677_v22, %v6865_v41  ;;  %v7482_v5 = vld [vmem:[#allocation31_spill] sm:$0xff]  ;;  %v2809_v51 = vpop.f32.mrf.mxu2  ;;  %vm2938_vm8 = vweird.f32 %v3677_v22 }
 0x73b   :  { %3185 = vmatpush.msra.mxu0 %v6420_v57  ;;  %v7483_v57 = vld [vmem:[#allocation35_spill] sm:$0xff]  ;;  %vm2939_vm10 = vmor %vm2937_vm9, %vm2938_vm8 }
 0x73c   :  { %3225 = vmatpush.msra.mxu2 %v6425_v12  ;;  %v2916_v2 = vmul.f32 %v3675_v10, %v2915_v0  ;;  %v3593_v12 = vld [vmem:[%s7063_s9] ss:$0 sm:$0xff]  ;;  %v2934_v59 = vsub.f32 1.0, %v2933_v32  ;;  %v2900_v0 = vperm.slane %v6835_v6, 3 }
 0x73d   :  { %3186 = vmatpush.msra.mxu0 %v6441_v16 }
 0x73e   :  { %3226 = vmatpush.msra.mxu2 %v6446_v25  ;;  %v7484_v25 = vld [vmem:[#allocation36_spill] sm:$0xff]  ;;  %v2917_v46 = vadd.f32 %v3675_v10, %v2916_v2 }
 0x73f   :  { %3187 = vmatpush.msra.mxu0 %v6459_v3  ;;  %v7485_v3 = vld [vmem:[#allocation32_spill] sm:$0xff] }
 0x740   :  { %3227 = vmatpush.msra.mxu2 %v7477_v35  ;;  %v2893_v35 = vadd.f32 %v2892_v21, %v2809_v51  ;;  %v7506_v51 = vld [vmem:[#allocation20_spill] sm:$0xff] }
 0x741   :  { %3188 = vmatpush.msra.mxu0 %v7478_v19  ;;  %v2921_v19 = vsel %vm2920_vm6, %v3675_v10, %v2917_v46  ;;  %v2941_v10 = vand.u32 2147483647, %v6865_v41 }
 0x742   :  { %3228 = vmatpush.msra.mxu2 %v7479_v15  ;;  %v2925_v15 = vor.u32 1.1754944e-38, %v2924_v53  ;;  %v2908_v32 = vadd.f32 %v2900_v0, %v2893_v35  ;;  %v7507_v35 = vld [vmem:[#allocation21_spill] sm:$0xff]  ;;  %v7510_v0 = vld [vmem:[#allocation24_spill] sm:$0xff] }
 0x743   :  { %3189 = vmatpush.msra.mxu0 %v7480_v52  ;;  %v2899_v52 = vperm.slane %v6835_v6, 2  ;;  %vm2942_vm11 = vcmp.eq.f32.partialorder %v2941_v10, 8.507059e+37 }
 0x744   :  { %3229 = vmatpush.msra.mxu2 %v7481_v50  ;;  %v2926_v50 = vsel %vm2923_vm7, %v2925_v15, %v2921_v19  ;;  %v7513_v19 = vld [vmem:[#allocation26_spill] sm:$0xff]  ;;  %v7515_v15 = vld [vmem:[#allocation27_spill] sm:$0xff] }
 0x745   :  { %3190 = vmatpush.msra.mxu0 %v7482_v5 }
 0x746   :  { %3230 = vmatpush.msra.mxu2 %v7483_v57  ;;  %v2943_v57 = vand.u32 2147483648, %v6865_v41  ;;  %v6904_v41 = vld [vmem:[#allocation7 + $0x78] sm:$0xff] }
 0x747   :  { %3191 = vmatpush.msra.mxu0 %v7484_v25  ;;  %3028 = vmatpush.msrb.mxu1 %v6904_v41 }
 0x748   :  { %3231 = vmatpush.msra.mxu2 %v7485_v3  ;;  %v2944_v46 = vor.u32 1.1754944e-38, %v2943_v57 }
 0x749   :  { %3192 = vmatpush.msra.mxu0 %v7486_v30  ;;  %v6911_v30 = vld [vmem:[#allocation7 + $0x68] sm:$0xff] }
 0x74a   :  { %3232 = vmatpush.msra.mxu2 %v7487_v1  ;;  %v7503_v1 = vld [vmem:[#allocation16_spill] sm:$0xff] }
 0x794   :  { %v2620_v16 = vpop.f32.mrf.mxu1 }
 0x795   :  { %v2641_v42 = vadd.f32 %v2640_v14, %v2620_v16  ;;  %v2935_v14 = vmul.f32 %v3677_v22, %v2934_v59 }
 0x797   :  { %v2647_v47 = vadd.f32 %v3593_v12, %v2641_v42  ;;  %v2936_v5 = vadd.f32 %v3677_v22, %v2935_v14  ;;  %v2947_v12 = vmul.f32 %v2926_v50, %v2908_v32  ;;  %v7514_v14 = vld [vmem:[#allocation44_spill] sm:$0xff] }
 0x799   :  { %3557 = vst [vmem:[%s7064_s10 + $0x28] sm:$0xff] %v2647_v47  ;;  %v2940_v3 = vsel %vm2939_vm10, %v3677_v22, %v2936_v5  ;;  %v6906_v22 = vld [vmem:[#allocation7 + $0x70] sm:$0xff]  ;;  %v7505_v47 = vld [vmem:[#allocation17_spill] sm:$0xff] }
 0x79a   :  { %v2945_v6 = vsel %vm2942_vm11, %v2944_v46, %v2940_v3  ;;  %3029 = vmatpush.msrb.mxu1 %v6906_v22 }
 0x79b   :  { %v2950_v42 = vsub.f32 1.0, %v2945_v6  ;;  %v2952_v21 = vmul.f32 %v2945_v6, %v6577_v58  ;;  %v6922_v58 = vld [vmem:[%s7054_s0 + $0x38] sm:$0xff] }
 0x79c   :  { %v2789_v2 = vpop.f32.mrf.mxu1  ;;  %3030 = vmatpush.msrb.mxu1 %v6911_v30 }
 0x79d   :  { %v2873_v45 = vadd.f32 %v2872_v29, %v2789_v2 }
 0x79f   :  { %v2907_v16 = vadd.f32 %v2899_v52, %v2873_v45  ;;  %v3594_v52 = vld [vmem:[%s7060_s6] ss:$0 sm:$0xff] }
 0x7a1   :  { %v2948_v25 = vadd.f32 %v2947_v12, %v2907_v16  ;;  %v3320_v12 = vld [vmem:[%s7058_s4] sm:$0xf] }
 0x7a2   :  { %v3322_v10 = vperm.slane %v3320_v12, 0 }
 0x7a3   :  { %3678 = vtanh.f32 %v2948_v25 }
 0x7a9   :  { %v3679_v59 = vpop.eup %3678 }
 0x7aa   :  { %v2951_v29 = vmul.f32 %v3679_v59, %v2950_v42  ;;  %v3323_v59 = vperm.slane %v3320_v12, 1 }
 0x7ac   :  { %v6899_v53 = vadd.f32 %v2952_v21, %v2951_v29 }
 0x7ae   :  { %2990 = vmatmul.f32.vlgmr.msrb.gmra.mxu0 %v6899_v53  ;;  %3064 = vmatmul.f32.vlgmr.msrb.gmra.mxu2 %v6899_v53 }
 0x7af   :  { %3173 = vmatmul.f32.vlgmr.msrb.gmra.mxu3 %v6899_v53  ;;  %3399 = vmatpush.msrb.mxu0 %v6747_v34  ;;  %v6943_v34 = vld [vmem:[#allocation7 + $0x48] sm:$0xff] }
 0x7b0   :  { %3272 = vmatpush.msrb.mxu3 %v6579_v56  ;;  %3473 = vmatpush.msrb.mxu2 %v6749_v20  ;;  %v6926_v56 = vld [vmem:[#allocation7 + $0x60] sm:$0xff] }
 0x7b1   :  { %3400 = vmatpush.msrb.mxu0 %v6751_v40  ;;  %3031 = vmatpush.msrb.mxu1 %v6926_v56  ;;  %v6949_v20 = vld [vmem:[#allocation7 + $0x40] sm:$0xff] }
 0x7b2   :  { %3273 = vmatpush.msrb.mxu3 %v6584_v63  ;;  %3474 = vmatpush.msrb.mxu2 %v6755_v49  ;;  %v6932_v63 = vld [vmem:[#allocation7 + $0x58] sm:$0xff]  ;;  %v7490_v40 = vld [vmem:[#allocation48_spill] sm:$0xff] }
 0x7b3   :  { %3401 = vmatpush.msrb.mxu0 %v6758_v43  ;;  %3032 = vmatpush.msrb.mxu1 %v6932_v63  ;;  %v7494_v49 = vld [vmem:[#allocation39_spill] sm:$0xff]  ;;  %v3013_v43 = vld [vmem:[#allocation7 + $0x8] sm:$0xff] }
 0x7b4   :  { %3274 = vmatpush.msrb.mxu3 %v6598_v33  ;;  %3475 = vmatpush.msrb.mxu2 %v6760_v31  ;;  %v6938_v33 = vld [vmem:[#allocation7 + $0x50] sm:$0xff]  ;;  %v7495_v31 = vld [vmem:[#allocation40_spill] sm:$0xff] }
 0x7b5   :  { %3402 = vmatpush.msrb.mxu0 %v6764_v24  ;;  %3033 = vmatpush.msrb.mxu1 %v6938_v33  ;;  %v7496_v24 = vld [vmem:[#allocation41_spill] sm:$0xff] }
 0x7b6   :  { %3193 = vmatmul.f32.vlgmr.msra.gmra.mxu0 %v6899_v53  ;;  %3233 = vmatmul.f32.vlgmr.msra.gmra.mxu2 %v6899_v53 }
 0x7b7   :  { %3567 = vmatmul.msk.f32.vlgmr.msra.gmra.mxu3 %vm262_vm0, %v6922_v58  ;;  %3476 = vmatpush.msrb.mxu2 %v6766_v48  ;;  %v3012_v48 = vld [vmem:[#allocation7] sm:$0xff] }
 0x7b8   :  { %3275 = vmatpush.msrb.mxu3 %v6617_v37  ;;  %3403 = vmatpush.msrb.mxu0 %v6770_v54  ;;  %v6955_v37 = vld [vmem:[#allocation7 + $0x38] sm:$0xff]  ;;  %v7497_v54 = vld [vmem:[#allocation12_spill] sm:$0xff] }
 0x7b9   :  { %3477 = vmatpush.msrb.mxu2 %v6772_v7  ;;  %3034 = vmatpush.msrb.mxu1 %v6943_v34  ;;  %v7498_v7 = vld [vmem:[#allocation42_spill] sm:$0xff] }
 0x7ba   :  { %3292 = vmatpush.msra.mxu3 %v6621_v61  ;;  %3404 = vmatpush.msrb.mxu0 %v6776_v60  ;;  %v6963_v61 = vld [vmem:[#allocation7 + $0x30] sm:$0xff]  ;;  %v7499_v60 = vld [vmem:[#allocation13_spill] sm:$0xff] }
 0x7bb   :  { %3478 = vmatpush.msrb.mxu2 %v6778_v36  ;;  %3035 = vmatpush.msrb.mxu1 %v6949_v20  ;;  %v7500_v36 = vld [vmem:[#allocation14_spill] sm:$0xff] }
 0x7bc   :  { %3293 = vmatpush.msra.mxu3 %v6631_v44  ;;  %3405 = vmatpush.msrb.mxu0 %v6782_v9  ;;  %v6968_v44 = vld [vmem:[#allocation7 + $0x28] sm:$0xff] }
 0x7bd   :  { %3479 = vmatpush.msrb.mxu2 %v6784_v27  ;;  %3036 = vmatpush.msrb.mxu1 %v6955_v37  ;;  %v7501_v9 = vld [vmem:[#allocation45_spill] sm:$0xff]  ;;  %v7502_v27 = vld [vmem:[#allocation15_spill] sm:$0xff] }
 0x7be   :  { %3294 = vmatpush.msra.mxu3 %v6640_v28  ;;  %3406 = vmatpush.msrb.mxu0 %v6788_v8  ;;  %v6974_v28 = vld [vmem:[#allocation7 + $0x20] sm:$0xff]  ;;  %v7489_v8 = vld [vmem:[#allocation18_spill] sm:$0xff] }
 0x7bf   :  { %3568 = vmatmul.msk.f32.vlgmr.msrb.gmra.mxu3 %vm262_vm0, %v6922_v58  ;;  %3480 = vmatpush.msrb.mxu2 %v6790_v17  ;;  %v7491_v17 = vld [vmem:[#allocation49_spill] sm:$0xff] }
 0x7c0   :  { %3295 = vmatpush.msra.mxu3 %v6645_v18  ;;  %3407 = vmatpush.msrb.mxu0 %v6794_v55  ;;  %v7488_v18 = vld [vmem:[#allocation47_spill] sm:$0xff]  ;;  %v3014_v55 = vld [vmem:[#allocation7 + $0x10] sm:$0xff] }
 0x7c1   :  { %3037 = vmatpush.msrb.mxu1 %v6963_v61  ;;  %3481 = vmatpush.msrb.mxu2 %v6796_v23  ;;  %v7493_v23 = vld [vmem:[#allocation50_spill] sm:$0xff] }
 0x7c2   :  { %3312 = vmatpush.msrb.mxu3 %v6647_v38  ;;  %3408 = vmatpush.msrb.mxu0 %v7488_v18  ;;  %v3015_v38 = vld [vmem:[#allocation7 + $0x18] sm:$0xff] }
 0x7c3   :  { %3038 = vmatpush.msrb.mxu1 %v6968_v44  ;;  %3482 = vmatpush.msrb.mxu2 %v7490_v40 }
 0x7c4   :  { %3313 = vmatpush.msrb.mxu3 %v6651_v13  ;;  %3409 = vmatpush.msrb.mxu0 %v7491_v17  ;;  %v7492_v13 = vld [vmem:[#allocation19_spill] sm:$0xff] }
 0x7c5   :  { %3039 = vmatpush.msrb.mxu1 %v6974_v28  ;;  %3483 = vmatpush.msrb.mxu2 %v7493_v23 }
 0x7c6   :  { %3314 = vmatpush.msrb.mxu3 %v7489_v8  ;;  %3410 = vmatpush.msrb.mxu0 %v7494_v49 }
 0x7c7   :  { %3569 = vmatmul.msk.f32.vlgmr.msra.gmra.mxu3 %vm262_vm0, %v6922_v58  ;;  %3040 = vmatpush.msrb.mxu1 %v3015_v38 }
 0x7c8   :  { %3315 = vmatpush.msrb.mxu3 %v7492_v13  ;;  %3484 = vmatpush.msrb.mxu2 %v7495_v31  ;;  %v3325_v31 = vperm.slane %v3320_v12, 3 }
 0x7c9   :  { %3041 = vmatpush.msrb.mxu1 %v3014_v55  ;;  %3411 = vmatpush.msrb.mxu0 %v7496_v24 }
 0x7ca   :  { %3485 = vmatpush.msrb.mxu2 %v7497_v54 }
 0x7cb   :  { %3042 = vmatpush.msrb.mxu1 %v3013_v43  ;;  %3412 = vmatpush.msrb.mxu0 %v7498_v7  ;;  %v3324_v7 = vperm.slane %v3320_v12, 2 }
 0x7cc   :  { %3486 = vmatpush.msrb.mxu2 %v7499_v60 }
 0x7cd   :  { %3043 = vmatpush.msrb.mxu1 %v3012_v48  ;;  %3413 = vmatpush.msrb.mxu0 %v6839_v39  ;;  %v7508_v39 = vld [vmem:[#allocation22_spill] sm:$0xff] }
 0x7ce   :  { %3487 = vmatpush.msrb.mxu2 %v6841_v62  ;;  %v7509_v62 = vld [vmem:[#allocation23_spill] sm:$0xff] }
 0x7cf   :  { %3570 = vmatmul.msk.f32.vlgmr.msrb.gmra.mxu3 %vm262_vm0, %v6922_v58  ;;  %3197 = vmatpush.msra.mxu1 %v7500_v36 }
 0x7d0   :  { %3414 = vmatpush.msrb.mxu0 %v6845_v11  ;;  %3488 = vmatpush.msrb.mxu2 %v6847_v4  ;;  %v7511_v11 = vld [vmem:[#allocation43_spill] sm:$0xff]  ;;  %v7512_v4 = vld [vmem:[#allocation25_spill] sm:$0xff] }
 0x7d1   :  { %3198 = vmatpush.msra.mxu1 %v7501_v9 }
 0x7d3   :  { %3199 = vmatpush.msra.mxu1 %v7502_v27 }
 0x7d5   :  { %3200 = vmatpush.msra.mxu1 %v7503_v1 }
 0x7d7   :  { %3201 = vmatpush.msra.mxu1 %v7504_v26 }
 0x7d9   :  { %3202 = vmatpush.msra.mxu1 %v7505_v47 }
 0x7db   :  { %3203 = vmatpush.msra.mxu1 %v7506_v51 }
 0x7dd   :  { %3204 = vmatpush.msra.mxu1 %v7507_v35 }
 0x7df   :  { %3205 = vmatpush.msra.mxu1 %v7508_v39 }
 0x7e1   :  { %3206 = vmatpush.msra.mxu1 %v7509_v62 }
 0x7e3   :  { %3207 = vmatpush.msra.mxu1 %v7510_v0 }
 0x7e5   :  { %3208 = vmatpush.msra.mxu1 %v7511_v11 }
 0x7e7   :  { %3209 = vmatpush.msra.mxu1 %v7512_v4 }
 0x7e9   :  { %3210 = vmatpush.msra.mxu1 %v7513_v19 }
 0x7eb   :  { %3211 = vmatpush.msra.mxu1 %v7514_v14 }
 0x7ed   :  { %3212 = vmatpush.msra.mxu1 %v7515_v15 }
 0x82b   :  { %v2991_v50 = vpop.f32.mrf.mxu0 }
 0x82c   :  { %v2992_v2 = vadd.f32 %v3594_v52, %v2991_v50  ;;  %v3596_v50 = vld [vmem:[%s7060_s6] ss:$0 sm:$0xff] }
 0x82e   :  { %3680 = vtanh.f32 %v2992_v2 }
 0x832   :  { %v3174_v5 = vpop.f32.mrf.mxu3 }
 0x833   :  { %v3194_v46 = vpop.f32.mrf.mxu0 }
 0x834   :  { %v3681_v32 = vpop.eup %3680 }
 0x835   :  { %v2995_v45 = vmul.f32 %v3681_v32, %v6899_v53 }
 0x837   :  { %3044 = vmatmul.f32.vlgmr.msrb.gmra.mxu1 %v2995_v45 }
 0x838   :  { %3453 = vmatpush.msrb.mxu1 %v6904_v41 }
 0x83a   :  { %3454 = vmatpush.msrb.mxu1 %v6906_v22  ;;  %v3257_v57 = vpop.f32.mrf.mxu3 }
 0x83b   :  { %v3258_v16 = vadd.f32 %v3257_v57, %v3174_v5 }
 0x83c   :  { %3455 = vmatpush.msrb.mxu1 %v6911_v30 }
 0x83d   :  { %v3330_v25 = vadd.f32 %v3322_v10, %v3258_v16 }
 0x83e   :  { %3456 = vmatpush.msrb.mxu1 %v6926_v56 }
 0x83f   :  { %3213 = vmatmul.f32.vlgmr.msra.gmra.mxu1 %v6899_v53  ;;  %v3571_v6 = vmul.f32 -1.442695, %v3330_v25 }
 0x840   :  { %3457 = vmatpush.msrb.mxu1 %v6932_v63 }
 0x841   :  { %3682 = vpow2.f32 %v3571_v6 }
 0x842   :  { %3458 = vmatpush.msrb.mxu1 %v6938_v33  ;;  %v3277_v3 = vpop.f32.mrf.mxu3 }
 0x843   :  { %v3278_v42 = vadd.f32 %v3277_v3, %v3194_v46 }
 0x844   :  { %3459 = vmatpush.msrb.mxu1 %v6943_v34 }
 0x845   :  { %v3331_v29 = vadd.f32 %v3323_v59, %v3278_v42 }
 0x846   :  { %3460 = vmatpush.msrb.mxu1 %v6949_v20  ;;  %v3065_v20 = vpop.f32.mrf.mxu2 }
 0x847   :  { %v3572_v21 = vmul.f32 -1.442695, %v3331_v29  ;;  %v3683_v41 = vpop.eup %3682 }
 0x848   :  { %3461 = vmatpush.msrb.mxu1 %v6955_v37  ;;  %v3337_v22 = vadd.f32 1.0, %v3683_v41 }
 0x849   :  { %3684 = vpow2.f32 %v3572_v21 }
 0x84a   :  { %3462 = vmatpush.msrb.mxu1 %v6963_v61  ;;  %3686 = vrcp.f32 %v3337_v22  ;;  %v3297_v33 = vpop.f32.mrf.mxu3  ;;  %v3349_v13 = vand.u32 2147483648, %v3337_v22  ;;  %vm3343_vm12 = vweird.f32 %v3337_v22 }
 0x84c   :  { %3463 = vmatpush.msrb.mxu1 %v6968_v44 }
 0x84e   :  { %3464 = vmatpush.msrb.mxu1 %v6974_v28  ;;  %v3595_v28 = vld [vmem:[%s7063_s9] ss:$0 sm:$0xff]  ;;  %v3234_v49 = vpop.f32.mrf.mxu2 }
 0x84f   :  { %v3685_v30 = vpop.eup %3684 }
 0x850   :  { %3465 = vmatpush.msrb.mxu1 %v3015_v38  ;;  %v3356_v58 = vadd.f32 1.0, %v3685_v30  ;;  %v3687_v56 = vpop.eup %3686 }
 0x851   :  { %v3339_v63 = vmul.f32 %v3687_v56, %v3337_v22  ;;  %vm3344_vm0 = vweird.f32 %v3687_v56 }
 0x852   :  { %3466 = vmatpush.msrb.mxu1 %v3014_v55  ;;  %3688 = vrcp.f32 %v3356_v58  ;;  %v3317_v17 = vpop.f32.mrf.mxu3  ;;  %v3347_v55 = vand.u32 2147483647, %v3337_v22  ;;  %vm3345_vm13 = vmor %vm3343_vm12, %vm3344_vm0  ;;  %v3368_v51 = vand.u32 2147483648, %v3356_v58  ;;  %vm3362_vm1 = vweird.f32 %v3356_v58 }
 0x853   :  { %v3340_v34 = vsub.f32 1.0, %v3339_v63  ;;  %v3366_v35 = vand.u32 2147483647, %v3356_v58 }
 0x854   :  { %3467 = vmatpush.msrb.mxu1 %v3013_v43  ;;  %v3318_v43 = vadd.f32 %v3317_v17, %v3234_v49  ;;  %vm3348_vm14 = vcmp.eq.f32.partialorder %v3347_v55, 8.507059e+37  ;;  %v3369_v0 = vor.u32 1.1754944e-38, %v3368_v51 }
 0x855   :  { %v3341_v61 = vmul.f32 %v3687_v56, %v3340_v34  ;;  %vm3367_vm3 = vcmp.eq.f32.partialorder %v3366_v35, 8.507059e+37 }
 0x856   :  { %3468 = vmatpush.msrb.mxu1 %v3012_v48  ;;  %v3350_v48 = vor.u32 1.1754944e-38, %v3349_v13  ;;  %v3333_v9 = vadd.f32 %v3325_v31, %v3318_v43 }
 0x857   :  { %v3342_v8 = vadd.f32 %v3687_v56, %v3341_v61 }
 0x858   :  { %v3689_v37 = vpop.eup %3688 }
 0x859   :  { %v3358_v44 = vmul.f32 %v3689_v37, %v3356_v58  ;;  %v3346_v24 = vsel %vm3345_vm13, %v3687_v56, %v3342_v8  ;;  %vm3363_vm15 = vweird.f32 %v3689_v37 }
 0x85a   :  { %v3351_v60 = vsel %vm3348_vm14, %v3350_v48, %v3346_v24  ;;  %vm3364_vm2 = vmor %vm3362_vm1, %vm3363_vm15 }
 0x85b   :  { %v3359_v40 = vsub.f32 1.0, %v3358_v44  ;;  %v3372_v26 = vmul.f32 %v3351_v60, %v3333_v9 }
 0x85d   :  { %v3360_v54 = vmul.f32 %v3689_v37, %v3359_v40 }
 0x85f   :  { %v3361_v1 = vadd.f32 %v3689_v37, %v3360_v54 }
 0x861   :  { %v3365_v62 = vsel %vm3364_vm2, %v3689_v37, %v3361_v1 }
 0x862   :  { %v3370_v11 = vsel %vm3367_vm3, %v3369_v0, %v3365_v62 }
 0x863   :  { %v3375_v4 = vsub.f32 1.0, %v3370_v11  ;;  %v3377_v15 = vmul.f32 %v3370_v11, %v6899_v53  ;;  %v3597_v53 = vld [vmem:[%s7063_s9] ss:$0 sm:$0xff] }
 0x8b4   :  { %v3045_v18 = vpop.f32.mrf.mxu1 }
 0x8b5   :  { %v3066_v38 = vadd.f32 %v3065_v20, %v3045_v18 }
 0x8b7   :  { %v3072_v23 = vadd.f32 %v3595_v28, %v3066_v38 }
 0x8b9   :  { %3565 = vst [vmem:[%s7064_s10 + $0x30] sm:$0xff] %v3072_v23 }
 0x8bc   :  { %v3214_v36 = vpop.f32.mrf.mxu1 }
 0x8bd   :  { %v3298_v27 = vadd.f32 %v3297_v33, %v3214_v36 }
 0x8bf   :  { %v3332_v47 = vadd.f32 %v3324_v7, %v3298_v27 }
 0x8c1   :  { %v3373_v39 = vadd.f32 %v3372_v26, %v3332_v47 }
 0x8c3   :  { %3690 = vtanh.f32 %v3373_v39 }
 0x8c9   :  { %v3691_v19 = vpop.eup %3690 }
 0x8ca   :  { %v3376_v14 = vmul.f32 %v3691_v19, %v3375_v4 }
 0x8cc   :  { %v3378_v52 = vadd.f32 %v3377_v15, %v3376_v14 }
 0x8ce   :  { %3415 = vmatmul.f32.vlgmr.msrb.gmra.mxu0 %v3378_v52  ;;  %3500 = vst [vmem:[%s7065_s11] sm:$0xff] %v3378_v52  ;;  %3489 = vmatmul.f32.vlgmr.msrb.gmra.mxu2 %v3378_v52 }
 0x94b   :  { %v3416_v2 = vpop.f32.mrf.mxu0 }
 0x94c   :  { %v3417_v32 = vadd.f32 %v3596_v50, %v3416_v2 }
 0x94e   :  { %3692 = vtanh.f32 %v3417_v32 }
 0x951   :  { %v3490_v57 = vpop.f32.mrf.mxu2 }
 0x954   :  { %v3693_v45 = vpop.eup %3692 }
 0x955   :  { %v3420_v5 = vmul.f32 %v3693_v45, %v3378_v52 }
 0x957   :  { %3469 = vmatmul.f32.vlgmr.msrb.gmra.mxu1 %v3420_v5 }
 0x9d4   :  { %v3470_v12 = vpop.f32.mrf.mxu1 }
 0x9d5   :  { %v3491_v16 = vadd.f32 %v3490_v57, %v3470_v12 }
 0x9d7   :  { %v3497_v10 = vadd.f32 %v3597_v53, %v3491_v16 }
 0x9d9   :  { %3573 = vst [vmem:[%s7064_s10 + $0x38] sm:$0xff] %v3497_v10 }
 0x9da   :  { %3509 = vsyncpa [#allocation3], 1 }
 0x9db   :  { %3510 = vsyncpa [#allocation5], 1 }
 0x9dc   :  { %3511 = vsyncpa [#allocation8], 1 }

</bundles_post_ra>
